<compile_context>
chip_gen: v7x
topology: tpu7x:2x2x1
jax: 0.10.0
libtpu: 0.0.40
codegen_flags: <defaults>
</compile_context>

<pallas_src>
import jax
import jax.numpy as jnp
from jax.experimental import pallas as pl
from jax.experimental.pallas import tpu as pltpu


def _attention_vec(xc, w_sh, gs):
    """Per-channel spatial attention vector for one batch element.

    xc: (C, HW) mean-centered features (f32).  Returns (C, 1) =
    sum_hw softmax_hw(grouped_conv(xc)) * xc, with the grouped conv expressed
    as channel-shifted multiply-adds and the softmax normalization folded into
    the weighted sum.  Conv bias omitted (spatial softmax is bias-invariant).
    """
    C = xc.shape[0]
    n_shifts = 2 * gs - 1
    logits = w_sh[gs - 1] * xc                       # shift-0 term
    for idx in range(n_shifts):
        s = idx - (gs - 1)
        if s == 0:
            continue
        logits = logits + w_sh[idx] * pltpu.roll(xc, s % C, axis=0)
    # TODO(synk): for very large H*W a lane-chunked online softmax (running
    # max / running sums) would bound these slab-sized temporaries.
    logits = logits - jnp.max(logits, axis=1, keepdims=True)
    e = jnp.exp(logits)
    num = jnp.sum(e * xc, axis=1, keepdims=True)     # (C, 1)
    den = jnp.sum(e, axis=1, keepdims=True)          # (C, 1)
    return num * pl.reciprocal(den)                  # exact reciprocal on (C,1)


def acm_kernel(x1_ref, x2_ref, wk_ref, wq_ref, w1_ref, b1_ref, w2_ref, b2_ref,
               out1_ref, out2_ref, cos_ref):
    C = w2_ref.shape[0]
    bt = x1_ref.shape[0] // C
    gs = (wk_ref.shape[0] + 1) // 2

    # Hoisted: one VMEM read of each shift table per grid step.
    wk_sh = wk_ref[...]                              # (2*gs-1, C, 1)
    wq_sh = wq_ref[...]

    m1_cols, m2_cols, k_cols, q_cols = [], [], [], []
    # K branch of each batch element finishes before its Q branch (short live
    # ranges); only the packed (C, .) vectors survive this loop.
    for b in range(bt):
        rows = slice(b * C, (b + 1) * C)
        x1b = x1_ref[rows, :].astype(jnp.float32)
        m1 = jnp.mean(x1b, axis=1, keepdims=True)
        k_cols.append(_attention_vec(x1b - m1, wk_sh, gs))
        x2b = x2_ref[rows, :].astype(jnp.float32)
        m2 = jnp.mean(x2b, axis=1, keepdims=True)
        q_cols.append(_attention_vec(x2b - m2, wq_sh, gs))
        m1_cols.append(m1)
        m2_cols.append(m2)

    kv = jnp.concatenate(k_cols, axis=1)             # (C, bt) lane-stacked
    qv = jnp.concatenate(q_cols, axis=1)             # (C, bt)

    # Cosine loss for all bt batch elements at once; single tile store.
    # CosineSimilarity(dim=1, eps=1e-6): PyTorch clamps each norm separately.
    dots = jnp.sum(kv * qv, axis=0, keepdims=True)                  # (1, bt)
    nk = jnp.sqrt(jnp.sum(kv * kv, axis=0, keepdims=True))
    nq = jnp.sqrt(jnp.sum(qv * qv, axis=0, keepdims=True))
    cos = dots / (jnp.maximum(nk, 1e-6) * jnp.maximum(nq, 1e-6))    # (1, bt)
    if bt < 128:
        cos = jnp.concatenate([cos, jnp.zeros((1, 128 - bt), jnp.float32)], axis=1)
    cos_ref[...] = jnp.broadcast_to(cos, (8, 128))

    kq = kv + qv                                     # (C, bt): all that survives

    # Channel-gating MLP batched over all 2*bt mean vectors: 2 MXU matmuls/step.
    means = jnp.concatenate(m1_cols + m2_cols, axis=1)              # (C, 2*bt)
    h = jnp.maximum(
        jnp.dot(w1_ref[...], means, preferred_element_type=jnp.float32)
        + b1_ref[...], 0.0)                                         # (C//2, 2*bt)
    gates = jax.nn.sigmoid(
        jnp.dot(w2_ref[...], h, preferred_element_type=jnp.float32)
        + b2_ref[...])                                              # (C, 2*bt)

    out_dtype = out1_ref.dtype
    for b in range(bt):
        rows = slice(b * C, (b + 1) * C)
        kqb = kq[:, b:b + 1]                         # static lane slices
        g1 = gates[:, b:b + 1]
        g2 = gates[:, bt + b:bt + b + 1]
        out1_ref[rows, :] = (g1 * (x1_ref[rows, :].astype(jnp.float32) + kqb)).astype(out_dtype)
        out2_ref[rows, :] = (g2 * (x2_ref[rows, :].astype(jnp.float32) + kqb)).astype(out_dtype)


def _grouped_shift_table(w, gs):
    """(C, gs) grouped-conv weight -> (2*gs-1, C, 1) per-channel-shift table.

    With rolled_s[o] = x[(o - s) % C] (jnp.roll / pltpu.roll convention), the
    contribution of shift s to output channel o is w[o, (o % gs) - s] when that
    is a valid in-group column, else 0 (which also zeroes wraparound rows).
    """
    C = w.shape[0]
    o = jnp.arange(C)
    cols = []
    for idx in range(2 * gs - 1):
        s = idx - (gs - 1)
        j = (o % gs) - s
        valid = (j >= 0) & (j < gs)
        cols.append(jnp.where(valid, w[o, jnp.clip(j, 0, gs - 1)], 0.0))
    return jnp.stack(cols, axis=0)[:, :, None].astype(jnp.float32)


def _vmem_capacity_bytes():
    """Physical per-core VMEM, with a conservative fallback if unavailable."""
    try:
        return int(pltpu.get_tpu_info().vmem_capacity_bytes)
    except Exception:
        return 64 * 1024 * 1024


def acm_block(x1, x2, params, *, block_batch=None, out_dtype=None):
    # bk / bq are not needed by the kernel (spatial softmax is invariant to a
    # per-channel bias); they are kept in `params` for interface fidelity.
    wk, bk, wq, bq, w1, b1, w2, b2 = params
    del bk, bq
    B, C, H, W = x1.shape
    HW = H * W
    if C % 64 != 0:
        raise ValueError("ACMBlock uses groups=64; in_channels must be a multiple of 64")
    gs = C // 64
    out_dtype = jnp.dtype(x1.dtype if out_dtype is None else out_dtype)

    # ---- Generation-aware VMEM budgeting (v5e/v6e: 128 MiB, v7x: 64 MiB) ----
    vmem_cap = _vmem_capacity_bytes()
    big_vmem = vmem_cap >= 96 * 1024 * 1024
    if big_vmem:                                    # v5e / v6e class, single TC
        budget = 64 * 1024 * 1024
        vmem_limit = 100 * 1024 * 1024
    else:                                           # v7x class (or unknown)
        budget = 20 * 1024 * 1024
        vmem_limit = min(48 * 1024 * 1024, max(vmem_cap // 2, 8 * 1024 * 1024))

    lane_pad_hw = max(HW, 128)                      # VMEM rows pad lanes to 128
    slab_in = C * lane_pad_hw * jnp.dtype(x1.dtype).itemsize
    slab_out = C * lane_pad_hw * out_dtype.itemsize
    slab_f32 = C * lane_pad_hw * 4
    pipeline_per_b = 2 * (2 * slab_in + 2 * slab_out)   # double-buffered I/O tiles
    intermediates = 6 * slab_f32                         # upcast/logits/e/rolled temps
    if budget > intermediates + pipeline_per_b:
        max_bt = max(1, min(128, (budget - intermediates) // pipeline_per_b))
    else:
        max_bt = 1
    # TODO(synk): if the single-batch intermediates alone exceed the budget, a
    # spatially tiled / online-softmax variant is needed; not implemented here.

    if block_batch is None:
        cap = max_bt
        if (not big_vmem) and B >= 2:
            # 2-TC (v7x-class) parts: keep >= 2 grid steps so the "parallel"
            # grid axis can shard across both TensorCores.
            cap = min(cap, B // 2)
        cap = max(cap, 1)
        bt = max(d for d in range(1, B + 1) if B % d == 0 and d <= cap)
    else:
        bt = int(block_batch)
        if bt < 1 or B % bt != 0:
            raise ValueError("block_batch must be a positive divisor of the batch size")
    nsteps = B // bt

    x1f = x1.reshape(B * C, HW)
    x2f = x2.reshape(B * C, HW)
    wk_sh = _grouped_shift_table(wk, gs)            # (2*gs-1, C, 1)
    wq_sh = _grouped_shift_table(wq, gs)
    w1f = w1.astype(jnp.float32)
    w2f = w2.astype(jnp.float32)
    b1c = b1.reshape(C // 2, 1).astype(jnp.float32)
    b2c = b2.reshape(C, 1).astype(jnp.float32)

    row_spec = pl.BlockSpec((bt * C, HW), lambda i: (i, 0))

    def full(a):
        return pl.BlockSpec(a.shape, lambda i: (0,) * a.ndim)

    # TODO(synk): for HW < 128 the lane axis is under-occupied (50% at 8x8); a
    # lane-packed (C//r, r*HW) row layout (pure reshape, no transpose) with
    # segmented softmax reductions would make loads/stores lane-dense at the
    # cost of extra shift/mask bookkeeping for the grouped conv.
    out1f, out2f, cos = pl.pallas_call(
        acm_kernel,
        out_shape=(
            jax.ShapeDtypeStruct((B * C, HW), out_dtype),
            jax.ShapeDtypeStruct((B * C, HW), out_dtype),
            jax.ShapeDtypeStruct((nsteps * 8, 128), jnp.float32),   # per-step cosine tile
        ),
        grid=(nsteps,),
        in_specs=[
            row_spec, row_spec,
            full(wk_sh), full(wq_sh),
            full(w1f), full(b1c), full(w2f), full(b2c),
        ],
        out_specs=(
            row_spec, row_spec,
            pl.BlockSpec((8, 128), lambda i: (i, 0)),
        ),
        compiler_params=pltpu.CompilerParams(
            dimension_semantics=("parallel",),
            vmem_limit_bytes=vmem_limit),
    )(x1f, x2f, wk_sh, wq_sh, w1f, b1c, w2f, b2c)

    cos_per_batch = cos.reshape(nsteps, 8, 128)[:, 0, :bt].reshape(B)
    orth_loss = jnp.mean(cos_per_batch)
    return out1f.reshape(B, C, H, W), out2f.reshape(B, C, H, W), orth_loss


def acm_reference(x1, x2, params):
    """Pure-JAX NCHW reference mirroring the PyTorch module (for verification)."""
    wk, bk, wq, bq, w1, b1, w2, b2 = params
    B, C, H, W = x1.shape
    gs = wk.shape[1]
    G = C // gs
    mean1 = jnp.mean(x1, axis=(2, 3), keepdims=True)
    mean2 = jnp.mean(x2, axis=(2, 3), keepdims=True)
    x1_mu = x1 - mean1
    x2_mu = x2 - mean2

    def grouped_conv(x, w, b):
        xg = x.reshape(B, G, gs, H, W)
        wg = w.reshape(G, gs, gs)
        y = jnp.einsum('goi,bgihw->bgohw', wg, xg).reshape(B, C, H, W)
        return y + b.reshape(1, C, 1, 1)

    def conv1x1(x, w, b):
        return jnp.einsum('oc,bchw->bohw', w, x) + b.reshape(1, -1, 1, 1)

    K = grouped_conv(x1_mu, wk, bk)
    Q = grouped_conv(x2_mu, wq, bq)
    K = jax.nn.softmax(K.reshape(B, C, -1), axis=-1).reshape(B, C, H, W)
    Q = jax.nn.softmax(Q.reshape(B, C, -1), axis=-1).reshape(B, C, H, W)
    Kv = jnp.einsum('nchw,nchw->nc', K, x1_mu)
    Qv = jnp.einsum('nchw,nchw->nc', Q, x2_mu)

    def gp(m):
        h = jax.nn.relu(conv1x1(m, w1, b1))
        return jax.nn.sigmoid(conv1x1(h, w2, b2))

    kq = (Kv + Qv).reshape(B, C, 1, 1)
    out1 = gp(mean1) * (x1 + kq)
    out2 = gp(mean2) * (x2 + kq)
    nk = jnp.linalg.norm(Kv, axis=1)
    nq = jnp.linalg.norm(Qv, axis=1)
    cos = jnp.sum(Kv * Qv, axis=1) / (jnp.maximum(nk, 1e-6) * jnp.maximum(nq, 1e-6))
    return out1, out2, jnp.mean(cos)


def _make_params(key, C):
    gs = C // 64
    ks = jax.random.split(key, 8)
    wk = jax.random.normal(ks[0], (C, gs), jnp.float32) * (1.0 / float(gs) ** 0.5)
    bk = jax.random.normal(ks[1], (C,), jnp.float32) * 0.1
    wq = jax.random.normal(ks[2], (C, gs), jnp.float32) * (1.0 / float(gs) ** 0.5)
    bq = jax.random.normal(ks[3], (C,), jnp.float32) * 0.1
    w1 = jax.random.normal(ks[4], (C // 2, C), jnp.float32) * (1.0 / float(C) ** 0.5)
    b1 = jax.random.normal(ks[5], (C // 2,), jnp.float32) * 0.1
    w2 = jax.random.normal(ks[6], (C, C // 2), jnp.float32) * (1.0 / float(C // 2) ** 0.5)
    b2 = jax.random.normal(ks[7], (C,), jnp.float32) * 0.1
    return (wk, bk, wq, bq, w1, b1, w2, b2)


if __name__ == "__main__":
    key = jax.random.PRNGKey(0)
    run = jax.jit(acm_block, static_argnames=("block_batch", "out_dtype"))
    # (B, C, H, W, block_batch, in_dtype): covers gs in {1,2,4}, multi-step
    # grids, HW<128, and the bf16 low-precision I/O path.
    configs = [
        (2, 128, 16, 16, None, jnp.float32),
        (4, 128, 8, 8, 2, jnp.float32),
        (2, 64, 8, 8, None, jnp.float32),
        (2, 256, 8, 8, None, jnp.float32),
        (2, 128, 16, 16, None, jnp.bfloat16),
    ]
    for (B, C, H, W, bb, dt) in configs:
        key, k1, k2, kp = jax.random.split(key, 4)
        x1 = jax.random.normal(k1, (B, C, H, W), jnp.float32).astype(dt)
        x2 = jax.random.normal(k2, (B, C, H, W), jnp.float32).astype(dt)
        params = _make_params(kp, C)

        out1, out2, loss = run(x1, x2, params, block_batch=bb)
        jax.block_until_ready((out1, out2, loss))

        # Reference runs in f32 on the same (possibly bf16-rounded) inputs.
        r1, r2, rl = acm_reference(x1.astype(jnp.float32), x2.astype(jnp.float32), params)
        if dt == jnp.float32:
            o_atol = o_rtol = 1e-4
            l_atol = l_rtol = 5e-5
        else:  # bf16 outputs: ~2^-8 relative rounding on O(1-5) values
            o_atol = o_rtol = 4e-2
            l_atol = l_rtol = 1e-4
        assert jnp.allclose(out1.astype(jnp.float32), r1, atol=o_atol, rtol=o_rtol), \
            ("out1 mismatch", B, C, H, W, dt)
        assert jnp.allclose(out2.astype(jnp.float32), r2, atol=o_atol, rtol=o_rtol), \
            ("out2 mismatch", B, C, H, W, dt)
        assert jnp.allclose(loss, rl, atol=l_atol, rtol=l_rtol), \
            ("loss mismatch", B, C, H, W, dt)

    print("KERNEL_OK")
</pallas_src>

<mosaic_0001>
module attributes {stable_mosaic.version = 11 : i64} {
  func.func @acm_kernel(%arg0: i32, %arg1: memref<128x256xf32, #tpu.memory_space<vmem>>, %arg2: memref<128x256xf32, #tpu.memory_space<vmem>>, %arg3: memref<3x128x1xf32, #tpu.memory_space<vmem>>, %arg4: memref<3x128x1xf32, #tpu.memory_space<vmem>>, %arg5: memref<64x128xf32, #tpu.memory_space<vmem>>, %arg6: memref<64x1xf32, #tpu.memory_space<vmem>>, %arg7: memref<128x64xf32, #tpu.memory_space<vmem>>, %arg8: memref<128x1xf32, #tpu.memory_space<vmem>>, %arg9: memref<128x256xf32, #tpu.memory_space<vmem>>, %arg10: memref<128x256xf32, #tpu.memory_space<vmem>>, %arg11: memref<8x128xf32, #tpu.memory_space<vmem>>) attributes {dimension_semantics = [#tpu.dimension_semantics<parallel>], iteration_bounds = array<i64: 2>, scalar_prefetch = 0 : i64, scratch_operands = 0 : i64, tpu.core_type = #tpu.core_type<tc>, window_params = [{transform_indices = @transform_0, window_bounds = array<i64: 128, 256>}, {transform_indices = @transform_1, window_bounds = array<i64: 128, 256>}, {pipeline_mode = #tpu.pipeline_mode<synchronous>, transform_indices = @transform_2, window_bounds = array<i64: 3, 128, 1>}, {pipeline_mode = #tpu.pipeline_mode<synchronous>, transform_indices = @transform_3, window_bounds = array<i64: 3, 128, 1>}, {pipeline_mode = #tpu.pipeline_mode<synchronous>, transform_indices = @transform_4, window_bounds = array<i64: 64, 128>}, {pipeline_mode = #tpu.pipeline_mode<synchronous>, transform_indices = @transform_5, window_bounds = array<i64: 64, 1>}, {pipeline_mode = #tpu.pipeline_mode<synchronous>, transform_indices = @transform_6, window_bounds = array<i64: 128, 64>}, {pipeline_mode = #tpu.pipeline_mode<synchronous>, transform_indices = @transform_7, window_bounds = array<i64: 128, 1>}, {transform_indices = @transform_8, window_bounds = array<i64: 128, 256>}, {transform_indices = @transform_9, window_bounds = array<i64: 128, 256>}, {transform_indices = @transform_10, window_bounds = array<i64: 8, 128>}]} {
    %c0 = arith.constant 0 : index
    %c0_0 = arith.constant 0 : index
    %c0_1 = arith.constant 0 : index
    %0 = vector.load %arg3[%c0, %c0_0, %c0_1] : memref<3x128x1xf32, #tpu.memory_space<vmem>>, vector<3x128x1xf32>
    %c0_2 = arith.constant 0 : index
    %c0_3 = arith.constant 0 : index
    %c0_4 = arith.constant 0 : index
    %1 = vector.load %arg4[%c0_2, %c0_3, %c0_4] : memref<3x128x1xf32, #tpu.memory_space<vmem>>, vector<3x128x1xf32>
    %c0_5 = arith.constant 0 : index
    %c0_6 = arith.constant 0 : index
    %2 = vector.load %arg1[%c0_5, %c0_6] : memref<128x256xf32, #tpu.memory_space<vmem>>, vector<128x256xf32>
    %cst = arith.constant dense<0.000000e+00> : vector<128xf32>
    %3 = vector.multi_reduction <add>, %2, %cst [1] : vector<128x256xf32> to vector<128xf32>
    %4 = vector.shape_cast %3 : vector<128xf32> to vector<128x1xf32>
    %cst_7 = arith.constant 2.560000e+02 : f32
    %5 = vector.broadcast %cst_7 : f32 to vector<128x1xf32>
    %6 = arith.divf %4, %5 : vector<128x1xf32>
    %7 = vector.broadcast %6 : vector<128x1xf32> to vector<128x256xf32>
    %8 = arith.subf %2, %7 : vector<128x256xf32>
    %9 = vector.extract_strided_slice %0 {offsets = [1, 0, 0], sizes = [1, 128, 1], strides = [1, 1, 1]} : vector<3x128x1xf32> to vector<1x128x1xf32>
    %10 = vector.shape_cast %9 : vector<1x128x1xf32> to vector<128x1xf32>
    %11 = vector.broadcast %10 : vector<128x1xf32> to vector<128x256xf32>
    %12 = arith.mulf %11, %8 : vector<128x256xf32>
    %13 = vector.extract_strided_slice %0 {offsets = [0, 0, 0], sizes = [1, 128, 1], strides = [1, 1, 1]} : vector<3x128x1xf32> to vector<1x128x1xf32>
    %14 = vector.shape_cast %13 : vector<1x128x1xf32> to vector<128x1xf32>
    %c127_i32 = arith.constant 127 : i32
    %15 = tpu.dynamic_rotate %8 by %c127_i32 dim 0 : vector<128x256xf32>, i32 -> vector<128x256xf32>
    %16 = vector.broadcast %14 : vector<128x1xf32> to vector<128x256xf32>
    %17 = arith.mulf %16, %15 : vector<128x256xf32>
    %18 = arith.addf %12, %17 : vector<128x256xf32>
    %19 = vector.extract_strided_slice %0 {offsets = [2, 0, 0], sizes = [1, 128, 1], strides = [1, 1, 1]} : vector<3x128x1xf32> to vector<1x128x1xf32>
    %20 = vector.shape_cast %19 : vector<1x128x1xf32> to vector<128x1xf32>
    %c1_i32 = arith.constant 1 : i32
    %21 = tpu.dynamic_rotate %8 by %c1_i32 dim 0 : vector<128x256xf32>, i32 -> vector<128x256xf32>
    %22 = vector.broadcast %20 : vector<128x1xf32> to vector<128x256xf32>
    %23 = arith.mulf %22, %21 : vector<128x256xf32>
    %24 = arith.addf %18, %23 : vector<128x256xf32>
    %cst_8 = arith.constant dense<0xFF800000> : vector<128xf32>
    %25 = vector.multi_reduction <maximumf>, %24, %cst_8 [1] : vector<128x256xf32> to vector<128xf32>
    %26 = vector.shape_cast %25 : vector<128xf32> to vector<128x1xf32>
    %27 = vector.broadcast %26 : vector<128x1xf32> to vector<128x256xf32>
    %28 = arith.subf %24, %27 : vector<128x256xf32>
    %29 = math.exp %28 : vector<128x256xf32>
    %30 = arith.mulf %29, %8 : vector<128x256xf32>
    %cst_9 = arith.constant dense<0.000000e+00> : vector<128xf32>
    %31 = vector.multi_reduction <add>, %30, %cst_9 [1] : vector<128x256xf32> to vector<128xf32>
    %32 = vector.shape_cast %31 : vector<128xf32> to vector<128x1xf32>
    %cst_10 = arith.constant dense<0.000000e+00> : vector<128xf32>
    %33 = vector.multi_reduction <add>, %29, %cst_10 [1] : vector<128x256xf32> to vector<128xf32>
    %34 = vector.shape_cast %33 : vector<128xf32> to vector<128x1xf32>
    %35 = tpu.reciprocal %34 : vector<128x1xf32> -> vector<128x1xf32>
    %36 = arith.mulf %32, %35 : vector<128x1xf32>
    %c0_11 = arith.constant 0 : index
    %c0_12 = arith.constant 0 : index
    %37 = vector.load %arg2[%c0_11, %c0_12] : memref<128x256xf32, #tpu.memory_space<vmem>>, vector<128x256xf32>
    %cst_13 = arith.constant dense<0.000000e+00> : vector<128xf32>
    %38 = vector.multi_reduction <add>, %37, %cst_13 [1] : vector<128x256xf32> to vector<128xf32>
    %39 = vector.shape_cast %38 : vector<128xf32> to vector<128x1xf32>
    %cst_14 = arith.constant 2.560000e+02 : f32
    %40 = vector.broadcast %cst_14 : f32 to vector<128x1xf32>
    %41 = arith.divf %39, %40 : vector<128x1xf32>
    %42 = vector.broadcast %41 : vector<128x1xf32> to vector<128x256xf32>
    %43 = arith.subf %37, %42 : vector<128x256xf32>
    %44 = vector.extract_strided_slice %1 {offsets = [1, 0, 0], sizes = [1, 128, 1], strides = [1, 1, 1]} : vector<3x128x1xf32> to vector<1x128x1xf32>
    %45 = vector.shape_cast %44 : vector<1x128x1xf32> to vector<128x1xf32>
    %46 = vector.broadcast %45 : vector<128x1xf32> to vector<128x256xf32>
    %47 = arith.mulf %46, %43 : vector<128x256xf32>
    %48 = vector.extract_strided_slice %1 {offsets = [0, 0, 0], sizes = [1, 128, 1], strides = [1, 1, 1]} : vector<3x128x1xf32> to vector<1x128x1xf32>
    %49 = vector.shape_cast %48 : vector<1x128x1xf32> to vector<128x1xf32>
    %c127_i32_15 = arith.constant 127 : i32
    %50 = tpu.dynamic_rotate %43 by %c127_i32_15 dim 0 : vector<128x256xf32>, i32 -> vector<128x256xf32>
    %51 = vector.broadcast %49 : vector<128x1xf32> to vector<128x256xf32>
    %52 = arith.mulf %51, %50 : vector<128x256xf32>
    %53 = arith.addf %47, %52 : vector<128x256xf32>
    %54 = vector.extract_strided_slice %1 {offsets = [2, 0, 0], sizes = [1, 128, 1], strides = [1, 1, 1]} : vector<3x128x1xf32> to vector<1x128x1xf32>
    %55 = vector.shape_cast %54 : vector<1x128x1xf32> to vector<128x1xf32>
    %c1_i32_16 = arith.constant 1 : i32
    %56 = tpu.dynamic_rotate %43 by %c1_i32_16 dim 0 : vector<128x256xf32>, i32 -> vector<128x256xf32>
    %57 = vector.broadcast %55 : vector<128x1xf32> to vector<128x256xf32>
    %58 = arith.mulf %57, %56 : vector<128x256xf32>
    %59 = arith.addf %53, %58 : vector<128x256xf32>
    %cst_17 = arith.constant dense<0xFF800000> : vector<128xf32>
    %60 = vector.multi_reduction <maximumf>, %59, %cst_17 [1] : vector<128x256xf32> to vector<128xf32>
    %61 = vector.shape_cast %60 : vector<128xf32> to vector<128x1xf32>
    %62 = vector.broadcast %61 : vector<128x1xf32> to vector<128x256xf32>
    %63 = arith.subf %59, %62 : vector<128x256xf32>
    %64 = math.exp %63 : vector<128x256xf32>
    %65 = arith.mulf %64, %43 : vector<128x256xf32>
    %cst_18 = arith.constant dense<0.000000e+00> : vector<128xf32>
    %66 = vector.multi_reduction <add>, %65, %cst_18 [1] : vector<128x256xf32> to vector<128xf32>
    %67 = vector.shape_cast %66 : vector<128xf32> to vector<128x1xf32>
    %cst_19 = arith.constant dense<0.000000e+00> : vector<128xf32>
    %68 = vector.multi_reduction <add>, %64, %cst_19 [1] : vector<128x256xf32> to vector<128xf32>
    %69 = vector.shape_cast %68 : vector<128xf32> to vector<128x1xf32>
    %70 = tpu.reciprocal %69 : vector<128x1xf32> -> vector<128x1xf32>
    %71 = arith.mulf %67, %70 : vector<128x1xf32>
    %72 = arith.mulf %36, %71 : vector<128x1xf32>
    %cst_20 = arith.constant dense<0.000000e+00> : vector<1xf32>
    %73 = vector.multi_reduction <add>, %72, %cst_20 [0] : vector<128x1xf32> to vector<1xf32>
    %74 = vector.shape_cast %73 : vector<1xf32> to vector<1x1xf32>
    %75 = arith.mulf %36, %36 : vector<128x1xf32>
    %cst_21 = arith.constant dense<0.000000e+00> : vector<1xf32>
    %76 = vector.multi_reduction <add>, %75, %cst_21 [0] : vector<128x1xf32> to vector<1xf32>
    %77 = vector.shape_cast %76 : vector<1xf32> to vector<1x1xf32>
    %78 = math.sqrt %77 : vector<1x1xf32>
    %79 = arith.mulf %71, %71 : vector<128x1xf32>
    %cst_22 = arith.constant dense<0.000000e+00> : vector<1xf32>
    %80 = vector.multi_reduction <add>, %79, %cst_22 [0] : vector<128x1xf32> to vector<1xf32>
    %81 = vector.shape_cast %80 : vector<1xf32> to vector<1x1xf32>
    %82 = math.sqrt %81 : vector<1x1xf32>
    %cst_23 = arith.constant 9.99999997E-7 : f32
    %83 = vector.broadcast %cst_23 : f32 to vector<1x1xf32>
    %84 = arith.maximumf %78, %83 : vector<1x1xf32>
    %cst_24 = arith.constant 9.99999997E-7 : f32
    %85 = vector.broadcast %cst_24 : f32 to vector<1x1xf32>
    %86 = arith.maximumf %82, %85 : vector<1x1xf32>
    %87 = arith.mulf %84, %86 : vector<1x1xf32>
    %88 = arith.divf %74, %87 : vector<1x1xf32>
    %cst_25 = arith.constant 0.000000e+00 : f32
    %89 = vector.broadcast %cst_25 : f32 to vector<1x127xf32>
    %90 = tpu.concatenate %88, %89 in 1 : vector<1x1xf32>, vector<1x127xf32> -> vector<1x128xf32>
    %91 = vector.shape_cast %90 : vector<1x128xf32> to vector<1x128xf32>
    %92 = vector.broadcast %91 : vector<1x128xf32> to vector<8x128xf32>
    %c0_26 = arith.constant 0 : index
    %c0_27 = arith.constant 0 : index
    %93 = vector.load %arg11[%c0_26, %c0_27] : memref<8x128xf32, #tpu.memory_space<vmem>>, vector<8x128xf32>
    tpu.vector_store %arg11[%c0_26, %c0_27], %92 {strides = array<i32>} : memref<8x128xf32, #tpu.memory_space<vmem>>, vector<8x128xf32>,
    %94 = arith.addf %36, %71 : vector<128x1xf32>
    %95 = tpu.concatenate %6, %41 in 1 : vector<128x1xf32>, vector<128x1xf32> -> vector<128x2xf32>
    %c0_28 = arith.constant 0 : index
    %c0_29 = arith.constant 0 : index
    %96 = vector.load %arg5[%c0_28, %c0_29] : memref<64x128xf32, #tpu.memory_space<vmem>>, vector<64x128xf32>
    %cst_30 = arith.constant dense<0.000000e+00> : vector<64x2xf32>
    %97 = tpu.matmul %96, %95, %cst_30 {dimension_numbers = #tpu.dot_dimension_numbers<[1], [0], [0], [1], [0, 0, 1, 1], [], []>} : vector<64x128xf32>, vector<128x2xf32>, vector<64x2xf32> -> vector<64x2xf32>
    %c0_31 = arith.constant 0 : index
    %c0_32 = arith.constant 0 : index
    %98 = vector.load %arg6[%c0_31, %c0_32] : memref<64x1xf32, #tpu.memory_space<vmem>>, vector<64x1xf32>
    %99 = vector.broadcast %98 : vector<64x1xf32> to vector<64x2xf32>
    %100 = arith.addf %97, %99 : vector<64x2xf32>
    %cst_33 = arith.constant 0.000000e+00 : f32
    %101 = vector.broadcast %cst_33 : f32 to vector<64x2xf32>
    %102 = arith.maximumf %100, %101 : vector<64x2xf32>
    %c0_34 = arith.constant 0 : index
    %c0_35 = arith.constant 0 : index
    %103 = vector.load %arg7[%c0_34, %c0_35] : memref<128x64xf32, #tpu.memory_space<vmem>>, vector<128x64xf32>
    %cst_36 = arith.constant dense<0.000000e+00> : vector<128x2xf32>
    %104 = tpu.matmul %103, %102, %cst_36 {dimension_numbers = #tpu.dot_dimension_numbers<[1], [0], [0], [1], [0, 0, 1, 1], [], []>} : vector<128x64xf32>, vector<64x2xf32>, vector<128x2xf32> -> vector<128x2xf32>
    %c0_37 = arith.constant 0 : index
    %c0_38 = arith.constant 0 : index
    %105 = vector.load %arg8[%c0_37, %c0_38] : memref<128x1xf32, #tpu.memory_space<vmem>>, vector<128x1xf32>
    %106 = vector.broadcast %105 : vector<128x1xf32> to vector<128x2xf32>
    %107 = arith.addf %104, %106 : vector<128x2xf32>
    %108 = arith.negf %107 : vector<128x2xf32>
    %109 = math.exp %108 : vector<128x2xf32>
    %cst_39 = arith.constant 1.000000e+00 : f32
    %110 = vector.broadcast %cst_39 : f32 to vector<128x2xf32>
    %111 = arith.addf %110, %109 : vector<128x2xf32>
    %112 = arith.divf %110, %111 : vector<128x2xf32>
    %113 = vector.extract_strided_slice %112 {offsets = [0, 0], sizes = [128, 1], strides = [1, 1]} : vector<128x2xf32> to vector<128x1xf32>
    %114 = vector.extract_strided_slice %112 {offsets = [0, 1], sizes = [128, 1], strides = [1, 1]} : vector<128x2xf32> to vector<128x1xf32>
    %c0_40 = arith.constant 0 : index
    %c0_41 = arith.constant 0 : index
    %115 = vector.load %arg1[%c0_40, %c0_41] : memref<128x256xf32, #tpu.memory_space<vmem>>, vector<128x256xf32>
    %116 = vector.broadcast %94 : vector<128x1xf32> to vector<128x256xf32>
    %117 = arith.addf %115, %116 : vector<128x256xf32>
    %118 = vector.broadcast %113 : vector<128x1xf32> to vector<128x256xf32>
    %119 = arith.mulf %118, %117 : vector<128x256xf32>
    %c0_42 = arith.constant 0 : index
    %c0_43 = arith.constant 0 : index
    %120 = vector.load %arg9[%c0_42, %c0_43] : memref<128x256xf32, #tpu.memory_space<vmem>>, vector<128x256xf32>
    tpu.vector_store %arg9[%c0_42, %c0_43], %119 {strides = array<i32>} : memref<128x256xf32, #tpu.memory_space<vmem>>, vector<128x256xf32>,
    %c0_44 = arith.constant 0 : index
    %c0_45 = arith.constant 0 : index
    %121 = vector.load %arg2[%c0_44, %c0_45] : memref<128x256xf32, #tpu.memory_space<vmem>>, vector<128x256xf32>
    %122 = vector.broadcast %94 : vector<128x1xf32> to vector<128x256xf32>
    %123 = arith.addf %121, %122 : vector<128x256xf32>
    %124 = vector.broadcast %114 : vector<128x1xf32> to vector<128x256xf32>
    %125 = arith.mulf %124, %123 : vector<128x256xf32>
    %c0_46 = arith.constant 0 : index
    %c0_47 = arith.constant 0 : index
    %126 = vector.load %arg10[%c0_46, %c0_47] : memref<128x256xf32, #tpu.memory_space<vmem>>, vector<128x256xf32>
    tpu.vector_store %arg10[%c0_46, %c0_47], %125 {strides = array<i32>} : memref<128x256xf32, #tpu.memory_space<vmem>>, vector<128x256xf32>,
    return
  }
  func.func @transform_0(%arg0: i32) -> (i32, i32) {
    %c0_i32 = arith.constant 0 : i32
    %c0_i32_0 = arith.constant 0 : i32
    return %arg0, %c0_i32 : i32, i32
  }
  func.func @transform_1(%arg0: i32) -> (i32, i32) {
    %c0_i32 = arith.constant 0 : i32
    %c0_i32_0 = arith.constant 0 : i32
    return %arg0, %c0_i32 : i32, i32
  }
  func.func @transform_2(%arg0: i32) -> (i32, i32, i32) {
    %c0_i32 = arith.constant 0 : i32
    %c0_i32_0 = arith.constant 0 : i32
    %c0_i32_1 = arith.constant 0 : i32
    %c0_i32_2 = arith.constant 0 : i32
    return %c0_i32, %c0_i32_0, %c0_i32_1 : i32, i32, i32
  }
  func.func @transform_3(%arg0: i32) -> (i32, i32, i32) {
    %c0_i32 = arith.constant 0 : i32
    %c0_i32_0 = arith.constant 0 : i32
    %c0_i32_1 = arith.constant 0 : i32
    %c0_i32_2 = arith.constant 0 : i32
    return %c0_i32, %c0_i32_0, %c0_i32_1 : i32, i32, i32
  }
  func.func @transform_4(%arg0: i32) -> (i32, i32) {
    %c0_i32 = arith.constant 0 : i32
    %c0_i32_0 = arith.constant 0 : i32
    %c0_i32_1 = arith.constant 0 : i32
    return %c0_i32, %c0_i32_0 : i32, i32
  }
  func.func @transform_5(%arg0: i32) -> (i32, i32) {
    %c0_i32 = arith.constant 0 : i32
    %c0_i32_0 = arith.constant 0 : i32
    %c0_i32_1 = arith.constant 0 : i32
    return %c0_i32, %c0_i32_0 : i32, i32
  }
  func.func @transform_6(%arg0: i32) -> (i32, i32) {
    %c0_i32 = arith.constant 0 : i32
    %c0_i32_0 = arith.constant 0 : i32
    %c0_i32_1 = arith.constant 0 : i32
    return %c0_i32, %c0_i32_0 : i32, i32
  }
  func.func @transform_7(%arg0: i32) -> (i32, i32) {
    %c0_i32 = arith.constant 0 : i32
    %c0_i32_0 = arith.constant 0 : i32
    %c0_i32_1 = arith.constant 0 : i32
    return %c0_i32, %c0_i32_0 : i32, i32
  }
  func.func @transform_8(%arg0: i32) -> (i32, i32) {
    %c0_i32 = arith.constant 0 : i32
    %c0_i32_0 = arith.constant 0 : i32
    return %arg0, %c0_i32 : i32, i32
  }
  func.func @transform_9(%arg0: i32) -> (i32, i32) {
    %c0_i32 = arith.constant 0 : i32
    %c0_i32_0 = arith.constant 0 : i32
    return %arg0, %c0_i32 : i32, i32
  }
  func.func @transform_10(%arg0: i32) -> (i32, i32) {
    %c0_i32 = arith.constant 0 : i32
    %c0_i32_0 = arith.constant 0 : i32
    return %arg0, %c0_i32 : i32, i32
  }
}

</mosaic_0001>

<bundles_post_ra>
// kernel: acm_block.1
= control target key start
LH: loop header
LB: loop body
LE: loop exit
PB: predicated region body
PF: predicated region fallthrough
CT: control target
= control target key end

     0   :  { %s4350_s13 = smov 0   ;;  %s7941_s0 = inlined_call_operand.vmem [shape: f32[256,256], index: 0, kind: input, shape index: {}]   ;;  %s7942_s1 = inlined_call_operand.vmem [shape: f32[256,256], index: 1, kind: input, shape index: {}]   ;;  %s7943_s2 = inlined_call_operand.vmem [shape: f32[3,128,1], index: 2, kind: input, shape index: {}]   ;;  %s7944_s3 = inlined_call_operand.vmem [shape: f32[3,128,1], index: 3, kind: input, shape index: {}]   ;;  %s7945_s4 = inlined_call_operand.vmem [shape: f32[64,128], index: 4, kind: input, shape index: {}]   ;;  %s7946_s5 = inlined_call_operand.vmem [shape: f32[64,1], index: 5, kind: input, shape index: {}]   ;;  %s7947_s6 = inlined_call_operand.vmem [shape: f32[128,64], index: 6, kind: input, shape index: {}]   ;;  %s7948_s7 = inlined_call_operand.vmem [shape: f32[128,1], index: 7, kind: input, shape index: {}]   ;;  %s7949_s8 = inlined_call_operand.vmem [shape: f32[256,256], index: 8, kind: output, shape index: {0}]   ;;  %s7950_s9 = inlined_call_operand.vmem [shape: f32[256,256], index: 9, kind: output, shape index: {1}]   ;;  %s7951_s10 = inlined_call_operand.vmem [shape: f32[16,128], index: 10, kind: output, shape index: {2}]  }
   0x1 LB: > { %s4356_s14 = sadd.s32 4294967295, %s4291_s13   ;;  %p3721_p0 = scmp.ge.s32.totalorder %s4291_s13, 1  ;;  %s4291_s13 = sphi %s4350_s13, %s21_s13  }
   0x2   : > { %p331_p1 = scmp.lt.s32.totalorder %s4291_s13, 3 }
   0x4   : > { %p332_p2 = pnand %p3721_p0, %p331_p1 }
   0x6   : > { %335 = sbr.rel (%p332_p2) target bundleno = 1440 (0x5a0), region = 52 }
   0xd   : > { %s3722_s15 = sshll.u32 %s4356_s14, 4  ;;  %v7952_v0 = vmov 0   ;;  %v436_v49 = vld [vmem:[%s7943_s2 + $0x88] sm:$0xff]  ;;  %v437_v50 = vld [vmem:[%s7943_s2 + $0x90] sm:$0xff]  ;;  %v435_v51 = vld [vmem:[%s7943_s2 + $0x80] sm:$0xff]  ;;  %vm2570_vm2 = vcmask 7168  }
   0xe   : > { %p388_p3 = scmp.lt.s32.totalorder %s3722_s15, 31  ;;  %3964 = vset.pattern.permute.xlu1 %v7952_v0  ;;  %3963 = vset.pattern.permute.xlu0 %v7952_v0  ;;  %v438_v52 = vld [vmem:[%s7943_s2 + $0x98] sm:$0xff]  ;;  %v444_v53 = vld [vmem:[%s7943_s2 + $0xc8] sm:$0xff]  ;;  %v439_v54 = vld [vmem:[%s7943_s2 + $0xa0] sm:$0xff]  ;;  %vm2890_vm3 = vcmask 523264   ;;  %p415_p4 = scmp.lt.s32.totalorder %s4356_s14, 1 }
   0xf   : > { %v446_v55 = vld [vmem:[%s7943_s2 + $0xd8] sm:$0xff]  ;;  %v440_v56 = vld [vmem:[%s7943_s2 + $0xa8] sm:$0xff]  ;;  %v441_v58 = vld [vmem:[%s7943_s2 + $0xb0] sm:$0xff] }
  0x10   : > { %s8824_s15 = smov (!%p388_p3, %s3722_s15), 31  ;;  %v448_v57 = vld [vmem:[%s7943_s2 + $0xe8] sm:$0xff]  ;;  %v450_v59 = vld [vmem:[%s7943_s2 + $0xf8] sm:$0xff]  ;;  %v443_v62 = vld [vmem:[%s7943_s2 + $0xc0] sm:$0xff]  ;;  %s8826_s14 = smov (!%p415_p4, %s4356_s14), 1 }
  0x11   : > { %s4363_s16 = sshll.u32 %s8824_s15, 4  ;;  %v442_v60 = vld [vmem:[%s7943_s2 + $0xb8] sm:$0xff]  ;;  %v420_v61 = vld [vmem:[%s7943_s2 + $0x8] sm:$0xff]  ;;  %s3734_s18 = sshll.u32 %s8826_s14, 3 }
  0x12   : > { %s4369_s19 = scalar_lea.vmem %s7941_s0, %s4363_s16  ;;  %v422_v63 = vld [vmem:[%s7943_s2 + $0x18] sm:$0xff]  ;;  %s4707_s22 = scalar_lea.vmem %s7942_s1, %s4363_s16 }
  0x13   : > { %v4372_v1 = vld [vmem:[%s4369_s19 + $0x20] sm:$0xff]  ;;  %v4375_v2 = vld [vmem:[%s4369_s19 + $0x28] sm:$0xff]  ;;  %v4386_v6 = vld [vmem:[%s4369_s19 + $0x30] sm:$0xff]  ;;  %s418_s23 = scalar_lea.vmem %s7951_s10, %s3734_s18  ;;  %s7708_s25 = scalar_lea.vmem %s7949_s8, %s4363_s16 }
  0x14   : > { %v4378_v3 = vld [vmem:[%s4369_s19] sm:$0xff]  ;;  %v553_v4 = vadd.f32 %v4375_v2, %v4372_v1  ;;  %v4383_v5 = vld [vmem:[%s4369_s19 + $0x8] sm:$0xff]  ;;  %v4389_v7 = vld [vmem:[%s4369_s19 + $0x38] sm:$0xff]  ;;  %s7722_s28 = scalar_lea.vmem %s7950_s9, %s4363_s16 }
  0x15   : > { %v547_v8 = vadd.f32 %v4383_v5, %v4378_v3  ;;  %v4394_v9 = vld [vmem:[%s4369_s19 + $0x10] sm:$0xff]  ;;  %v4397_v10 = vld [vmem:[%s4369_s19 + $0x18] sm:$0xff]  ;;  %v556_v11 = vadd.f32 %v4389_v7, %v4386_v6  ;;  %v4410_v15 = vld [vmem:[%s4369_s19 + $0x40] sm:$0xff] }
  0x16   : > { %554 = vadd.xlane.f32.xlu1 %v553_v4  ;;  %v550_v12 = vadd.f32 %v4397_v10, %v4394_v9  ;;  %v4404_v13 = vld [vmem:[%s4369_s19 + $0x50] sm:$0xff]  ;;  %v4407_v14 = vld [vmem:[%s4369_s19 + $0x58] sm:$0xff]  ;;  %v4413_v16 = vld [vmem:[%s4369_s19 + $0x48] sm:$0xff] }
  0x17   : > { %548 = vadd.xlane.f32.xlu0 %v547_v8  ;;  %v562_v17 = vadd.f32 %v4407_v14, %v4404_v13  ;;  %v559_v18 = vadd.f32 %v4413_v16, %v4410_v15  ;;  %v4420_v19 = vld [vmem:[%s4369_s19 + $0x70] sm:$0xff]  ;;  %v4423_v20 = vld [vmem:[%s4369_s19 + $0x78] sm:$0xff]  ;;  %v4426_v21 = vld [vmem:[%s4369_s19 + $0x60] sm:$0xff] }
  0x18   : > { %v4429_v22 = vld [vmem:[%s4369_s19 + $0x68] sm:$0xff]  ;;  %v568_v23 = vadd.f32 %v4423_v20, %v4420_v19  ;;  %v4436_v25 = vld [vmem:[%s4369_s19 + $0x90] sm:$0xff]  ;;  %v4439_v26 = vld [vmem:[%s4369_s19 + $0x98] sm:$0xff] }
  0x19   : > { %v565_v24 = vadd.f32 %v4429_v22, %v4426_v21  ;;  %v4442_v27 = vld [vmem:[%s4369_s19 + $0x80] sm:$0xff]  ;;  %v4445_v28 = vld [vmem:[%s4369_s19 + $0x88] sm:$0xff]  ;;  %v574_v29 = vadd.f32 %v4439_v26, %v4436_v25  ;;  %v4452_v31 = vld [vmem:[%s4369_s19 + $0xb0] sm:$0xff] }
  0x1a   : > { %557 = vadd.xlane.f32.xlu1 %v556_v11  ;;  %v571_v30 = vadd.f32 %v4445_v28, %v4442_v27  ;;  %v4455_v32 = vld [vmem:[%s4369_s19 + $0xb8] sm:$0xff]  ;;  %v4458_v33 = vld [vmem:[%s4369_s19 + $0xa0] sm:$0xff]  ;;  %v4461_v34 = vld [vmem:[%s4369_s19 + $0xa8] sm:$0xff] }
  0x1b   : > { %551 = vadd.xlane.f32.xlu0 %v550_v12  ;;  %v580_v35 = vadd.f32 %v4455_v32, %v4452_v31  ;;  %v577_v36 = vadd.f32 %v4461_v34, %v4458_v33  ;;  %v4468_v37 = vld [vmem:[%s4369_s19 + $0xd0] sm:$0xff]  ;;  %v4471_v38 = vld [vmem:[%s4369_s19 + $0xd8] sm:$0xff]  ;;  %v4474_v39 = vld [vmem:[%s4369_s19 + $0xc0] sm:$0xff] }
  0x1c   : > { %v4477_v40 = vld [vmem:[%s4369_s19 + $0xc8] sm:$0xff]  ;;  %v586_v41 = vadd.f32 %v4471_v38, %v4468_v37  ;;  %v4484_v43 = vld [vmem:[%s4369_s19 + $0xf0] sm:$0xff]  ;;  %v4487_v44 = vld [vmem:[%s4369_s19 + $0xf8] sm:$0xff] }
  0x1d   : > { %v583_v42 = vadd.f32 %v4477_v40, %v4474_v39  ;;  %v4490_v45 = vld [vmem:[%s4369_s19 + $0xe0] sm:$0xff]  ;;  %v4493_v46 = vld [vmem:[%s4369_s19 + $0xe8] sm:$0xff]  ;;  %v592_v47 = vadd.f32 %v4487_v44, %v4484_v43  ;;  %v445_v4 = vld [vmem:[%s7943_s2 + $0xd0] sm:$0xff] }
  0x1e   : > { %563 = vadd.xlane.f32.xlu1 %v562_v17  ;;  %8135 = vst [vmem:[#allocation2_spill] sm:$0xff] %v4490_v45  ;;  %8136 = vst [vmem:[#allocation3_spill] sm:$0xff] %v4493_v46  ;;  %v589_v48 = vadd.f32 %v4493_v46, %v4490_v45  ;;  %v424_v8 = vld [vmem:[%s7943_s2 + $0x28] sm:$0xff]  ;;  %v447_v11 = vld [vmem:[%s7943_s2 + $0xe0] sm:$0xff] }
  0x1f   : > { %560 = vadd.xlane.f32.xlu0 %v559_v18  ;;  %v426_v12 = vld [vmem:[%s7943_s2 + $0x38] sm:$0xff]  ;;  %v449_v17 = vld [vmem:[%s7943_s2 + $0xf0] sm:$0xff]  ;;  %v428_v18 = vld [vmem:[%s7943_s2 + $0x48] sm:$0xff] }
  0x20   : > { %v1481_v46 = vld [vmem:[%s4707_s22 + $0x8] sm:$0xff]  ;;  %v1482_v45 = vld [vmem:[%s4707_s22 + $0x10] sm:$0xff] }
  0x22   : > { %569 = vadd.xlane.f32.xlu1 %v568_v23  ;;  %v419_v23 = vld [vmem:[%s7943_s2] sm:$0xff] }
  0x23   : > { %566 = vadd.xlane.f32.xlu0 %v565_v24  ;;  %v430_v24 = vld [vmem:[%s7943_s2 + $0x58] sm:$0xff] }
  0x26   : > { %575 = vadd.xlane.f32.xlu1 %v574_v29  ;;  %v421_v29 = vld [vmem:[%s7943_s2 + $0x10] sm:$0xff] }
  0x27   : > { %572 = vadd.xlane.f32.xlu0 %v571_v30  ;;  %v432_v30 = vld [vmem:[%s7943_s2 + $0x68] sm:$0xff] }
  0x2a   : > { %581 = vadd.xlane.f32.xlu1 %v580_v35  ;;  %v423_v35 = vld [vmem:[%s7943_s2 + $0x20] sm:$0xff] }
  0x2b   : > { %578 = vadd.xlane.f32.xlu0 %v577_v36  ;;  %v434_v36 = vld [vmem:[%s7943_s2 + $0x78] sm:$0xff] }
  0x2e   : > { %587 = vadd.xlane.f32.xlu1 %v586_v41  ;;  %v425_v41 = vld [vmem:[%s7943_s2 + $0x30] sm:$0xff] }
  0x2f   : > { %584 = vadd.xlane.f32.xlu0 %v583_v42  ;;  %v452_v42 = vld [vmem:[%s7943_s2 + $0x108] sm:$0xff] }
  0x32   : > { %593 = vadd.xlane.f32.xlu1 %v592_v47  ;;  %v427_v47 = vld [vmem:[%s7943_s2 + $0x40] sm:$0xff] }
  0x33   : > { %590 = vadd.xlane.f32.xlu0 %v589_v48  ;;  %v454_v48 = vld [vmem:[%s7943_s2 + $0x118] sm:$0xff] }
  0x43   : > { %651 = vperm.xlu1 %3964, %v436_v49   ;;  %v429_v49 = vld [vmem:[%s7943_s2 + $0x50] sm:$0xff] }
  0x47   : > { %656 = vperm.xlu1 %3964, %v437_v50   ;;  %v456_v50 = vld [vmem:[%s7943_s2 + $0x128] sm:$0xff] }
  0x49   : > { %646 = vperm.xlu0 %3963, %v435_v51   ;;  %v431_v51 = vld [vmem:[%s7943_s2 + $0x60] sm:$0xff] }
  0x4b   : > { %661 = vperm.xlu1 %3964, %v438_v52   ;;  %v458_v52 = vld [vmem:[%s7943_s2 + $0x138] sm:$0xff] }
  0x4d   : > { %691 = vperm.xlu0 %3963, %v444_v53   ;;  %v433_v53 = vld [vmem:[%s7943_s2 + $0x70] sm:$0xff] }
  0x4f   : > { %666 = vperm.xlu1 %3964, %v439_v54   ;;  %v460_v54 = vld [vmem:[%s7943_s2 + $0x148] sm:$0xff] }
  0x51   : > { %701 = vperm.xlu0 %3963, %v446_v55   ;;  %v451_v55 = vld [vmem:[%s7943_s2 + $0x100] sm:$0xff] }
  0x53   : > { %671 = vperm.xlu1 %3964, %v440_v56   ;;  %v462_v56 = vld [vmem:[%s7943_s2 + $0x158] sm:$0xff] }
  0x55   : > { %711 = vperm.xlu0 %3963, %v448_v57   ;;  %v453_v57 = vld [vmem:[%s7943_s2 + $0x110] sm:$0xff] }
  0x57   : > { %676 = vperm.xlu1 %3964, %v441_v58   ;;  %v464_v58 = vld [vmem:[%s7943_s2 + $0x168] sm:$0xff] }
  0x59   : > { %721 = vperm.xlu0 %3963, %v450_v59   ;;  %v455_v59 = vld [vmem:[%s7943_s2 + $0x120] sm:$0xff] }
  0x5b   : > { %681 = vperm.xlu1 %3964, %v442_v60   ;;  %v466_v60 = vld [vmem:[%s7943_s2 + $0x178] sm:$0xff] }
  0x5d   : > { %830 = vperm.xlu0 %3963, %v420_v61   ;;  %v457_v61 = vld [vmem:[%s7943_s2 + $0x130] sm:$0xff] }
  0x5f   : > { %686 = vperm.xlu1 %3964, %v443_v62   ;;  %v459_v62 = vld [vmem:[%s7943_s2 + $0x140] sm:$0xff] }
  0x61   : > { %840 = vperm.xlu0 %3963, %v422_v63   ;;  %v461_v63 = vld [vmem:[%s7943_s2 + $0x150] sm:$0xff] }
  0x63   : > { %696 = vperm.xlu1 %3964, %v445_v4  }
  0x65   : > { %850 = vperm.xlu0 %3963, %v424_v8  }
  0x67   : > { %706 = vperm.xlu1 %3964, %v447_v11   ;;  %v463_v11 = vld [vmem:[%s7943_s2 + $0x160] sm:$0xff] }
  0x69   : > { %860 = vperm.xlu0 %3963, %v426_v12  }
  0x6b   : > { %716 = vperm.xlu1 %3964, %v449_v17  }
  0x6d   : > { %870 = vperm.xlu0 %3963, %v428_v18   ;;  %v465_v18 = vld [vmem:[%s7943_s2 + $0x170] sm:$0xff] }
  0x6f   : > { %825 = vperm.xlu1 %3964, %v419_v23  }
  0x71   : > { %880 = vperm.xlu0 %3963, %v430_v24  }
  0x73   : > { %835 = vperm.xlu1 %3964, %v421_v29  }
  0x75   : > { %890 = vperm.xlu0 %3963, %v432_v30  }
  0x77   : > { %845 = vperm.xlu1 %3964, %v423_v35  }
  0x79   : > { %900 = vperm.xlu0 %3963, %v434_v36  }
  0x7b   : > { %855 = vperm.xlu1 %3964, %v425_v41  }
  0x7d   : > { %1039 = vperm.xlu0 %3963, %v452_v42  }
  0x7f   : > { %865 = vperm.xlu1 %3964, %v427_v47  }
  0x81   : > { %1049 = vperm.xlu0 %3963, %v454_v48  }
  0x83   : > { %875 = vperm.xlu1 %3964, %v429_v49  }
  0x85   : > { %1059 = vperm.xlu0 %3963, %v456_v50  }
  0x87   : > { %885 = vperm.xlu1 %3964, %v431_v51  }
  0x89   : > { %1069 = vperm.xlu0 %3963, %v458_v52  }
  0x8b   : > { %895 = vperm.xlu1 %3964, %v433_v53  }
  0x8d   : > { %1079 = vperm.xlu0 %3963, %v460_v54  }
  0x8f   : > { %1034 = vperm.xlu1 %3964, %v451_v55  }
  0x91   : > { %1089 = vperm.xlu0 %3963, %v462_v56  }
  0x93   : > { %1044 = vperm.xlu1 %3964, %v453_v57  }
  0x95   : > { %1099 = vperm.xlu0 %3963, %v464_v58  }
  0x97   : > { %1054 = vperm.xlu1 %3964, %v455_v59  }
  0x99   : > { %1109 = vperm.xlu0 %3963, %v466_v60  }
  0x9b   : > { %1064 = vperm.xlu1 %3964, %v457_v61  }
  0x9f   : > { %1074 = vperm.xlu1 %3964, %v459_v62  }
  0xa3   : > { %1084 = vperm.xlu1 %3964, %v461_v63   ;;  %v555_v4 = vpop.xlane.xlu1 %554 }
  0xa4   : > { %v549_v8 = vpop.xlane.xlu0 %548 }
  0xa7   : > { %1094 = vperm.xlu1 %3964, %v463_v11   ;;  %v558_v12 = vpop.xlane.xlu1 %557 }
  0xa8   : > { %v552_v17 = vpop.xlane.xlu0 %551 }
  0xab   : > { %1104 = vperm.xlu1 %3964, %v465_v18   ;;  %v564_v23 = vpop.xlane.xlu1 %563 }
  0xac   : > { %v4643_v24 = vpop.xlane.xlu0 %560 }
  0xaf   : > { %v4645_v29 = vpop.xlane.xlu1 %569 }
  0xb0   : > { %v4647_v30 = vpop.xlane.xlu0 %566 }
  0xb3   : > { %v4649_v35 = vpop.xlane.xlu1 %575 }
  0xb4   : > { %v4651_v36 = vpop.xlane.xlu0 %572 }
  0xb7   : > { %v4653_v41 = vpop.xlane.xlu1 %581 }
  0xb8   : > { %v4655_v42 = vpop.xlane.xlu0 %578 }
  0xbb   : > { %v4657_v47 = vpop.xlane.xlu1 %587 }
  0xbc   : > { %v4659_v48 = vpop.xlane.xlu0 %584 }
  0xbf   : > { %v4661_v49 = vpop.xlane.xlu1 %593 }
  0xc0   : > { %v4665_v51 = vpop.xlane.xlu0 %590 }
  0xc3   : > { %v4663_v50 = vpop.permute.xlu1 %651 }
  0xc7   : > { %v4667_v52 = vpop.permute.xlu1 %656 }
  0xc8   : > { %8137 = vst [vmem:[#allocation4_spill] sm:$0xff] %v4667_v52  ;;  %v4669_v53 = vpop.permute.xlu0 %646  ;;  %v4772_v52 = vmul.f32 0.00390625, %v564_v23 }
  0xc9   : > { %8138 = vst [vmem:[#allocation5_spill] sm:$0xff] %v4669_v53  ;;  %v1489_v53 = vld [vmem:[%s4707_s22 + $0x48] sm:$0xff] }
  0xca   : > { %8171 = vst [vmem:[#allocation38_spill] sm:$0xff] %v4772_v52 }
  0xcb   : > { %v4671_v54 = vpop.permute.xlu1 %661 }
  0xcc   : > { %8139 = vst [vmem:[#allocation6_spill] sm:$0xff] %v4671_v54  ;;  %v4673_v55 = vpop.permute.xlu0 %691 }
  0xcd   : > { %8140 = vst [vmem:[#allocation7_spill] sm:$0xff] %v4673_v55 }
  0xcf   : > { %v4675_v56 = vpop.permute.xlu1 %666 }
  0xd0   : > { %8141 = vst [vmem:[#allocation8_spill] sm:$0xff] %v4675_v56  ;;  %v4677_v57 = vpop.permute.xlu0 %701  ;;  %v1483_v56 = vld [vmem:[%s4707_s22 + $0x18] sm:$0xff] }
  0xd1   : > { %8142 = vst [vmem:[#allocation9_spill] sm:$0xff] %v4677_v57  ;;  %v788_v57 = vlaneseq }
  0xd3   : > { %v4679_v58 = vpop.permute.xlu1 %671 }
  0xd4   : > { %8143 = vst [vmem:[#allocation10_spill] sm:$0xff] %v4679_v58  ;;  %v4681_v59 = vpop.permute.xlu0 %711 }
  0xd5   : > { %8144 = vst [vmem:[#allocation11_spill] sm:$0xff] %v4681_v59 }
  0xd7   : > { %v4683_v60 = vpop.permute.xlu1 %676 }
  0xd8   : > { %8145 = vst [vmem:[#allocation12_spill] sm:$0xff] %v4683_v60  ;;  %v4685_v61 = vpop.permute.xlu0 %721  ;;  %v1480_v60 = vld [vmem:[%s4707_s22] sm:$0xff] }
  0xd9   : > { %8146 = vst [vmem:[#allocation13_spill] sm:$0xff] %v4685_v61 }
  0xdb   : > { %v4687_v62 = vpop.permute.xlu1 %681 }
  0xdc   : > { %8147 = vst [vmem:[#allocation14_spill] sm:$0xff] %v4687_v62  ;;  %v4689_v63 = vpop.permute.xlu0 %830 }
  0xdf   : > { %v4691_v11 = vpop.permute.xlu1 %686 }
  0xe0   : > { %8148 = vst [vmem:[#allocation15_spill] sm:$0xff] %v4691_v11  ;;  %v4693_v18 = vpop.permute.xlu0 %840  ;;  %v4711_v11 = vmul.f32 0.00390625, %v549_v8 }
  0xe1   : > { %8149 = vst [vmem:[#allocation16_spill] sm:$0xff] %v4693_v18  ;;  %v1484_v18 = vld [vmem:[%s4707_s22 + $0x20] sm:$0xff] }
  0xe2   : > { %8155 = vst [vmem:[#allocation22_spill] sm:$0xff] %v4711_v11 }
  0xe3   : > { %v4695_v0 = vpop.permute.xlu1 %696 }
  0xe4   : > { %8150 = vst [vmem:[#allocation17_spill] sm:$0xff] %v4695_v0  ;;  %v4697_v55 = vpop.permute.xlu0 %850  ;;  %v4709_v0 = vmul.f32 0.00390625, %v555_v4 }
  0xe5   : > { %8151 = vst [vmem:[#allocation18_spill] sm:$0xff] %v4697_v55  ;;  %v4719_v55 = vmul.f32 0.00390625, %v552_v17  ;;  %v1486_v17 = vld [vmem:[%s4707_s22 + $0x30] sm:$0xff] }
  0xe6   : > { %8154 = vst [vmem:[#allocation21_spill] sm:$0xff] %v4709_v0  ;;  %v4730_v4 = vsub.f32 %v4372_v1, %v4709_v0  ;;  %v4734_v8 = vsub.f32 %v4375_v2, %v4709_v0 }
  0xe7   : > { %v4699_v58 = vpop.permute.xlu1 %706  ;;  %8159 = vst [vmem:[#allocation26_spill] sm:$0xff] %v4719_v55 }
  0xe8   : > { %8152 = vst [vmem:[#allocation19_spill] sm:$0xff] %v4699_v58  ;;  %v4701_v59 = vpop.permute.xlu0 %860  ;;  %v4713_v58 = vmul.f32 0.00390625, %v558_v12  ;;  %8161 = vst [vmem:[#allocation28_spill] sm:$0xff] %v4730_v4  ;;  %v1485_v12 = vld [vmem:[%s4707_s22 + $0x28] sm:$0xff] }
  0xe9   : > { %8153 = vst [vmem:[#allocation20_spill] sm:$0xff] %v4701_v59  ;;  %v4715_v59 = vshrl.u32 %v788_v57, 7  ;;  %8162 = vst [vmem:[#allocation29_spill] sm:$0xff] %v4734_v8  ;;  %v1487_v57 = vld [vmem:[%s4707_s22 + $0x38] sm:$0xff] }
  0xea   : > { %8156 = vst [vmem:[#allocation23_spill] sm:$0xff] %v4713_v58  ;;  %v4749_v1 = vsub.f32 %v4386_v6, %v4713_v58  ;;  %v4756_v2 = vsub.f32 %v4389_v7, %v4713_v58  ;;  %v4768_v6 = vadd.f32 %v1481_v46, %v1480_v60  ;;  %v4774_v7 = vadd.f32 %v1483_v56, %v1482_v45 }
  0xeb   : > { %8157 = vst [vmem:[#allocation24_spill] sm:$0xff] %v4715_v59  ;;  %v4717_v62 = vpop.permute.xlu1 %716  ;;  %vm790_vm0 = vcmp.lt.s32.totalorder %v4715_v59, 7  ;;  %v4776_v58 = vadd.f32 %v1485_v12, %v1484_v18  ;;  %v761_v46 = vrot.slane %v4734_v8, 1  ;;  %vm999_vm1 = vcmp.lt.s32.totalorder %v4715_v59, 1 }
  0xec   : > { %8158 = vst [vmem:[#allocation25_spill] sm:$0xff] %v4717_v62  ;;  %v4721_v61 = vpop.permute.xlu0 %870  ;;  %v4741_v62 = vsub.f32 %v4378_v3, %v4711_v11  ;;  %8165 = vst [vmem:[#allocation32_spill] sm:$0xff] %v4749_v1  ;;  %v4760_v3 = vsub.f32 %v4394_v9, %v4719_v55  ;;  %v4778_v9 = vadd.f32 %v1487_v57, %v1486_v17  ;;  %v762_v23 = vrot.slane %v4749_v1, 1  ;;  %v1492_v17 = vld [vmem:[%s4707_s22 + $0x60] sm:$0xff]  ;;  %v1493_v57 = vld [vmem:[%s4707_s22 + $0x68] sm:$0xff] }
  0xed   : > { %8160 = vst [vmem:[#allocation27_spill] sm:$0xff] %v4721_v61  ;;  %v4745_v61 = vsub.f32 %v4383_v5, %v4711_v11  ;;  %8166 = vst [vmem:[#allocation33_spill] sm:$0xff] %v4756_v2  ;;  %v4764_v5 = vsub.f32 %v4397_v10, %v4719_v55  ;;  %v1488_v11 = vld [vmem:[%s4707_s22 + $0x40] sm:$0xff]  ;;  %v4781_v10 = vmul.f32 0.00390625, %v4643_v24  ;;  %v760_v55 = vrot.slane %v4730_v4, 1  ;;  %v1491_v24 = vld [vmem:[%s4707_s22 + $0x58] sm:$0xff] }
  0xee   : > { %8163 = vst [vmem:[#allocation30_spill] sm:$0xff] %v4741_v62  ;;  %8167 = vst [vmem:[#allocation34_spill] sm:$0xff] %v4760_v3  ;;  %v4793_v12 = vadd.f32 %v1489_v53, %v1488_v11  ;;  %v4806_v56 = vsub.f32 %v4404_v13, %v4772_v52  ;;  %v4810_v53 = vsub.f32 %v4407_v14, %v4772_v52 }
  0xef   : > { %8164 = vst [vmem:[#allocation31_spill] sm:$0xff] %v4745_v61  ;;  %v4752_v54 = vpop.permute.xlu1 %825  ;;  %8168 = vst [vmem:[#allocation35_spill] sm:$0xff] %v4764_v5  ;;  %v759_v60 = vrot.slane %v4764_v5, 1  ;;  %v4824_v13 = vadd.f32 %v1493_v57, %v1492_v17  ;;  %v4831_v14 = vsel %vm790_vm0, %v760_v55, %v762_v23 }
  0xf0   : > { %v4766_v0 = vpop.permute.xlu0 %880  ;;  %8170 = vst [vmem:[#allocation37_spill] sm:$0xff] %v4768_v6  ;;  %8172 = vst [vmem:[#allocation39_spill] sm:$0xff] %v4774_v7  ;;  %v4816_v6 = vsub.f32 %v4410_v15, %v4781_v10  ;;  %v766_v11 = vrot.slane %v4806_v56, 1 }
  0xf1   : > { %8169 = vst [vmem:[#allocation36_spill] sm:$0xff] %v4766_v0  ;;  %8173 = vst [vmem:[#allocation40_spill] sm:$0xff] %v4776_v58  ;;  %v1490_v0 = vld [vmem:[%s4707_s22 + $0x50] sm:$0xff]  ;;  %v763_v58 = vrot.slane %v4756_v2, 1 }
  0xf2   : > { %8174 = vst [vmem:[#allocation41_spill] sm:$0xff] %v4778_v9  ;;  %8175 = vst [vmem:[#allocation42_spill] sm:$0xff] %v4781_v10  ;;  %v758_v9 = vrot.slane %v4760_v3, 1  ;;  %v4822_v45 = vadd.f32 %v1491_v24, %v1490_v0  ;;  %v764_v52 = vrot.slane %v4816_v6, 1 }
  0xf3   : > { %v4790_v18 = vpop.permute.xlu1 %835  ;;  %8177 = vst [vmem:[#allocation44_spill] sm:$0xff] %v4793_v12  ;;  %8179 = vst [vmem:[#allocation46_spill] sm:$0xff] %v4806_v56  ;;  %v4846_v24 = vsel %vm790_vm0, %v761_v46, %v763_v58 }
  0xf4   : > { %8176 = vst [vmem:[#allocation43_spill] sm:$0xff] %v4790_v18  ;;  %v4801_v7 = vpop.permute.xlu0 %890  ;;  %8180 = vst [vmem:[#allocation47_spill] sm:$0xff] %v4810_v53  ;;  %v4827_v18 = vmul.f32 0.00390625, %v4647_v30  ;;  %v817_v0 = vsel %vm790_vm0, %v758_v9, %v760_v55  ;;  %v818_v30 = vsel %vm790_vm0, %v759_v60, %v761_v46 }
  0xf5   : > { %8178 = vst [vmem:[#allocation45_spill] sm:$0xff] %v4801_v7  ;;  %8181 = vst [vmem:[#allocation48_spill] sm:$0xff] %v4816_v6  ;;  %v4820_v7 = vsub.f32 %v4413_v16, %v4781_v10  ;;  %v4838_v16 = vmul.f32 0.00390625, %v4645_v29  ;;  %v905_v57 = vmul.f32 %v4689_v63, %v817_v0  ;;  %v906_v15 = vmul.f32 %v4689_v63, %v818_v30 }
  0xf6   : > { %8183 = vst [vmem:[#allocation50_spill] sm:$0xff] %v4822_v45  ;;  %8184 = vst [vmem:[#allocation51_spill] sm:$0xff] %v4824_v13  ;;  %v767_v29 = vrot.slane %v4810_v53, 1  ;;  %v8190_v10 = vrot.slane %v4741_v62, 1  ;;  %v4865_v0 = vsub.f32 %v4426_v21, %v4827_v18  ;;  %v4869_v63 = vsub.f32 %v4429_v22, %v4827_v18 }
  0xf7   : > { %8182 = vst [vmem:[#allocation49_spill] sm:$0xff] %v4820_v7  ;;  %8185 = vst [vmem:[#allocation52_spill] sm:$0xff] %v4827_v18  ;;  %v4833_v12 = vpop.permute.xlu1 %845  ;;  %v765_v55 = vrot.slane %v4820_v7, 1  ;;  %v726_v30 = vmul.f32 %v4663_v50, %v4760_v3  ;;  %v727_v13 = vmul.f32 %v4663_v50, %v4764_v5  ;;  %v8196_v21 = vrot.slane %v4760_v3, 7 }
  0xf8   : > { %8186 = vst [vmem:[#allocation53_spill] sm:$0xff] %v4833_v12  ;;  %8187 = vst [vmem:[#allocation54_spill] sm:$0xff] %v4838_v16  ;;  %v4848_v17 = vpop.permute.xlu0 %900  ;;  %v4860_v46 = vsel %vm790_vm0, %v8190_v10, %v758_v9  ;;  %v4878_v9 = vmul.f32 0.00390625, %v4649_v35  ;;  %v4881_v10 = vmul.f32 0.00390625, %v4651_v36  ;;  %v8198_v18 = vrot.slane %v4764_v5, 7 }
  0xf9   : > { %8188 = vst [vmem:[#allocation55_spill] sm:$0xff] %v4846_v24  ;;  %8189 = vst [vmem:[#allocation56_spill] sm:$0xff] %v4848_v17  ;;  %v8197_v17 = vrot.slane %v4741_v62, 7  ;;  %v8199_v53 = vrot.slane %v4745_v61, 7  ;;  %v937_v12 = vadd.f32 %v905_v57, %v726_v30  ;;  %v938_v36 = vadd.f32 %v906_v15, %v727_v13 }
  0xfa   : > { %8191 = vst [vmem:[#allocation57_spill] sm:$0xff] %v4865_v0  ;;  %8192 = vst [vmem:[#allocation58_spill] sm:$0xff] %v4869_v63  ;;  %v4897_v3 = vsub.f32 %v4420_v19, %v4838_v16  ;;  %v4901_v24 = vsub.f32 %v4423_v20, %v4838_v16  ;;  %v4921_v20 = vsub.f32 %v4442_v27, %v4881_v10  ;;  %v4941_v27 = vmul.f32 0.00390625, %v4655_v42 }
  0xfb   : > { %v4875_v45 = vpop.permute.xlu1 %855  ;;  %8194 = vst [vmem:[#allocation60_spill] sm:$0xff] %v4878_v9  ;;  %8195 = vst [vmem:[#allocation61_spill] sm:$0xff] %v4881_v10  ;;  %v1028_v22 = vsel %vm999_vm1, %v8197_v17, %v8196_v21  ;;  %v1029_v50 = vsel %vm999_vm1, %v8199_v53, %v8198_v18  ;;  %v4905_v17 = vsel %vm790_vm0, %v762_v23, %v764_v52  ;;  %v8200_v21 = vrot.slane %v4745_v61, 1 }
  0xfc   : > { %8193 = vst [vmem:[#allocation59_spill] sm:$0xff] %v4875_v45  ;;  %v1040_v45 = vpop.permute.xlu0 %1039  ;;  %v769_v53 = vrot.slane %v4869_v63, 1  ;;  %v4925_v23 = vsub.f32 %v4445_v28, %v4881_v10  ;;  %v814_v57 = vsel %vm790_vm0, %v763_v58, %v765_v55  ;;  %8207 = vst [vmem:[#allocation68_spill] sm:$0xff] %v4941_v27  ;;  %v770_v30 = vrot.slane %v4897_v3, 1 }
  0xfd   : > { %v1114_v35 = vmul.f32 %v1040_v45, %v1028_v22  ;;  %v1115_v56 = vmul.f32 %v1040_v45, %v1029_v50  ;;  %v820_v18 = vsel %vm790_vm0, %v8200_v21, %v759_v60  ;;  %v768_v45 = vrot.slane %v4865_v0, 1 }
  0xfe   : > { %v4928_v60 = vmul.f32 0.00390625, %v4653_v41  ;;  %v4946_v41 = vmul.f32 0.00390625, %v4661_v49  ;;  %v771_v58 = vrot.slane %v4901_v24, 1  ;;  %v4960_v42 = vsel %vm790_vm0, %v767_v29, %v769_v53 }
  0xff   : > { %v4913_v13 = vpop.permute.xlu1 %865  ;;  %v4915_v19 = vadd.f32 %v1114_v35, %v937_v12  ;;  %v4917_v15 = vadd.f32 %v1115_v56, %v938_v36  ;;  %v4934_v12 = vsub.f32 %v4436_v25, %v4878_v9  ;;  %v4938_v56 = vsub.f32 %v4439_v26, %v4878_v9  ;;  %8209 = vst [vmem:[#allocation70_spill] sm:$0xff] %v4960_v42 }
 0x100   : > { %8201 = vst [vmem:[#allocation62_spill] sm:$0xff] %v4913_v13  ;;  %8204 = vst [vmem:[#allocation65_spill] sm:$0xff] %v4928_v60  ;;  %v4952_v25 = vsel %vm790_vm0, %v764_v52, %v766_v11  ;;  %v4956_v26 = vsel %vm790_vm0, %v766_v11, %v768_v45  ;;  %v4964_v49 = vsel %vm790_vm0, %v765_v55, %v767_v29  ;;  %v772_v35 = vrot.slane %v4921_v20, 1  ;;  %v1050_v10 = vpop.permute.xlu0 %1049 }
 0x101   : > { %8202 = vst [vmem:[#allocation63_spill] sm:$0xff] %v4915_v19  ;;  %8203 = vst [vmem:[#allocation64_spill] sm:$0xff] %v4917_v15  ;;  %v1179_v28 = vmax.f32 %v4915_v19, %v4917_v15  ;;  %v4971_v52 = vsub.f32 %v4452_v31, %v4928_v60  ;;  %v4975_v11 = vsub.f32 %v4455_v32, %v4928_v60  ;;  %v773_v36 = vrot.slane %v4925_v23, 1 }
 0x102   : > { %8205 = vst [vmem:[#allocation66_spill] sm:$0xff] %v4934_v12  ;;  %8206 = vst [vmem:[#allocation67_spill] sm:$0xff] %v4938_v56  ;;  %v4981_v29 = vsub.f32 %v4458_v33, %v4941_v27  ;;  %v4985_v55 = vsub.f32 %v4461_v34, %v4941_v27  ;;  %v4994_v32 = vsub.f32 %v4484_v43, %v4946_v41  ;;  %v5005_v34 = vmul.f32 0.00390625, %v4659_v48 }
 0x103   : > { %8208 = vst [vmem:[#allocation69_spill] sm:$0xff] %v4946_v41  ;;  %1180 = vmax.xlane.f32.xlu0 %v1179_v28  ;;  %v4967_v50 = vpop.permute.xlu1 %875  ;;  %8211 = vst [vmem:[#allocation72_spill] sm:$0xff] %v4971_v52  ;;  %v4990_v28 = vmul.f32 0.00390625, %v4657_v47  ;;  %v4998_v22 = vsel %vm790_vm0, %v768_v45, %v770_v30  ;;  %v5002_v33 = vsel %vm790_vm0, %v769_v53, %v771_v58  ;;  %v8219_v47 = vrot.slane %v4749_v1, 7 }
 0x104   : > { %8210 = vst [vmem:[#allocation71_spill] sm:$0xff] %v4967_v50  ;;  %8212 = vst [vmem:[#allocation73_spill] sm:$0xff] %v4975_v11  ;;  %v5009_v31 = vsub.f32 %v4487_v44, %v4946_v41  ;;  %v8220_v43 = vrot.slane %v4730_v4, 7  ;;  %v8221_v45 = vrot.slane %v4756_v2, 7  ;;  %v8222_v60 = vrot.slane %v4734_v8, 7  ;;  %v8241_v50 = vld [vmem:[#allocation55_spill] sm:$0xff] }
 0x105   : > { %8213 = vst [vmem:[#allocation74_spill] sm:$0xff] %v4990_v28  ;;  %8214 = vst [vmem:[#allocation75_spill] sm:$0xff] %v4994_v32  ;;  %v5027_v44 = vsel %vm790_vm0, %v770_v30, %v772_v35  ;;  %v5031_v41 = vsel %vm790_vm0, %v771_v58, %v773_v36  ;;  %v8228_v30 = vrot.slane %v4938_v56, 1  ;;  %v5051_v27 = vsub.f32 %v4468_v37, %v4990_v28  ;;  %v8236_v37 = vld [vmem:[#allocation6_spill] sm:$0xff] }
 0x106   : > { %8215 = vst [vmem:[#allocation76_spill] sm:$0xff] %v4998_v22  ;;  %8216 = vst [vmem:[#allocation77_spill] sm:$0xff] %v5002_v33  ;;  %v1024_v21 = vsel %vm999_vm1, %v8220_v43, %v8219_v47  ;;  %v1025_v53 = vsel %vm999_vm1, %v8222_v60, %v8221_v45  ;;  %v8226_v60 = vrot.slane %v4934_v12, 1  ;;  %v5055_v47 = vsub.f32 %v4471_v38, %v4990_v28  ;;  %v8234_v43 = vld [vmem:[#allocation4_spill] sm:$0xff]  ;;  %v8327_v59 = vld [vmem:[#allocation70_spill] sm:$0xff] }
 0x107   : > { %8217 = vst [vmem:[#allocation78_spill] sm:$0xff] %v5005_v34  ;;  %8218 = vst [vmem:[#allocation79_spill] sm:$0xff] %v5009_v31  ;;  %v5023_v48 = vpop.permute.xlu1 %885  ;;  %v5047_v58 = vsel %vm790_vm0, %v773_v36, %v8228_v30  ;;  %v903_v36 = vmul.f32 %v4752_v54, %v4860_v46  ;;  %v5071_v38 = vsub.f32 %v4477_v40, %v5005_v34  ;;  %v5074_v9 = vmul.f32 0.00390625, %v4665_v51  ;;  %v8235_v46 = vld [vmem:[#allocation5_spill] sm:$0xff]  ;;  %v8237_v40 = vld [vmem:[#allocation16_spill] sm:$0xff] }
 0x108   : > { %8223 = vst [vmem:[#allocation80_spill] sm:$0xff] %v5023_v48  ;;  %8224 = vst [vmem:[#allocation81_spill] sm:$0xff] %v5027_v44  ;;  %v5041_v45 = vsel %vm790_vm0, %v772_v35, %v8226_v60  ;;  %v5061_v35 = vsub.f32 %v4474_v39, %v5005_v34  ;;  %v728_v39 = vmul.f32 %v8234_v43, %v4730_v4  ;;  %v8240_v48 = vrot.slane %v4994_v32, 7 }
 0x109   : > { %8225 = vst [vmem:[#allocation82_spill] sm:$0xff] %v5031_v41  ;;  %8227 = vst [vmem:[#allocation83_spill] sm:$0xff] %v5041_v45  ;;  %v904_v28 = vmul.f32 %v4752_v54, %v820_v18  ;;  %v724_v60 = vmul.f32 %v8235_v46, %v4741_v62  ;;  %v725_v16 = vmul.f32 %v8235_v46, %v4745_v61  ;;  %v8238_v54 = vld [vmem:[#allocation43_spill] sm:$0xff]  ;;  %v8242_v45 = vrot.slane %v4745_v61, 7 }
 0x10a   : > { %8229 = vst [vmem:[#allocation84_spill] sm:$0xff] %v5047_v58  ;;  %8230 = vst [vmem:[#allocation85_spill] sm:$0xff] %v5051_v27  ;;  %v730_v15 = vmul.f32 %v8236_v37, %v4749_v1  ;;  %v909_v34 = vmul.f32 %v8237_v40, %v4905_v17  ;;  %v731_v51 = vmul.f32 %v8236_v37, %v4756_v2  ;;  %v8243_v37 = vrot.slane %v5009_v31, 7 }
 0x10b   : > { %8231 = vst [vmem:[#allocation86_spill] sm:$0xff] %v5055_v47  ;;  %v5066_v30 = vpop.permute.xlu1 %895  ;;  %8233 = vst [vmem:[#allocation88_spill] sm:$0xff] %v5074_v9  ;;  %v910_v19 = vmul.f32 %v8237_v40, %v814_v57  ;;  %v907_v18 = vmul.f32 %v8238_v54, %v4831_v14  ;;  %v908_v58 = vmul.f32 %v8238_v54, %v8241_v50  ;;  %v8245_v50 = vld [vmem:[#allocation34_spill] sm:$0xff]  ;;  %v8247_v44 = vrot.slane %v4734_v8, 7 }
 0x10c   : > { %8232 = vst [vmem:[#allocation87_spill] sm:$0xff] %v5066_v30  ;;  %v8239_v30 = vrot.slane %v4741_v62, 7  ;;  %v1118_v13 = vmul.f32 %v1050_v10, %v1024_v21  ;;  %v1031_v57 = vsel %vm999_vm1, %v8243_v37, %v8242_v45  ;;  %v935_v14 = vadd.f32 %v903_v36, %v724_v60  ;;  %v8251_v36 = vld [vmem:[#allocation53_spill] sm:$0xff] }
 0x10d   : > { %v1119_v40 = vmul.f32 %v1050_v10, %v1025_v53  ;;  %v936_v41 = vadd.f32 %v904_v28, %v725_v16  ;;  %v8246_v21 = vrot.slane %v8245_v50, 7  ;;  %v8248_v42 = vrot.slane %v4764_v5, 7 }
 0x10e   : > { %v1030_v46 = vsel %vm999_vm1, %v8240_v48, %v8239_v30  ;;  %v729_v48 = vmul.f32 %v8234_v43, %v4734_v8  ;;  %v8244_v30 = vrot.slane %v4730_v4, 7  ;;  %v941_v53 = vadd.f32 %v909_v34, %v730_v15  ;;  %v8257_v34 = vld [vmem:[#allocation2_spill] sm:$0xff] }
 0x10f   : > { %v1035_v17 = vpop.permute.xlu1 %1034  ;;  %v1027_v10 = vsel %vm999_vm1, %v8248_v42, %v8247_v44  ;;  %v939_v28 = vadd.f32 %v907_v18, %v728_v39  ;;  %v942_v43 = vadd.f32 %v910_v19, %v731_v51  ;;  %v911_v60 = vmul.f32 %v8251_v36, %v4952_v25 }
 0x110   : > { %v1112_v33 = vmul.f32 %v1035_v17, %v1030_v46  ;;  %v1113_v22 = vmul.f32 %v1035_v17, %v1031_v57  ;;  %v1026_v54 = vsel %vm999_vm1, %v8246_v21, %v8244_v30  ;;  %v912_v46 = vmul.f32 %v8251_v36, %v4964_v49 }
 0x111   : > { %v940_v37 = vadd.f32 %v908_v58, %v729_v48  ;;  %v5128_v57 = vadd.f32 %v1118_v13, %v941_v53  ;;  %v5132_v42 = vadd.f32 %v1119_v40, %v942_v43  ;;  %v8256_v49 = vrot.slane %v4934_v12, 1  ;;  %v8258_v58 = vld [vmem:[#allocation3_spill] sm:$0xff] }
 0x112   : > { %v5120_v45 = vadd.f32 %v1112_v33, %v935_v14  ;;  %v5122_v16 = vadd.f32 %v1113_v22, %v936_v41  ;;  %v8254_v41 = vld [vmem:[#allocation8_spill] sm:$0xff]  ;;  %v8255_v22 = vrot.slane %v4981_v29, 1  ;;  %v780_v33 = vrot.slane %v5061_v35, 1 }
 0x113   : > { %v1045_v17 = vpop.permute.xlu1 %1044  ;;  %8252 = vst [vmem:[#allocation6_spill] sm:$0xff] %v5128_v57  ;;  %8253 = vst [vmem:[#allocation16_spill] sm:$0xff] %v5132_v42  ;;  %v732_v19 = vmul.f32 %v8254_v41, %v4816_v6  ;;  %v733_v25 = vmul.f32 %v8254_v41, %v4820_v7  ;;  %v5149_v44 = vsub.f32 %v8257_v34, %v5074_v9  ;;  %v8261_v40 = vrot.slane %v4816_v6, 7  ;;  %v8266_v34 = vld [vmem:[#allocation47_spill] sm:$0xff] }
 0x114   : > { %8249 = vst [vmem:[#allocation4_spill] sm:$0xff] %v5120_v45  ;;  %8250 = vst [vmem:[#allocation5_spill] sm:$0xff] %v5122_v16  ;;  %v1116_v30 = vmul.f32 %v1045_v17, %v1026_v54  ;;  %v1117_v21 = vmul.f32 %v1045_v17, %v1027_v10  ;;  %v1176_v15 = vmax.f32 %v5120_v45, %v5122_v16  ;;  %v8262_v48 = vrot.slane %v4749_v1, 7 }
 0x115   : > { %v5144_v13 = vsel %vm790_vm0, %v8256_v49, %v8255_v22  ;;  %v5153_v39 = vsub.f32 %v8258_v58, %v5074_v9  ;;  %v8263_v10 = vrot.slane %v4820_v7, 7  ;;  %v8264_v53 = vrot.slane %v4756_v2, 7  ;;  %v8265_v22 = vld [vmem:[#allocation46_spill] sm:$0xff] }
 0x116   : > { %1177 = vmax.xlane.f32.xlu1 %v1176_v15  ;;  %v5155_v51 = vadd.f32 %v1116_v30, %v939_v28  ;;  %v5157_v18 = vadd.f32 %v1117_v21, %v940_v37  ;;  %v1022_v54 = vsel %vm999_vm1, %v8262_v48, %v8261_v40  ;;  %v943_v36 = vadd.f32 %v911_v60, %v732_v19 }
 0x117   : > { %v1055_v14 = vpop.permute.xlu1 %1054  ;;  %v1023_v43 = vsel %vm999_vm1, %v8264_v53, %v8263_v10  ;;  %v944_v28 = vadd.f32 %v912_v46, %v733_v25  ;;  %v1185_v21 = vmax.f32 %v5128_v57, %v5132_v42  ;;  %v781_v15 = vrot.slane %v5071_v38, 1 }
 0x118   : > { %8259 = vst [vmem:[#allocation43_spill] sm:$0xff] %v5155_v51  ;;  %8260 = vst [vmem:[#allocation55_spill] sm:$0xff] %v5157_v18  ;;  %v1120_v17 = vmul.f32 %v1055_v14, %v1022_v54  ;;  %v1121_v37 = vmul.f32 %v1055_v14, %v1023_v43  ;;  %v1182_v30 = vmax.f32 %v5155_v51, %v5157_v18  ;;  %v786_v41 = vrot.slane %v4994_v32, 1  ;;  %v8293_v18 = vld [vmem:[#allocation40_spill] sm:$0xff] }
 0x119   : > { %v8012_v49 = vrot.slane %v8265_v22, 7  ;;  %v782_v40 = vrot.slane %v5051_v27, 1  ;;  %v787_v60 = vrot.slane %v5009_v31, 1  ;;  %v8269_v25 = vrot.slane %v4985_v55, 1 }
 0x11a   : > { %1183 = vmax.xlane.f32.xlu0 %v1182_v30  ;;  %1186 = vmax.xlane.f32.xlu1 %v1185_v21  ;;  %v5181_v46 = vadd.f32 %v1120_v17, %v943_v36  ;;  %v5183_v19 = vadd.f32 %v1121_v37, %v944_v28  ;;  %v8270_v14 = vrot.slane %v4938_v56, 1  ;;  %v783_v54 = vrot.slane %v5055_v47, 1 }
 0x11b   : > { %v784_v10 = vrot.slane %v5149_v44, 1  ;;  %v785_v53 = vrot.slane %v5153_v39, 1  ;;  %v8271_v43 = vrot.slane %v4971_v52, 1  ;;  %v8273_v17 = vrot.slane %v4981_v29, 1 }
 0x11c   : > { %8267 = vst [vmem:[#allocation53_spill] sm:$0xff] %v5181_v46  ;;  %8268 = vst [vmem:[#allocation8_spill] sm:$0xff] %v5183_v19  ;;  %v5191_v48 = vsel %vm790_vm0, %v8270_v14, %v8269_v25  ;;  %v8275_v30 = vrot.slane %v4975_v11, 1  ;;  %v8276_v21 = vmov %v8269_v25  ;;  %v1188_v14 = vmax.f32 %v5181_v46, %v5183_v19  ;;  %v8292_v46 = vld [vmem:[#allocation39_spill] sm:$0xff] }
 0x11d   : > { %v5200_v36 = vsel %vm790_vm0, %v8271_v43, %v780_v33  ;;  %v8272_v28 = vmov %v8271_v43  ;;  %v8282_v9 = vrot.slane %v8266_v34, 7  ;;  %v8283_v8 = vrot.slane %v4820_v7, 7  ;;  %v8287_v7 = vld [vmem:[#allocation37_spill] sm:$0xff] }
 0x11e   : > { %v5208_v37 = vsel %vm790_vm0, %v8273_v17, %v8272_v28  ;;  %v5216_v25 = vsel %vm790_vm0, %v8276_v21, %v8275_v30  ;;  %v8278_v43 = vmov %v8275_v30  ;;  %v8279_v28 = vrot.slane %v4741_v62, 1  ;;  %1189 = vmax.xlane.f32.xlu0 %v1188_v14  ;;  %1513 = vadd.xlane.f32.xlu1 %v8287_v7 }
 0x11f   : > { %8274 = vst [vmem:[#allocation2_spill] sm:$0xff] %v5208_v37  ;;  %8277 = vst [vmem:[#allocation3_spill] sm:$0xff] %v5216_v25  ;;  %v5224_v58 = vsel %vm790_vm0, %v8278_v43, %v781_v15  ;;  %v8281_v30 = vrot.slane %v4816_v6, 7  ;;  %v5246_v43 = vsel %vm999_vm1, %v8283_v8, %v8282_v9  ;;  %v8284_v4 = vrot.slane %v4745_v61, 1  ;;  %v1496_v25 = vld [vmem:[%s4707_s22 + $0x80] sm:$0xff]  ;;  %v1497_v37 = vld [vmem:[%s4707_s22 + $0x88] sm:$0xff] }
 0x120   : > { %v5230_v17 = vsel %vm790_vm0, %v786_v41, %v8279_v28  ;;  %v5256_v6 = vsel %vm790_vm0, %v780_v33, %v782_v40  ;;  %v5263_v8 = vsel %vm790_vm0, %v782_v40, %v784_v10  ;;  %v5267_v9 = vsel %vm790_vm0, %v783_v54, %v785_v53 }
 0x121   : > { %8280 = vst [vmem:[#allocation89_spill] sm:$0xff] %v5230_v17  ;;  %v5238_v21 = vsel %vm999_vm1, %v8281_v30, %v8012_v49  ;;  %v5252_v28 = vsel %vm790_vm0, %v787_v60, %v8284_v4  ;;  %8286 = vst [vmem:[#allocation91_spill] sm:$0xff] %v5256_v6  ;;  %v979_v30 = vrot.slane %v4865_v0, 7  ;;  %v981_v49 = vrot.slane %v4897_v3, 7  ;;  %v8303_v6 = vld [vmem:[#allocation44_spill] sm:$0xff] }
 0x122   : > { %8285 = vst [vmem:[#allocation90_spill] sm:$0xff] %v5252_v28  ;;  %8288 = vst [vmem:[#allocation37_spill] sm:$0xff] %v5267_v9  ;;  %v5271_v4 = vsel %vm790_vm0, %v781_v15, %v783_v54  ;;  %v980_v33 = vrot.slane %v4869_v63, 7  ;;  %v982_v2 = vrot.slane %v4901_v24, 7  ;;  %v5277_v14 = vsel %vm790_vm0, %v784_v10, %v786_v41  ;;  %1516 = vadd.xlane.f32.xlu0 %v8292_v46 }
 0x123   : > { %8289 = vst [vmem:[#allocation92_spill] sm:$0xff] %v5271_v4  ;;  %8290 = vst [vmem:[#allocation93_spill] sm:$0xff] %v5277_v14  ;;  %v983_v7 = vrot.slane %v4921_v20, 7  ;;  %v984_v40 = vrot.slane %v4925_v23, 7  ;;  %v985_v1 = vrot.slane %v4934_v12, 7  ;;  %v986_v61 = vrot.slane %v4938_v56, 7  ;;  %1519 = vadd.xlane.f32.xlu1 %v8293_v18 }
 0x124   : > { %v987_v62 = vrot.slane %v4981_v29, 7  ;;  %v989_v15 = vrot.slane %v4971_v52, 7  ;;  %v5287_v54 = vsel %vm999_vm1, %v979_v30, %v981_v49  ;;  %v5291_v41 = vsel %vm790_vm0, %v785_v53, %v787_v60  ;;  %v8294_v60 = vld [vmem:[#allocation7_spill] sm:$0xff]  ;;  %v8298_v14 = vld [vmem:[#allocation9_spill] sm:$0xff] }
 0x125   : > { %8291 = vst [vmem:[#allocation94_spill] sm:$0xff] %v5291_v41  ;;  %v988_v10 = vrot.slane %v4985_v55, 7  ;;  %v990_v19 = vrot.slane %v4975_v11, 7  ;;  %v991_v51 = vrot.slane %v5061_v35, 7  ;;  %v992_v42 = vrot.slane %v5071_v38, 7  ;;  %v8302_v4 = vld [vmem:[#allocation41_spill] sm:$0xff] }
 0x126   : > { %v993_v57 = vrot.slane %v5051_v27, 7  ;;  %v994_v16 = vrot.slane %v5055_v47, 7  ;;  %v5303_v53 = vmul.f32 %v8294_v60, %v4934_v12  ;;  %v5307_v45 = vsel %vm999_vm1, %v980_v33, %v982_v2  ;;  %1522 = vadd.xlane.f32.xlu0 %v8302_v4 }
 0x127   : > { %v995_v46 = vrot.slane %v5149_v44, 7  ;;  %v996_v18 = vrot.slane %v5153_v39, 7  ;;  %v5313_v5 = vmul.f32 %v8294_v60, %v4938_v56  ;;  %v5317_v50 = vsel %vm999_vm1, %v983_v7, %v985_v1  ;;  %v5335_v56 = vpop.permute.xlu0 %1059  ;;  %1525 = vadd.xlane.f32.xlu1 %v8303_v6 }
 0x128   : > { %8295 = vst [vmem:[#allocation39_spill] sm:$0xff] %v5317_v50  ;;  %v5321_v12 = vsel %vm999_vm1, %v984_v40, %v986_v61  ;;  %v5325_v41 = vsel %vm999_vm1, %v987_v62, %v989_v15  ;;  %v5329_v28 = vmul.f32 %v8298_v14, %v4971_v52  ;;  %v5333_v60 = vmul.f32 %v8298_v14, %v4975_v11 }
 0x129   : > { %8296 = vst [vmem:[#allocation40_spill] sm:$0xff] %v5321_v12  ;;  %8297 = vst [vmem:[#allocation7_spill] sm:$0xff] %v5325_v41  ;;  %v5339_v17 = vsel %vm999_vm1, %v988_v10, %v990_v19  ;;  %v1494_v41 = vld [vmem:[%s4707_s22 + $0x70] sm:$0xff]  ;;  %v5346_v52 = vsel %vm999_vm1, %v991_v51, %v993_v57  ;;  %v5350_v14 = vsel %vm999_vm1, %v992_v42, %v994_v16  ;;  %v8306_v11 = vrot.slane %v8265_v22, 7 }
 0x12a   : > { %8299 = vst [vmem:[#allocation9_spill] sm:$0xff] %v5329_v28  ;;  %8300 = vst [vmem:[#allocation95_spill] sm:$0xff] %v5333_v60  ;;  %v8307_v4 = vrot.slane %v8266_v34, 7  ;;  %v8311_v9 = vrot.slane %v5009_v31, 7  ;;  %v8313_v60 = vld [vmem:[#allocation11_spill] sm:$0xff]  ;;  %v1502_v28 = vld [vmem:[%s4707_s22 + $0xb0] sm:$0xff] }
 0x12b   : > { %8301 = vst [vmem:[#allocation96_spill] sm:$0xff] %v5339_v17  ;;  %8304 = vst [vmem:[#allocation41_spill] sm:$0xff] %v5346_v52  ;;  %v5356_v17 = vsel %vm999_vm1, %v8306_v11, %v979_v30  ;;  %v1495_v52 = vld [vmem:[%s4707_s22 + $0x78] sm:$0xff]  ;;  %v8309_v11 = vrot.slane %v4994_v32, 7 }
 0x12c   : > { %8305 = vst [vmem:[#allocation44_spill] sm:$0xff] %v5350_v14  ;;  %v5362_v6 = vsel %vm999_vm1, %v8307_v4, %v980_v33  ;;  %v8308_v14 = vld [vmem:[#allocation10_spill] sm:$0xff]  ;;  %v5381_v33 = vsel %vm999_vm1, %v996_v18, %v8311_v9  ;;  %v1498_v4 = vld [vmem:[%s4707_s22 + $0x90] sm:$0xff]  ;;  %v5399_v9 = vsel %vm999_vm1, %v982_v2, %v984_v40  ;;  %v1505_v40 = vld [vmem:[%s4707_s22 + $0xc8] sm:$0xff] }
 0x12d   : > { %v734_v12 = vmul.f32 %v8308_v14, %v8265_v22  ;;  %v735_v50 = vmul.f32 %v8308_v14, %v8266_v34  ;;  %v5375_v30 = vsel %vm999_vm1, %v995_v46, %v8309_v11  ;;  %8312 = vst [vmem:[#allocation97_spill] sm:$0xff] %v5381_v33  ;;  %v1499_v22 = vld [vmem:[%s4707_s22 + $0x98] sm:$0xff]  ;;  %v5387_v14 = vmul.f32 %v8313_v60, %v5051_v27  ;;  %v1500_v33 = vld [vmem:[%s4707_s22 + $0xa0] sm:$0xff] }
 0x12e   : > { %8310 = vst [vmem:[#allocation10_spill] sm:$0xff] %v5375_v30  ;;  %v5391_v34 = vmul.f32 %v8313_v60, %v5055_v47  ;;  %v5395_v11 = vsel %vm999_vm1, %v981_v49, %v983_v7  ;;  %8315 = vst [vmem:[#allocation98_spill] sm:$0xff] %v5399_v9  ;;  %v1501_v30 = vld [vmem:[%s4707_s22 + $0xa8] sm:$0xff]  ;;  %v5406_v27 = vsel %vm999_vm1, %v985_v1, %v987_v62  ;;  %v8316_v60 = vld [vmem:[#allocation50_spill] sm:$0xff] }
 0x12f   : > { %1528 = vadd.xlane.f32.xlu0 %v8316_v60  ;;  %v8317_v47 = vld [vmem:[#allocation51_spill] sm:$0xff]  ;;  %v1533_v49 = vadd.f32 %v1495_v52, %v1494_v41  ;;  %v1536_v7 = vadd.f32 %v1497_v37, %v1496_v25  ;;  %v1504_v2 = vld [vmem:[%s4707_s22 + $0xc0] sm:$0xff]  ;;  %v5415_v9 = vsel %vm999_vm1, %v986_v61, %v988_v10  ;;  %v5419_v62 = vsel %vm999_vm1, %v989_v15, %v991_v51  ;;  %v1507_v37 = vld [vmem:[%s4707_s22 + $0xd8] sm:$0xff]  ;;  %v1070_v51 = vpop.permute.xlu0 %1069 }
 0x130   : > { %8314 = vst [vmem:[#allocation11_spill] sm:$0xff] %v5391_v34  ;;  %1531 = vadd.xlane.f32.xlu1 %v8317_v47  ;;  %v1503_v34 = vld [vmem:[%s4707_s22 + $0xb8] sm:$0xff]  ;;  %8318 = vst [vmem:[#allocation50_spill] sm:$0xff] %v5415_v9  ;;  %v5423_v1 = vsel %vm999_vm1, %v990_v19, %v992_v42  ;;  %v5427_v52 = vsel %vm999_vm1, %v993_v57, %v995_v46  ;;  %v1506_v47 = vld [vmem:[%s4707_s22 + $0xd0] sm:$0xff]  ;;  %v5442_v42 = vsel %vm999_vm1, %v994_v16, %v996_v18 }
 0x131   : > { %8319 = vst [vmem:[#allocation51_spill] sm:$0xff] %v5419_v62  ;;  %8320 = vst [vmem:[#allocation99_spill] sm:$0xff] %v5423_v1  ;;  %v1508_v25 = vld [vmem:[%s4707_s22 + $0xe0] sm:$0xff]  ;;  %v8322_v41 = vld [vmem:[#allocation12_spill] sm:$0xff]  ;;  %v1539_v19 = vadd.f32 %v1499_v22, %v1498_v4  ;;  %v1065_v1 = vpop.permute.xlu1 %1064  ;;  %v1542_v62 = vadd.f32 %v1501_v30, %v1500_v33  ;;  %v1545_v22 = vadd.f32 %v1503_v34, %v1502_v28 }
 0x132   : > { %8321 = vst [vmem:[#allocation100_spill] sm:$0xff] %v5427_v52  ;;  %v5434_v60 = vmul.f32 %v8322_v41, %v4865_v0  ;;  %v5438_v61 = vmul.f32 %v8322_v41, %v4869_v63  ;;  %8323 = vst [vmem:[#allocation12_spill] sm:$0xff] %v5442_v42  ;;  %v1509_v15 = vld [vmem:[%s4707_s22 + $0xe8] sm:$0xff]  ;;  %v1510_v57 = vld [vmem:[%s4707_s22 + $0xf0] sm:$0xff]  ;;  %v1548_v18 = vadd.f32 %v1505_v40, %v1504_v2 }
 0x133   : > { %v1511_v10 = vld [vmem:[%s4707_s22 + $0xf8] sm:$0xff]  ;;  %v8326_v41 = vld [vmem:[#allocation18_spill] sm:$0xff]  ;;  %1534 = vadd.xlane.f32.xlu0 %v1533_v49  ;;  %v1554_v42 = vadd.f32 %v1509_v15, %v1508_v25  ;;  %v1123_v25 = vmul.f32 %v5335_v56, %v5246_v43 }
 0x134   : > { %v8324_v46 = vld [vmem:[#allocation13_spill] sm:$0xff]  ;;  %v913_v63 = vmul.f32 %v8326_v41, %v4956_v26  ;;  %v914_v16 = vmul.f32 %v8326_v41, %v8327_v59  ;;  %1537 = vadd.xlane.f32.xlu1 %v1536_v7  ;;  %v8328_v4 = vld [vmem:[#allocation14_spill] sm:$0xff]  ;;  %v5461_v9 = vadd.f32 %v1511_v10, %v1510_v57  ;;  %v8329_v26 = vld [vmem:[#allocation15_spill] sm:$0xff] }
 0x135   : > { %v5449_v52 = vmul.f32 %v8324_v46, %v4994_v32  ;;  %v5453_v0 = vmul.f32 %v8324_v46, %v5009_v31  ;;  %v738_v32 = vmul.f32 %v8328_v4, %v4897_v3  ;;  %v739_v46 = vmul.f32 %v8328_v4, %v4901_v24  ;;  %v8330_v33 = vld [vmem:[#allocation81_spill] sm:$0xff]  ;;  %v8331_v31 = vld [vmem:[#allocation20_spill] sm:$0xff]  ;;  %v8332_v49 = vld [vmem:[#allocation82_spill] sm:$0xff]  ;;  %v1075_v4 = vpop.permute.xlu1 %1074 }
 0x136   : > { %v740_v30 = vmul.f32 %v8329_v26, %v4921_v20  ;;  %v917_v59 = vmul.f32 %v8331_v31, %v8330_v33  ;;  %v918_v34 = vmul.f32 %v8331_v31, %v8332_v49  ;;  %v5473_v28 = vmul.f32 %v8329_v26, %v4925_v23  ;;  %v8333_v7 = vld [vmem:[#allocation17_spill] sm:$0xff]  ;;  %v1080_v31 = vpop.permute.xlu0 %1079  ;;  %v8334_v57 = vld [vmem:[#allocation19_spill] sm:$0xff]  ;;  %v8339_v49 = vld [vmem:[#allocation76_spill] sm:$0xff] }
 0x137   : > { %8325 = vst [vmem:[#allocation13_spill] sm:$0xff] %v5449_v52  ;;  %v1551_v52 = vadd.f32 %v1507_v37, %v1506_v47  ;;  %v5477_v2 = vmul.f32 %v8333_v7, %v4981_v29  ;;  %v5481_v40 = vmul.f32 %v8333_v7, %v4985_v55  ;;  %v945_v47 = vadd.f32 %v913_v63, %v734_v12  ;;  %v8335_v63 = vld [vmem:[#allocation27_spill] sm:$0xff] }
 0x138   : > { %v1122_v37 = vmul.f32 %v5335_v56, %v5238_v21  ;;  %1540 = vadd.xlane.f32.xlu0 %v1539_v19  ;;  %1543 = vadd.xlane.f32.xlu1 %v1542_v62  ;;  %v946_v15 = vadd.f32 %v914_v16, %v735_v50  ;;  %v5489_v10 = vmul.f32 %v8334_v57, %v5061_v35  ;;  %v8336_v56 = vld [vmem:[#allocation36_spill] sm:$0xff]  ;;  %v8337_v16 = vld [vmem:[#allocation25_spill] sm:$0xff]  ;;  %v8340_v7 = vld [vmem:[#allocation59_spill] sm:$0xff] }
 0x139   : > { %v5493_v41 = vmul.f32 %v8334_v57, %v5071_v38  ;;  %v921_v12 = vmul.f32 %v8335_v63, %v5144_v13  ;;  %v922_v21 = vmul.f32 %v8335_v63, %v5191_v48  ;;  %v925_v43 = vmul.f32 %v8336_v56, %v5200_v36  ;;  %v8338_v13 = vld [vmem:[#allocation45_spill] sm:$0xff] }
 0x13a   : > { %v926_v50 = vmul.f32 %v8336_v56, %v5224_v58  ;;  %v949_v62 = vadd.f32 %v917_v59, %v738_v32  ;;  %v950_v19 = vadd.f32 %v918_v34, %v739_v46  ;;  %v5505_v26 = vmul.f32 %v8337_v16, %v5149_v44  ;;  %v8341_v36 = vld [vmem:[#allocation77_spill] sm:$0xff]  ;;  %v1090_v56 = vpop.permute.xlu0 %1089 }
 0x13b   : > { %v5509_v33 = vmul.f32 %v8337_v16, %v5153_v39  ;;  %v929_v48 = vmul.f32 %v8338_v13, %v5263_v8  ;;  %v915_v57 = vmul.f32 %v8340_v7, %v8339_v49  ;;  %v916_v63 = vmul.f32 %v8340_v7, %v8341_v36  ;;  %v8342_v7 = vld [vmem:[#allocation9_spill] sm:$0xff] }
 0x13c   : > { %1546 = vadd.xlane.f32.xlu0 %v1545_v22  ;;  %1549 = vadd.xlane.f32.xlu1 %v1548_v18  ;;  %v5517_v32 = vadd.f32 %v1122_v37, %v945_v47  ;;  %v5519_v58 = vadd.f32 %v1123_v25, %v946_v15  ;;  %v1126_v46 = vmul.f32 %v1070_v51, %v5287_v54  ;;  %v8343_v18 = vld [vmem:[#allocation95_spill] sm:$0xff]  ;;  %v8344_v37 = vld [vmem:[#allocation37_spill] sm:$0xff] }
 0x13d   : > { %v1127_v59 = vmul.f32 %v1070_v51, %v5307_v45  ;;  %v953_v34 = vadd.f32 %v921_v12, %v5303_v53  ;;  %v954_v8 = vadd.f32 %v922_v21, %v5313_v5  ;;  %v1124_v16 = vmul.f32 %v1065_v1, %v5356_v17  ;;  %v8345_v15 = vld [vmem:[#allocation83_spill] sm:$0xff]  ;;  %v8346_v45 = vld [vmem:[#allocation62_spill] sm:$0xff]  ;;  %v1085_v53 = vpop.permute.xlu1 %1084  ;;  %v8347_v12 = vld [vmem:[#allocation84_spill] sm:$0xff] }
 0x13e   : > { %v1125_v49 = vmul.f32 %v1065_v1, %v5362_v6  ;;  %v957_v22 = vadd.f32 %v925_v43, %v8342_v7  ;;  %v958_v47 = vadd.f32 %v926_v50, %v8343_v18  ;;  %v930_v25 = vmul.f32 %v8338_v13, %v8344_v37  ;;  %v8348_v21 = vld [vmem:[#allocation39_spill] sm:$0xff]  ;;  %v8349_v50 = vld [vmem:[#allocation40_spill] sm:$0xff]  ;;  %v8352_v37 = vld [vmem:[#allocation2_spill] sm:$0xff] }
 0x13f   : > { %v961_v54 = vadd.f32 %v929_v48, %v5387_v14  ;;  %v919_v51 = vmul.f32 %v8346_v45, %v8345_v15  ;;  %v947_v5 = vadd.f32 %v915_v57, %v5434_v60  ;;  %v920_v17 = vmul.f32 %v8346_v45, %v8347_v12  ;;  %v8350_v57 = vld [vmem:[#allocation98_spill] sm:$0xff]  ;;  %v8354_v15 = vld [vmem:[#allocation3_spill] sm:$0xff] }
 0x140   : > { %1552 = vadd.xlane.f32.xlu0 %v1551_v52  ;;  %1555 = vadd.xlane.f32.xlu1 %v1554_v42  ;;  %v1191_v6 = vmax.f32 %v5517_v32, %v5519_v58  ;;  %v948_v1 = vadd.f32 %v916_v63, %v5438_v61  ;;  %v1130_v43 = vmul.f32 %v1080_v31, %v8348_v21  ;;  %v8351_v42 = vld [vmem:[#allocation11_spill] sm:$0xff] }
 0x141   : > { %v1131_v14 = vmul.f32 %v1080_v31, %v8349_v50  ;;  %v5542_v13 = vadd.f32 %v1126_v46, %v949_v62  ;;  %v5544_v48 = vadd.f32 %v1127_v59, %v950_v19  ;;  %v1128_v60 = vmul.f32 %v1075_v4, %v5395_v11  ;;  %v8353_v61 = vld [vmem:[#allocation71_spill] sm:$0xff]  ;;  %v8356_v59 = vld [vmem:[#allocation96_spill] sm:$0xff]  ;;  %v1100_v11 = vpop.permute.xlu0 %1099 }
 0x142   : > { %v1129_v36 = vmul.f32 %v1075_v4, %v8350_v57  ;;  %v5548_v7 = vadd.f32 %v1124_v16, %v947_v5  ;;  %v5550_v52 = vadd.f32 %v1125_v49, %v948_v1  ;;  %v962_v18 = vadd.f32 %v930_v25, %v8351_v42  ;;  %v8355_v46 = vld [vmem:[#allocation7_spill] sm:$0xff]  ;;  %v8357_v49 = vld [vmem:[#allocation50_spill] sm:$0xff]  ;;  %v1095_v5 = vpop.permute.xlu1 %1094  ;;  %v8364_v42 = vld [vmem:[#allocation44_spill] sm:$0xff] }
 0x143   : > { %v923_v63 = vmul.f32 %v8353_v61, %v8352_v37  ;;  %v924_v31 = vmul.f32 %v8353_v61, %v8354_v15  ;;  %v951_v62 = vadd.f32 %v919_v51, %v740_v30  ;;  %v1134_v19 = vmul.f32 %v1090_v56, %v8355_v46  ;;  %v8367_v46 = vld [vmem:[#allocation90_spill] sm:$0xff] }
 0x144   : > { %v1135_v45 = vmul.f32 %v1090_v56, %v8356_v59  ;;  %1558 = vadd.xlane.f32.xlu0 %v5461_v9  ;;  %1192 = vmax.xlane.f32.xlu1 %v1191_v6  ;;  %v952_v4 = vadd.f32 %v920_v17, %v5473_v28  ;;  %v1132_v16 = vmul.f32 %v1085_v53, %v5406_v27  ;;  %v8358_v28 = vld [vmem:[#allocation91_spill] sm:$0xff]  ;;  %v8359_v17 = vld [vmem:[#allocation80_spill] sm:$0xff]  ;;  %v8368_v59 = vld [vmem:[#allocation93_spill] sm:$0xff] }
 0x145   : > { %v1133_v25 = vmul.f32 %v1085_v53, %v8357_v49  ;;  %v1197_v12 = vmax.f32 %v5542_v13, %v5544_v48  ;;  %v5565_v1 = vadd.f32 %v1130_v43, %v953_v34  ;;  %v1194_v30 = vmax.f32 %v5548_v7, %v5550_v52  ;;  %v8360_v6 = vld [vmem:[#allocation92_spill] sm:$0xff]  ;;  %v8361_v43 = vld [vmem:[#allocation41_spill] sm:$0xff] }
 0x146   : > { %v5569_v56 = vadd.f32 %v1128_v60, %v951_v62  ;;  %v5571_v51 = vadd.f32 %v1129_v36, %v952_v4  ;;  %v5573_v9 = vadd.f32 %v1131_v14, %v954_v8  ;;  %v927_v27 = vmul.f32 %v8359_v17, %v8358_v28  ;;  %v8362_v8 = vld [vmem:[#allocation89_spill] sm:$0xff]  ;;  %v8363_v14 = vld [vmem:[#allocation56_spill] sm:$0xff]  ;;  %v1105_v4 = vpop.permute.xlu1 %1104 }
 0x147   : > { %v928_v53 = vmul.f32 %v8359_v17, %v8360_v6  ;;  %v955_v21 = vadd.f32 %v923_v63, %v5477_v2  ;;  %v956_v34 = vadd.f32 %v924_v31, %v5481_v40  ;;  %v1138_v50 = vmul.f32 %v1100_v11, %v8361_v43  ;;  %v1110_v2 = vpop.permute.xlu0 %1109  ;;  %v8365_v63 = vld [vmem:[#allocation51_spill] sm:$0xff]  ;;  %v8371_v17 = vld [vmem:[#allocation10_spill] sm:$0xff] }
 0x148   : > { %1195 = vmax.xlane.f32.xlu0 %v1194_v30  ;;  %1198 = vmax.xlane.f32.xlu1 %v1197_v12  ;;  %v5582_v60 = vadd.f32 %v1134_v19, %v957_v22  ;;  %v5584_v57 = vadd.f32 %v1135_v45, %v958_v47  ;;  %v933_v36 = vmul.f32 %v8363_v14, %v8362_v8  ;;  %v8366_v31 = vld [vmem:[#allocation99_spill] sm:$0xff]  ;;  %v8375_v8 = vld [vmem:[#allocation13_spill] sm:$0xff] }
 0x149   : > { %v1139_v37 = vmul.f32 %v1100_v11, %v8364_v42  ;;  %v5589_v61 = vadd.f32 %v1132_v16, %v955_v21  ;;  %v5591_v15 = vadd.f32 %v1133_v25, %v956_v34  ;;  %v1136_v40 = vmul.f32 %v1095_v5, %v8365_v63  ;;  %v8369_v45 = vld [vmem:[#allocation87_spill] sm:$0xff]  ;;  %v8370_v25 = vld [vmem:[#allocation94_spill] sm:$0xff]  ;;  %v8372_v21 = vld [vmem:[#allocation97_spill] sm:$0xff] }
 0x14a   : > { %v1137_v62 = vmul.f32 %v1095_v5, %v8366_v31  ;;  %v1200_v22 = vmax.f32 %v5569_v56, %v5571_v51  ;;  %v1203_v47 = vmax.f32 %v5565_v1, %v5573_v9  ;;  %v934_v19 = vmul.f32 %v8363_v14, %v8367_v46 }
 0x14b   : > { %v931_v11 = vmul.f32 %v8369_v45, %v8368_v59  ;;  %v959_v16 = vadd.f32 %v927_v27, %v5489_v10  ;;  %v960_v49 = vadd.f32 %v928_v53, %v5493_v41  ;;  %v932_v5 = vmul.f32 %v8369_v45, %v8370_v25  ;;  %v8373_v41 = vld [vmem:[#allocation100_spill] sm:$0xff] }
 0x14c   : > { %v5607_v12 = vadd.f32 %v1138_v50, %v961_v54  ;;  %1201 = vmax.xlane.f32.xlu0 %v1200_v22  ;;  %1204 = vmax.xlane.f32.xlu1 %v1203_v47  ;;  %v1209_v30 = vmax.f32 %v5582_v60, %v5584_v57  ;;  %v5611_v28 = vadd.f32 %v1139_v37, %v962_v18  ;;  %v8374_v53 = vld [vmem:[#allocation12_spill] sm:$0xff]  ;;  %v8376_v47 = vld [vmem:[#allocation63_spill] sm:$0xff] }
 0x14d   : > { %v1142_v6 = vmul.f32 %v1110_v2, %v8371_v17  ;;  %v1143_v34 = vmul.f32 %v1110_v2, %v8372_v21  ;;  %v1206_v10 = vmax.f32 %v5589_v61, %v5591_v15  ;;  %v1140_v27 = vmul.f32 %v1105_v4, %v8373_v41  ;;  %v8381_v41 = vld [vmem:[#allocation5_spill] sm:$0xff] }
 0x14e   : > { %v1141_v43 = vmul.f32 %v1105_v4, %v8374_v53  ;;  %v5619_v54 = vadd.f32 %v1136_v40, %v959_v16  ;;  %v5621_v50 = vadd.f32 %v1137_v62, %v960_v49  ;;  %v965_v14 = vadd.f32 %v933_v36, %v8375_v8  ;;  %v8378_v49 = vld [vmem:[#allocation34_spill] sm:$0xff] }
 0x14f   : > { %v966_v18 = vadd.f32 %v934_v19, %v5453_v0  ;;  %v963_v42 = vadd.f32 %v931_v11, %v5505_v26  ;;  %v964_v37 = vadd.f32 %v932_v5, %v5509_v33  ;;  %v1215_v63 = vmax.f32 %v5607_v12, %v5611_v28  ;;  %v2609_v33 = vld [vmem:[%s7945_s4] sm:$0xff]  ;;  %v8377_v19 = vld [vmem:[#allocation64_spill] sm:$0xff] }
 0x150   : > { %1207 = vmax.xlane.f32.xlu0 %v1206_v10  ;;  %1210 = vmax.xlane.f32.xlu1 %v1209_v30  ;;  %v5627_v2 = vadd.f32 %v1142_v6, %v965_v14  ;;  %v1212_v40 = vmax.f32 %v5619_v54, %v5621_v50  ;;  %v8379_v30 = vld [vmem:[#allocation35_spill] sm:$0xff] }
 0x151   : > { %v5631_v31 = vadd.f32 %v1143_v34, %v966_v18  ;;  %v5635_v62 = vadd.f32 %v1140_v27, %v963_v42  ;;  %v5637_v36 = vadd.f32 %v1141_v43, %v964_v37  ;;  %3853 = vmatprep.mubr.f32.mxu0 %v2609_v33  ;;  %v8380_v34 = vld [vmem:[#allocation4_spill] sm:$0xff]  ;;  %v8382_v18 = vld [vmem:[#allocation6_spill] sm:$0xff] }
 0x152   : > { %v8383_v37 = vld [vmem:[#allocation16_spill] sm:$0xff] }
 0x153   : > { %v1218_v0 = vmax.f32 %v5635_v62, %v5637_v36  ;;  %v1221_v26 = vmax.f32 %v5627_v2, %v5631_v31 }
 0x154   : > { %1213 = vmax.xlane.f32.xlu0 %v1212_v40  ;;  %1216 = vmax.xlane.f32.xlu1 %v1215_v63  ;;  %v8384_v40 = vld [vmem:[#allocation43_spill] sm:$0xff] }
 0x158   : > { %1219 = vmax.xlane.f32.xlu0 %v1218_v0  ;;  %1222 = vmax.xlane.f32.xlu1 %v1221_v26  ;;  %v8385_v26 = vld [vmem:[#allocation55_spill] sm:$0xff] }
 0x190   : > { %v1181_v22 = vpop.xlane.xlu0 %1180 }
 0x191   : > { %v1226_v46 = vsub.f32 %v8376_v47, %v1181_v22  ;;  %v1227_v59 = vsub.f32 %v8377_v19, %v1181_v22 }
 0x193   : > { %v1260_v45 = vmul.f32 1.442695, %v1226_v46  ;;  %v1262_v11 = vmul.f32 1.442695, %v1227_v59 }
 0x195   : > { %3991 = vpow2.f32 %v1260_v45 }
 0x196   : > { %3993 = vpow2.f32 %v1262_v11  ;;  %v8386_v11 = vld [vmem:[#allocation53_spill] sm:$0xff] }
 0x19f   : > { %v3992_v4 = vpop.eup %3991 }
 0x1a0   : > { %v3994_v16 = vpop.eup %3993  ;;  %v1322_v25 = vmul.f32 %v3992_v4, %v8378_v49 }
 0x1a1   : > { %v1403_v5 = vadd.f32 %v3994_v16, %v3992_v4  ;;  %v1323_v17 = vmul.f32 %v3994_v16, %v8379_v30  ;;  %v8387_v16 = vld [vmem:[#allocation8_spill] sm:$0xff] }
 0x1a3   : > { %1404 = vadd.xlane.f32.xlu1 %v1403_v5  ;;  %v1178_v6 = vpop.xlane.xlu1 %1177  ;;  %v5650_v21 = vadd.f32 %v1323_v17, %v1322_v25 }
 0x1a4   : > { %v1224_v10 = vsub.f32 %v8380_v34, %v1178_v6  ;;  %v1225_v27 = vsub.f32 %v8381_v41, %v1178_v6 }
 0x1a6   : > { %v1256_v53 = vmul.f32 1.442695, %v1224_v10  ;;  %v1258_v43 = vmul.f32 1.442695, %v1225_v27 }
 0x1a7   : > { %v1187_v8 = vpop.xlane.xlu1 %1186  ;;  %v1184_v14 = vpop.xlane.xlu0 %1183 }
 0x1a8   : > { %3995 = vpow2.f32 %v1256_v53  ;;  %v1230_v42 = vsub.f32 %v8382_v18, %v1187_v8  ;;  %v1231_v63 = vsub.f32 %v8383_v37, %v1187_v8  ;;  %v1228_v0 = vsub.f32 %v8384_v40, %v1184_v14  ;;  %v8389_v8 = vld [vmem:[#allocation22_spill] sm:$0xff] }
 0x1a9   : > { %3997 = vpow2.f32 %v1258_v43  ;;  %v1229_v33 = vsub.f32 %v8385_v26, %v1184_v14  ;;  %v8390_v18 = vld [vmem:[#allocation26_spill] sm:$0xff] }
 0x1aa   : > { %v1268_v22 = vmul.f32 1.442695, %v1230_v42  ;;  %v1270_v47 = vmul.f32 1.442695, %v1231_v63  ;;  %v1264_v46 = vmul.f32 1.442695, %v1228_v0 }
 0x1ab   : > { %v1266_v19 = vmul.f32 1.442695, %v1229_v33  ;;  %v1514_v59 = vpop.xlane.xlu1 %1513  ;;  %v1190_v45 = vpop.xlane.xlu0 %1189  ;;  %v8391_v37 = vld [vmem:[#allocation30_spill] sm:$0xff]  ;;  %v8393_v33 = vld [vmem:[#allocation31_spill] sm:$0xff] }
 0x1ac   : > { %3999 = vpow2.f32 %v1268_v22  ;;  %v1232_v4 = vsub.f32 %v8386_v11, %v1190_v45  ;;  %v1233_v49 = vsub.f32 %v8387_v16, %v1190_v45  ;;  %v5660_v5 = vmul.f32 0.00390625, %v1514_v59  ;;  %v8395_v11 = vld [vmem:[#allocation21_spill] sm:$0xff]  ;;  %v8396_v16 = vld [vmem:[#allocation23_spill] sm:$0xff] }
 0x1ad   : > { %4001 = vpow2.f32 %v1270_v47 }
 0x1ae   : > { %4003 = vpow2.f32 %v1264_v46  ;;  %v1272_v25 = vmul.f32 1.442695, %v1232_v4  ;;  %8388 = vst [vmem:[#allocation18_spill] sm:$0xff] %v5660_v5  ;;  %v1274_v30 = vmul.f32 1.442695, %v1233_v49  ;;  %v2593_v14 = vsel %vm2570_vm2, %v8389_v8, %v5660_v5  ;;  %v8398_v8 = vld [vmem:[#allocation33_spill] sm:$0xff] }
 0x1af   : > { %4005 = vpow2.f32 %v1266_v19  ;;  %v1517_v6 = vpop.xlane.xlu0 %1516  ;;  %v8405_v5 = vld [vmem:[#allocation52_spill] sm:$0xff] }
 0x1b0   : > { %v1520_v17 = vpop.xlane.xlu1 %1519  ;;  %4007 = vpow2.f32 %v1272_v25  ;;  %v5662_v34 = vmul.f32 0.00390625, %v1517_v6 }
 0x1b1   : > { %4009 = vpow2.f32 %v1274_v30  ;;  %v5664_v27 = vmul.f32 0.00390625, %v1520_v17  ;;  %v8397_v30 = vld [vmem:[#allocation32_spill] sm:$0xff] }
 0x1b2   : > { %v3996_v10 = vpop.eup %3995  ;;  %v2594_v42 = vsel %vm2570_vm2, %v8390_v18, %v5662_v34 }
 0x1b3   : > { %v3998_v41 = vpop.eup %3997  ;;  %v1523_v43 = vpop.xlane.xlu0 %1522  ;;  %v1320_v63 = vmul.f32 %v3996_v10, %v8391_v37  ;;  %v3905_v26 = vpack.c.bf16 %v2594_v42, %v2593_v14  ;;  %v2595_v4 = vsel %vm2570_vm2, %v8395_v11, %v5664_v27  ;;  %v8399_v37 = vld [vmem:[#allocation42_spill] sm:$0xff] }
 0x1b4   : > { %v1526_v53 = vpop.xlane.xlu1 %1525  ;;  %v5673_v40 = vmul.f32 0.00390625, %v1523_v43  ;;  %v1400_v0 = vadd.f32 %v3998_v41, %v3996_v10  ;;  %v1321_v22 = vmul.f32 %v3998_v41, %v8393_v33 }
 0x1b5   : > { %v5676_v46 = vmul.f32 0.00390625, %v1526_v53  ;;  %3906 = vmatprep.subr.bf16.mxu0 %v3905_v26 }
 0x1b6   : > { %8392 = vst [vmem:[#allocation70_spill] sm:$0xff] %v5673_v40  ;;  %v4000_v47 = vpop.eup %3999  ;;  %1401 = vadd.xlane.f32.xlu0 %v1400_v0  ;;  %v2596_v49 = vsel %vm2570_vm2, %v8396_v16, %v5673_v40  ;;  %v5684_v25 = vadd.f32 %v1321_v22, %v1320_v63  ;;  %3908 = vmatpush3.bf16.msra.mxu0 %v3905_v26  ;;  %v8404_v40 = vld [vmem:[#allocation49_spill] sm:$0xff] }
 0x1b7   : > { %8394 = vst [vmem:[#allocation14_spill] sm:$0xff] %v5676_v46  ;;  %v4002_v19 = vpop.eup %4001  ;;  %v1326_v17 = vmul.f32 %v4000_v47, %v8397_v30  ;;  %v3909_v53 = vpack.c.bf16 %v2596_v49, %v2595_v4  ;;  %v2597_v63 = vsel %vm2570_vm2, %v8399_v37, %v5676_v46  ;;  %v8402_v30 = vld [vmem:[#allocation29_spill] sm:$0xff] }
 0x1b8   : > { %v4004_v6 = vpop.eup %4003  ;;  %v1409_v41 = vadd.f32 %v4002_v19, %v4000_v47  ;;  %v1327_v14 = vmul.f32 %v4002_v19, %v8398_v8  ;;  %v8401_v19 = vld [vmem:[#allocation28_spill] sm:$0xff] }
 0x1b9   : > { %v4006_v43 = vpop.eup %4005  ;;  %3910 = vmatprep.subr.bf16.mxu0 %v3909_v53  ;;  %v1324_v4 = vmul.f32 %v4004_v6, %v8401_v19  ;;  %v8403_v8 = vld [vmem:[#allocation48_spill] sm:$0xff] }
 0x1ba   : > { %v4008_v18 = vpop.eup %4007  ;;  %1410 = vadd.xlane.f32.xlu1 %v1409_v41  ;;  %v1406_v33 = vadd.f32 %v4006_v43, %v4004_v6  ;;  %v5698_v11 = vadd.f32 %v1327_v14, %v1326_v17  ;;  %3912 = vmatpush3.bf16.msra.mxu0 %v3909_v53  ;;  %v1325_v41 = vmul.f32 %v4006_v43, %v8402_v30  ;;  %v8408_v19 = vld [vmem:[#allocation60_spill] sm:$0xff] }
 0x1bb   : > { %v4010_v0 = vpop.eup %4009  ;;  %v1328_v37 = vmul.f32 %v4008_v18, %v8403_v8  ;;  %v8411_v8 = vld [vmem:[#allocation68_spill] sm:$0xff] }
 0x1bc   : > { %v1529_v45 = vpop.xlane.xlu0 %1528  ;;  %1407 = vadd.xlane.f32.xlu0 %v1406_v33  ;;  %v1412_v49 = vadd.f32 %v4010_v0, %v4008_v18  ;;  %v1329_v46 = vmul.f32 %v4010_v0, %v8404_v40  ;;  %v5714_v33 = vadd.f32 %v1325_v41, %v1324_v4 }
 0x1bd   : > { %v1532_v59 = vpop.xlane.xlu1 %1531  ;;  %v5687_v10 = vmul.f32 0.00390625, %v1529_v45  ;;  %v8400_v45 = vld [vmem:[#allocation38_spill] sm:$0xff] }
 0x1be   : > { %v5690_v42 = vmul.f32 0.00390625, %v1532_v59  ;;  %v5716_v43 = vadd.f32 %v1329_v46, %v1328_v37 }
 0x1bf   : > { %v2598_v47 = vsel %vm2570_vm2, %v8400_v45, %v5687_v10  ;;  %v8407_v45 = vld [vmem:[#allocation61_spill] sm:$0xff] }
 0x1c0   : > { %v1535_v26 = vpop.xlane.xlu0 %1534  ;;  %v3913_v16 = vpack.c.bf16 %v2598_v47, %v2597_v63  ;;  %v2599_v17 = vsel %vm2570_vm2, %v8405_v5, %v5690_v42  ;;  %1413 = vadd.xlane.f32.xlu0 %v1412_v49 }
 0x1c1   : > { %v1538_v22 = vpop.xlane.xlu1 %1537  ;;  %v5701_v59 = vmul.f32 0.00390625, %v1535_v26  ;;  %v8406_v26 = vld [vmem:[#allocation54_spill] sm:$0xff] }
 0x1c2   : > { %3914 = vmatprep.subr.bf16.mxu0 %v3913_v16  ;;  %v5709_v14 = vmul.f32 0.00390625, %v1538_v22 }
 0x1c3   : > { %v2600_v63 = vsel %vm2570_vm2, %v8406_v26, %v5701_v59  ;;  %3916 = vmatpush3.bf16.msra.mxu0 %v3913_v16 }
 0x1c4   : > { %v3917_v40 = vpack.c.bf16 %v2600_v63, %v2599_v17  ;;  %v2601_v47 = vsel %vm2570_vm2, %v8407_v45, %v5709_v14  ;;  %v8412_v17 = vld [vmem:[#allocation65_spill] sm:$0xff] }
 0x1c5   : > { %v1544_v6 = vpop.xlane.xlu1 %1543  ;;  %v1541_v53 = vpop.xlane.xlu0 %1540 }
 0x1c6   : > { %v5718_v18 = vmul.f32 0.00390625, %v1541_v53  ;;  %3918 = vmatprep.subr.bf16.mxu0 %v3917_v40  ;;  %v5720_v0 = vmul.f32 0.00390625, %v1544_v6 }
 0x1c7   : > { %3920 = vmatpush3.bf16.msra.mxu0 %v3917_v40 }
 0x1c8   : > { %v2602_v4 = vsel %vm2570_vm2, %v8408_v19, %v5718_v18  ;;  %v2603_v37 = vsel %vm2570_vm2, %v8411_v8, %v5720_v0 }
 0x1c9   : > { %v1550_v5 = vpop.xlane.xlu1 %1549  ;;  %v1547_v22 = vpop.xlane.xlu0 %1546  ;;  %v3921_v16 = vpack.c.bf16 %v2602_v4, %v2601_v47  ;;  %v8415_v47 = vld [vmem:[#allocation74_spill] sm:$0xff] }
 0x1ca   : > { %v5728_v46 = vmul.f32 0.00390625, %v1547_v22  ;;  %v5730_v30 = vmul.f32 0.00390625, %v1550_v5  ;;  %v8414_v22 = vld [vmem:[#allocation78_spill] sm:$0xff] }
 0x1cb   : > { %3922 = vmatprep.subr.bf16.mxu0 %v3921_v16 }
 0x1cc   : > { %8409 = vst [vmem:[#allocation15_spill] sm:$0xff] %v5728_v46  ;;  %8410 = vst [vmem:[#allocation81_spill] sm:$0xff] %v5730_v30  ;;  %v2604_v6 = vsel %vm2570_vm2, %v8412_v17, %v5728_v46  ;;  %3924 = vmatpush3.bf16.msra.mxu0 %v3921_v16  ;;  %v2605_v45 = vsel %vm2570_vm2, %v8414_v22, %v5730_v30  ;;  %v8416_v46 = vld [vmem:[#allocation88_spill] sm:$0xff]  ;;  %v8417_v30 = vld [vmem:[#allocation69_spill] sm:$0xff] }
 0x1cd   : > { %v1556_v49 = vpop.xlane.xlu1 %1555  ;;  %v1553_v41 = vpop.xlane.xlu0 %1552  ;;  %v3925_v26 = vpack.c.bf16 %v2604_v6, %v2603_v37 }
 0x1ce   : > { %v5738_v53 = vmul.f32 0.00390625, %v1553_v41  ;;  %v5740_v63 = vmul.f32 0.00390625, %v1556_v49 }
 0x1cf   : > { %3926 = vmatprep.subr.bf16.mxu0 %v3925_v26 }
 0x1d0   : > { %8413 = vst [vmem:[#allocation20_spill] sm:$0xff] %v5738_v53  ;;  %v2606_v19 = vsel %vm2570_vm2, %v8415_v47, %v5738_v53  ;;  %3928 = vmatpush3.bf16.msra.mxu0 %v3925_v26  ;;  %v2607_v22 = vsel %vm2570_vm2, %v8416_v46, %v5740_v63 }
 0x1d1   : > { %v1193_v40 = vpop.xlane.xlu1 %1192  ;;  %v1559_v5 = vpop.xlane.xlu0 %1558  ;;  %v3929_v8 = vpack.c.bf16 %v2606_v19, %v2605_v45 }
 0x1d2   : > { %v1234_v4 = vsub.f32 %v5517_v32, %v1193_v40  ;;  %v1235_v16 = vsub.f32 %v5519_v58, %v1193_v40  ;;  %v5750_v41 = vmul.f32 0.00390625, %v1559_v5 }
 0x1d3   : > { %3930 = vmatprep.subr.bf16.mxu0 %v3929_v8 }
 0x1d4   : > { %v1276_v49 = vmul.f32 1.442695, %v1234_v4  ;;  %v1278_v37 = vmul.f32 1.442695, %v1235_v16  ;;  %v2608_v26 = vsel %vm2570_vm2, %v8417_v30, %v5750_v41  ;;  %3932 = vmatpush3.bf16.msra.mxu0 %v3929_v8  ;;  %v2611_v8 = vld [vmem:[%s7945_s4 + $0x10] sm:$0xff] }
 0x1d5   : > { %v1199_v17 = vpop.xlane.xlu1 %1198  ;;  %v1196_v6 = vpop.xlane.xlu0 %1195  ;;  %v3933_v45 = vpack.c.bf16 %v2608_v26, %v2607_v22 }
 0x1d6   : > { %4011 = vpow2.f32 %v1276_v49  ;;  %v1238_v32 = vsub.f32 %v5542_v13, %v1199_v17  ;;  %v1239_v58 = vsub.f32 %v5544_v48, %v1199_v17  ;;  %v1236_v40 = vsub.f32 %v5548_v7, %v1196_v6  ;;  %v2610_v7 = vld [vmem:[%s7945_s4 + $0x8] sm:$0xff] }
 0x1d7   : > { %4013 = vpow2.f32 %v1278_v37  ;;  %v1237_v5 = vsub.f32 %v5550_v52, %v1196_v6  ;;  %3934 = vmatprep.subr.bf16.mxu0 %v3933_v45 }
 0x1d8   : > { %v1284_v47 = vmul.f32 1.442695, %v1238_v32  ;;  %v1286_v19 = vmul.f32 1.442695, %v1239_v58  ;;  %v1280_v4 = vmul.f32 1.442695, %v1236_v40  ;;  %3936 = vmatpush3.bf16.msra.mxu0 %v3933_v45 }
 0x1d9   : > { %v1282_v46 = vmul.f32 1.442695, %v1237_v5  ;;  %v1205_v16 = vpop.xlane.xlu1 %1204  ;;  %v1202_v53 = vpop.xlane.xlu0 %1201  ;;  %v2613_v32 = vld [vmem:[%s7945_s4 + $0x20] sm:$0xff] }
 0x1da   : > { %4015 = vpow2.f32 %v1284_v47  ;;  %v1242_v30 = vsub.f32 %v5565_v1, %v1205_v16  ;;  %v1243_v13 = vsub.f32 %v5573_v9, %v1205_v16  ;;  %v1240_v48 = vsub.f32 %v5569_v56, %v1202_v53 }
 0x1db   : > { %4017 = vpow2.f32 %v1286_v19  ;;  %v1241_v52 = vsub.f32 %v5571_v51, %v1202_v53  ;;  %3854 = vmatmul.mubr.f32.vlgmr.msra.gmra.mrb[0].mxu0 %v2610_v7  ;;  %v2612_v53 = vld [vmem:[%s7945_s4 + $0x18] sm:$0xff] }
 0x1dc   : > { %4019 = vpow2.f32 %v1280_v4  ;;  %v1292_v49 = vmul.f32 1.442695, %v1242_v30  ;;  %v1294_v37 = vmul.f32 1.442695, %v1243_v13  ;;  %v1288_v17 = vmul.f32 1.442695, %v1240_v48  ;;  %3856 = vmatprep.mubr.f32.mxu0 %v2611_v8 }
 0x1dd   : > { %4021 = vpow2.f32 %v1282_v46  ;;  %v1290_v1 = vmul.f32 1.442695, %v1241_v52  ;;  %v1211_v9 = vpop.xlane.xlu1 %1210  ;;  %v1208_v6 = vpop.xlane.xlu0 %1207  ;;  %v2614_v46 = vld [vmem:[%s7945_s4 + $0x28] sm:$0xff]  ;;  %v2615_v13 = vld [vmem:[%s7945_s4 + $0x30] sm:$0xff] }
 0x1de   : > { %4023 = vpow2.f32 %v1292_v49  ;;  %v1246_v56 = vsub.f32 %v5582_v60, %v1211_v9  ;;  %v1247_v22 = vsub.f32 %v5584_v57, %v1211_v9  ;;  %v1244_v51 = vsub.f32 %v5589_v61, %v1208_v6  ;;  %v2616_v9 = vld [vmem:[%s7945_s4 + $0x38] sm:$0xff] }
 0x1df   : > { %4025 = vpow2.f32 %v1294_v37  ;;  %v1245_v26 = vsub.f32 %v5591_v15, %v1208_v6  ;;  %3857 = vmatmul.mubr.f32.gmra.mrb[2].mxu0 %v2612_v53 }
 0x1e0   : > { %v5782_v58 = vpop.eup %4011  ;;  %4027 = vpow2.f32 %v1288_v17  ;;  %v1300_v60 = vmul.f32 1.442695, %v1246_v56  ;;  %v1302_v40 = vmul.f32 1.442695, %v1247_v22  ;;  %v1296_v57 = vmul.f32 1.442695, %v1244_v51  ;;  %3859 = vmatprep.mubr.f32.mxu0 %v2613_v32 }
 0x1e1   : > { %v5784_v5 = vpop.eup %4013  ;;  %4029 = vpow2.f32 %v1290_v1  ;;  %v1298_v61 = vmul.f32 1.442695, %v1245_v26  ;;  %v1217_v45 = vpop.xlane.xlu1 %1216 }
 0x1e2   : > { %v1214_v47 = vpop.xlane.xlu0 %1213  ;;  %4031 = vpow2.f32 %v1300_v60  ;;  %v1250_v15 = vsub.f32 %v5607_v12, %v1217_v45  ;;  %v1251_v19 = vsub.f32 %v5611_v28, %v1217_v45  ;;  %v1415_v30 = vadd.f32 %v5784_v5, %v5782_v58 }
 0x1e3   : > { %v1248_v4 = vsub.f32 %v5619_v54, %v1214_v47  ;;  %4033 = vpow2.f32 %v1302_v40  ;;  %v1249_v16 = vsub.f32 %v5621_v50, %v1214_v47  ;;  %3860 = vmatmul.mubr.f32.gmra.mrb[4].mxu0 %v2614_v46 }
 0x1e4   : > { %v5798_v12 = vpop.eup %4015  ;;  %4035 = vpow2.f32 %v1296_v57  ;;  %v1308_v28 = vmul.f32 1.442695, %v1250_v15  ;;  %v1310_v54 = vmul.f32 1.442695, %v1251_v19  ;;  %1416 = vadd.xlane.f32.xlu1 %v1415_v30  ;;  %3862 = vmatprep.mubr.f32.mxu0 %v2615_v13 }
 0x1e5   : > { %v1304_v48 = vmul.f32 1.442695, %v1248_v4  ;;  %v5800_v7 = vpop.eup %4017  ;;  %4037 = vpow2.f32 %v1298_v61  ;;  %v1306_v52 = vmul.f32 1.442695, %v1249_v16  ;;  %v1223_v8 = vpop.xlane.xlu1 %1222 }
 0x1e6   : > { %v1220_v50 = vpop.xlane.xlu0 %1219  ;;  %v5802_v49 = vpop.eup %4019  ;;  %4039 = vpow2.f32 %v1308_v28  ;;  %v1254_v37 = vsub.f32 %v5627_v2, %v1223_v8  ;;  %v1255_v17 = vsub.f32 %v5631_v31, %v1223_v8  ;;  %v1421_v22 = vadd.f32 %v5800_v7, %v5798_v12  ;;  %v8418_v8 = vld [vmem:[#allocation75_spill] sm:$0xff] }
 0x1e7   : > { %v1252_v1 = vsub.f32 %v5635_v62, %v1220_v50  ;;  %v5810_v6 = vpop.eup %4021  ;;  %4041 = vpow2.f32 %v1310_v54  ;;  %v1253_v56 = vsub.f32 %v5637_v36, %v1220_v50  ;;  %3863 = vmatmul.mubr.f32.gmra.mrb[6].mxu0 %v2616_v9 }
 0x1e8   : > { %v5815_v51 = vpop.eup %4023  ;;  %4043 = vpow2.f32 %v1304_v48  ;;  %v1316_v2 = vmul.f32 1.442695, %v1254_v37  ;;  %v1318_v31 = vmul.f32 1.442695, %v1255_v17  ;;  %1422 = vadd.xlane.f32.xlu1 %v1421_v22  ;;  %v1418_v32 = vadd.f32 %v5810_v6, %v5802_v49 }
 0x1e9   : > { %v1312_v53 = vmul.f32 1.442695, %v1252_v1  ;;  %v4026_v62 = vpop.eup %4025  ;;  %4045 = vpow2.f32 %v1306_v52  ;;  %v1314_v26 = vmul.f32 1.442695, %v1253_v56  ;;  %v8419_v1 = vld [vmem:[#allocation79_spill] sm:$0xff] }
 0x1ea   : > { %v4028_v60 = vpop.eup %4027  ;;  %4047 = vpow2.f32 %v1316_v2  ;;  %v1427_v36 = vadd.f32 %v4026_v62, %v5815_v51  ;;  %1419 = vadd.xlane.f32.xlu0 %v1418_v32 }
 0x1eb   : > { %v4030_v40 = vpop.eup %4029  ;;  %4049 = vpow2.f32 %v1318_v31  ;;  %v8420_v31 = vld [vmem:[#allocation46_spill] sm:$0xff] }
 0x1ec   : > { %v4032_v57 = vpop.eup %4031  ;;  %4051 = vpow2.f32 %v1312_v53  ;;  %v1424_v61 = vadd.f32 %v4030_v40, %v4028_v60  ;;  %1428 = vadd.xlane.f32.xlu1 %v1427_v36  ;;  %v1330_v53 = vmul.f32 %v5782_v58, %v8420_v31  ;;  %v487_v31 = vld [vmem:[%s7944_s3 + $0xa0] sm:$0xff] }
 0x1ed   : > { %v4034_v45 = vpop.eup %4033  ;;  %4053 = vpow2.f32 %v1314_v26  ;;  %v8421_v26 = vld [vmem:[#allocation47_spill] sm:$0xff] }
 0x1ee   : > { %v4036_v47 = vpop.eup %4035  ;;  %v1433_v15 = vadd.f32 %v4034_v45, %v4032_v57  ;;  %1425 = vadd.xlane.f32.xlu0 %v1424_v61  ;;  %v1331_v32 = vmul.f32 %v5784_v5, %v8421_v26  ;;  %v1334_v61 = vmul.f32 %v5798_v12, %v4897_v3  ;;  %v1336_v12 = vmul.f32 %v4028_v60, %v4921_v20  ;;  %v489_v26 = vld [vmem:[%s7944_s3 + $0xb0] sm:$0xff] }
 0x1ef   : > { %v4038_v19 = vpop.eup %4037 }
 0x1f0   : > { %v4040_v4 = vpop.eup %4039  ;;  %v1430_v46 = vadd.f32 %v4038_v19, %v4036_v47  ;;  %1434 = vadd.xlane.f32.xlu1 %v1433_v15  ;;  %v1367_v36 = vadd.f32 %v1331_v32, %v1330_v53  ;;  %v1335_v15 = vmul.f32 %v5800_v7, %v4901_v24  ;;  %v1337_v24 = vmul.f32 %v4030_v40, %v4925_v23  ;;  %v476_v53 = vld [vmem:[%s7944_s3 + $0x48] sm:$0xff]  ;;  %v478_v32 = vld [vmem:[%s7944_s3 + $0x58] sm:$0xff] }
 0x1f1   : > { %v4042_v16 = vpop.eup %4041 }
 0x1f2   : > { %v4044_v30 = vpop.eup %4043  ;;  %v1439_v13 = vadd.f32 %v4042_v16, %v4040_v4  ;;  %1431 = vadd.xlane.f32.xlu0 %v1430_v46  ;;  %v8423_v46 = vld [vmem:[#allocation58_spill] sm:$0xff]  ;;  %v1373_v5 = vadd.f32 %v1335_v15, %v1334_v61  ;;  %v480_v61 = vld [vmem:[%s7944_s3 + $0x68] sm:$0xff] }
 0x1f3   : > { %v4046_v28 = vpop.eup %4045  ;;  %v1333_v58 = vmul.f32 %v5810_v6, %v8423_v46  ;;  %v1344_v60 = vmul.f32 %v4044_v30, %v5061_v35  ;;  %v483_v35 = vld [vmem:[%s7944_s3 + $0x80] sm:$0xff] }
 0x1f4   : > { %v4048_v54 = vpop.eup %4047  ;;  %v1436_v48 = vadd.f32 %v4046_v28, %v4044_v30  ;;  %1440 = vadd.xlane.f32.xlu1 %v1439_v13  ;;  %v8425_v13 = vld [vmem:[#allocation67_spill] sm:$0xff]  ;;  %v1345_v40 = vmul.f32 %v4046_v28, %v5071_v38  ;;  %v486_v38 = vld [vmem:[%s7944_s3 + $0x98] sm:$0xff]  ;;  %v495_v46 = vld [vmem:[%s7944_s3 + $0xe0] sm:$0xff] }
 0x1f5   : > { %v4050_v52 = vpop.eup %4049  ;;  %v1350_v50 = vmul.f32 %v4048_v54, %v8418_v8  ;;  %v1340_v8 = vmul.f32 %v4036_v47, %v4981_v29  ;;  %v496_v30 = vld [vmem:[%s7944_s3 + $0xe8] sm:$0xff]  ;;  %v498_v28 = vld [vmem:[%s7944_s3 + $0xf8] sm:$0xff] }
 0x1f6   : > { %v4052_v37 = vpop.eup %4051  ;;  %v1445_v17 = vadd.f32 %v4050_v52, %v4048_v54  ;;  %v1351_v9 = vmul.f32 %v4050_v52, %v8419_v1  ;;  %1437 = vadd.xlane.f32.xlu0 %v1436_v48  ;;  %v1339_v54 = vmul.f32 %v4026_v62, %v8425_v13  ;;  %v8427_v52 = vld [vmem:[#allocation73_spill] sm:$0xff]  ;;  %v8429_v1 = vld [vmem:[#allocation86_spill] sm:$0xff] }
 0x1f7   : > { %v4054_v56 = vpop.eup %4053  ;;  %v1343_v6 = vmul.f32 %v4034_v45, %v8427_v52  ;;  %v1347_v20 = vmul.f32 %v4042_v16, %v8429_v1  ;;  %v1388_v45 = vadd.f32 %v1345_v40, %v1344_v60  ;;  %v1348_v29 = vmul.f32 %v4052_v37, %v5149_v44  ;;  %v488_v44 = vld [vmem:[%s7944_s3 + $0xa8] sm:$0xff]  ;;  %v494_v16 = vld [vmem:[%s7944_s3 + $0xd8] sm:$0xff]  ;;  %v477_v60 = vld [vmem:[%s7944_s3 + $0x50] sm:$0xff] }
 0x1f8   : > { %v1442_v22 = vadd.f32 %v4054_v56, %v4052_v37  ;;  %v5822_v2 = vadd.f32 %v1351_v9, %v1350_v50  ;;  %1446 = vadd.xlane.f32.xlu1 %v1445_v17  ;;  %v8428_v50 = vld [vmem:[#allocation85_spill] sm:$0xff]  ;;  %v468_v37 = vld [vmem:[%s7944_s3 + $0x8] sm:$0xff] }
 0x1f9   : > { %v1346_v17 = vmul.f32 %v4040_v4, %v8428_v50  ;;  %v492_v4 = vld [vmem:[%s7944_s3 + $0xc8] sm:$0xff]  ;;  %v470_v9 = vld [vmem:[%s7944_s3 + $0x18] sm:$0xff] }
 0x1fa   : > { %1443 = vadd.xlane.f32.xlu0 %v1442_v22  ;;  %v485_v22 = vld [vmem:[%s7944_s3 + $0x90] sm:$0xff]  ;;  %v506_v40 = vld [vmem:[%s7944_s3 + $0x138] sm:$0xff] }
 0x1fc   : > { %1356 = vadd.xlane.f32.xlu1 %v5650_v21  ;;  %v8422_v21 = vld [vmem:[#allocation57_spill] sm:$0xff] }
 0x1fe   : > { %1353 = vadd.xlane.f32.xlu0 %v5684_v25  ;;  %v1332_v25 = vmul.f32 %v5802_v49, %v8422_v21  ;;  %v8426_v49 = vld [vmem:[#allocation72_spill] sm:$0xff] }
 0x1ff   : > { %v1342_v48 = vmul.f32 %v4032_v57, %v8426_v49  ;;  %v1391_v57 = vadd.f32 %v1347_v20, %v1346_v17  ;;  %v493_v21 = vld [vmem:[%s7944_s3 + $0xd0] sm:$0xff]  ;;  %v475_v17 = vld [vmem:[%s7944_s3 + $0x40] sm:$0xff]  ;;  %v504_v20 = vld [vmem:[%s7944_s3 + $0x128] sm:$0xff] }
 0x200   : > { %1362 = vadd.xlane.f32.xlu1 %v5698_v11  ;;  %v8424_v11 = vld [vmem:[#allocation66_spill] sm:$0xff]  ;;  %v1370_v3 = vadd.f32 %v1333_v58, %v1332_v25 }
 0x201   : > { %v1385_v62 = vadd.f32 %v1343_v6, %v1342_v48  ;;  %v2617_v25 = vld [vmem:[%s7946_s5] sm:$0xff]  ;;  %v500_v6 = vld [vmem:[%s7944_s3 + $0x108] sm:$0xff] }
 0x202   : > { %1359 = vadd.xlane.f32.xlu0 %v5714_v33  ;;  %v1338_v33 = vmul.f32 %v5815_v51, %v8424_v11  ;;  %v1341_v51 = vmul.f32 %v4038_v19, %v4985_v55  ;;  %v1349_v55 = vmul.f32 %v4054_v56, %v5153_v39  ;;  %v484_v19 = vld [vmem:[%s7944_s3 + $0x88] sm:$0xff]  ;;  %v490_v39 = vld [vmem:[%s7944_s3 + $0xb8] sm:$0xff]  ;;  %v497_v11 = vld [vmem:[%s7944_s3 + $0xf0] sm:$0xff] }
 0x203   : > { %v472_v56 = vld [vmem:[%s7944_s3 + $0x28] sm:$0xff]  ;;  %v471_v48 = vld [vmem:[%s7944_s3 + $0x20] sm:$0xff] }
 0x204   : > { %1368 = vadd.xlane.f32.xlu1 %v1367_v36  ;;  %v1379_v7 = vadd.f32 %v1339_v54, %v1338_v33  ;;  %v1382_v23 = vadd.f32 %v1341_v51, %v1340_v8  ;;  %v1394_v47 = vadd.f32 %v1349_v55, %v1348_v29  ;;  %v491_v36 = vld [vmem:[%s7944_s3 + $0xc0] sm:$0xff]  ;;  %v473_v8 = vld [vmem:[%s7944_s3 + $0x30] sm:$0xff]  ;;  %v508_v55 = vld [vmem:[%s7944_s3 + $0x148] sm:$0xff] }
 0x205   : > { %v2621_v33 = vld [vmem:[%s7946_s5 + $0x20] sm:$0xff] }
 0x206   : > { %1365 = vadd.xlane.f32.xlu0 %v5716_v43  ;;  %v1376_v43 = vadd.f32 %v1337_v24, %v1336_v12  ;;  %v467_v54 = vld [vmem:[%s7944_s3] sm:$0xff]  ;;  %v469_v24 = vld [vmem:[%s7944_s3 + $0x10] sm:$0xff] }
 0x207   : > { %v479_v29 = vld [vmem:[%s7944_s3 + $0x60] sm:$0xff] }
 0x208   : > { %1374 = vadd.xlane.f32.xlu1 %v1373_v5  ;;  %v2619_v5 = vld [vmem:[%s7946_s5 + $0x10] sm:$0xff] }
 0x20a   : > { %1371 = vadd.xlane.f32.xlu0 %v1370_v3  ;;  %v2623_v3 = vld [vmem:[%s7946_s5 + $0x30] sm:$0xff] }
 0x20c   : > { %1380 = vadd.xlane.f32.xlu1 %v1379_v7  ;;  %v482_v7 = vld [vmem:[%s7944_s3 + $0x78] sm:$0xff] }
 0x20e   : > { %1377 = vadd.xlane.f32.xlu0 %v1376_v43 }
 0x210   : > { %1386 = vadd.xlane.f32.xlu1 %v1385_v62  ;;  %v502_v62 = vld [vmem:[%s7944_s3 + $0x118] sm:$0xff] }
 0x212   : > { %1383 = vadd.xlane.f32.xlu0 %v1382_v23 }
 0x214   : > { %1392 = vadd.xlane.f32.xlu1 %v1391_v57 }
 0x216   : > { %1389 = vadd.xlane.f32.xlu0 %v1388_v45 }
 0x21a   : > { %1395 = vadd.xlane.f32.xlu0 %v1394_v47 }
 0x225   : > { %1615 = vperm.xlu1 %3964, %v484_v19   ;;  %v481_v19 = vld [vmem:[%s7944_s3 + $0x70] sm:$0xff] }
 0x230   : > { %1610 = vperm.xlu0 %3963, %v483_v35   ;;  %v5960_v52 = vpop.xlane.xlu1 %1404 }
 0x231   : > { %8435 = vst [vmem:[#allocation25_spill] sm:$0xff] %v5960_v52 }
 0x234   : > { %1625 = vperm.xlu0 %3963, %v486_v38   ;;  %v510_v38 = vld [vmem:[%s7944_s3 + $0x158] sm:$0xff] }
 0x238   : > { %1635 = vperm.xlu0 %3963, %v488_v44  }
 0x23c   : > { %1645 = vperm.xlu0 %3963, %v490_v39   ;;  %v2618_v39 = vld [vmem:[%s7946_s5 + $0x8] sm:$0xff] }
 0x240   : > { %1655 = vperm.xlu0 %3963, %v492_v4   ;;  %v512_v4 = vld [vmem:[%s7944_s3 + $0x168] sm:$0xff] }
 0x243   : > { %v5917_v15 = vpop.xlane.xlu0 %1401 }
 0x244   : > { %1665 = vperm.xlu0 %3963, %v494_v16   ;;  %8430 = vst [vmem:[#allocation82_spill] sm:$0xff] %v5917_v15  ;;  %v4267_v15 = vld [vmem:[%s4707_s22 + $0x80] sm:$0xff] }
 0x247   : > { %v5970_v51 = vpop.xlane.xlu1 %1410 }
 0x248   : > { %1675 = vperm.xlu0 %3963, %v496_v30   ;;  %8437 = vst [vmem:[#allocation76_spill] sm:$0xff] %v5970_v51 }
 0x249   : > { %1398 = vadd.xlane.f32.xlu1 %v5822_v2  ;;  %v474_v2 = vld [vmem:[%s7944_s3 + $0x38] sm:$0xff]  ;;  %v5928_v58 = vpop.xlane.xlu0 %1407 }
 0x24a   : > { %8431 = vst [vmem:[#allocation17_spill] sm:$0xff] %v5928_v58  ;;  %v4272_v58 = vld [vmem:[%s4707_s22 + $0x90] sm:$0xff] }
 0x24c   : > { %1685 = vperm.xlu0 %3963, %v498_v28   ;;  %v2620_v28 = vld [vmem:[%s7946_s5 + $0x18] sm:$0xff] }
 0x24d   : > { %v5939_v13 = vpop.xlane.xlu0 %1413 }
 0x24e   : > { %8432 = vst [vmem:[#allocation19_spill] sm:$0xff] %v5939_v13  ;;  %v4266_v13 = vld [vmem:[%s4707_s22 + $0x58] sm:$0xff] }
 0x250   : > { %1791 = vperm.xlu0 %3963, %v468_v37   ;;  %v514_v37 = vld [vmem:[%s7944_s3 + $0x178] sm:$0xff] }
 0x254   : > { %1801 = vperm.xlu0 %3963, %v470_v9  }
 0x258   : > { %1811 = vperm.xlu0 %3963, %v472_v56   ;;  %v2622_v56 = vld [vmem:[%s7946_s5 + $0x28] sm:$0xff] }
 0x25a   : > { %1620 = vperm.xlu1 %3964, %v485_v22  }
 0x25c   : > { %1821 = vperm.xlu0 %3963, %v474_v2  }
 0x25e   : > { %1630 = vperm.xlu1 %3964, %v487_v31   ;;  %v2624_v31 = vld [vmem:[%s7946_s5 + $0x38] sm:$0xff] }
 0x260   : > { %1831 = vperm.xlu0 %3963, %v476_v53  }
 0x262   : > { %1640 = vperm.xlu1 %3964, %v489_v26   ;;  %v499_v26 = vld [vmem:[%s7944_s3 + $0x100] sm:$0xff] }
 0x264   : > { %1841 = vperm.xlu0 %3963, %v478_v32  }
 0x266   : > { %1650 = vperm.xlu1 %3964, %v491_v36   ;;  %v501_v36 = vld [vmem:[%s7944_s3 + $0x110] sm:$0xff] }
 0x268   : > { %1851 = vperm.xlu0 %3963, %v480_v61  }
 0x26a   : > { %1660 = vperm.xlu1 %3964, %v493_v21  }
 0x26c   : > { %2627 = vperm.xlu0 %3963, %v2617_v25   ;;  %v503_v25 = vld [vmem:[%s7944_s3 + $0x120] sm:$0xff] }
 0x26e   : > { %1670 = vperm.xlu1 %3964, %v495_v46  }
 0x270   : > { %2637 = vperm.xlu0 %3963, %v2619_v5  }
 0x271   : > { %v5980_v1 = vpop.xlane.xlu1 %1416 }
 0x272   : > { %1680 = vperm.xlu1 %3964, %v497_v11   ;;  %8439 = vst [vmem:[#allocation77_spill] sm:$0xff] %v5980_v1  ;;  %v505_v11 = vld [vmem:[%s7944_s3 + $0x130] sm:$0xff] }
 0x274   : > { %2647 = vperm.xlu0 %3963, %v2621_v33  }
 0x275   : > { %v5993_v57 = vpop.xlane.xlu1 %1422 }
 0x276   : > { %1786 = vperm.xlu1 %3964, %v467_v54   ;;  %8441 = vst [vmem:[#allocation95_spill] sm:$0xff] %v5993_v57 }
 0x277   : > { %v5947_v12 = vpop.xlane.xlu0 %1419 }
 0x278   : > { %8433 = vst [vmem:[#allocation27_spill] sm:$0xff] %v5947_v12  ;;  %2657 = vperm.xlu0 %3963, %v2623_v3  }
 0x279   : > { %v6008_v35 = vpop.xlane.xlu1 %1428 }
 0x27a   : > { %1796 = vperm.xlu1 %3964, %v469_v24   ;;  %8444 = vst [vmem:[#allocation62_spill] sm:$0xff] %v6008_v35  ;;  %v507_v24 = vld [vmem:[%s7944_s3 + $0x140] sm:$0xff]  ;;  %v4257_v35 = vld [vmem:[%s4707_s22 + $0x28] sm:$0xff] }
 0x27b   : > { %v5955_v49 = vpop.xlane.xlu0 %1425 }
 0x27c   : > { %8434 = vst [vmem:[#allocation36_spill] sm:$0xff] %v5955_v49  ;;  %1861 = vperm.xlu0 %3963, %v482_v7   ;;  %v4263_v49 = vld [vmem:[%s4707_s22 + $0x60] sm:$0xff] }
 0x27d   : > { %v6021_v16 = vpop.xlane.xlu1 %1434 }
 0x27e   : > { %1806 = vperm.xlu1 %3964, %v471_v48   ;;  %8446 = vst [vmem:[#allocation39_spill] sm:$0xff] %v6021_v16  ;;  %v8481_v16 = vld [vmem:[#allocation18_spill] sm:$0xff] }
 0x27f   : > { %v5965_v43 = vpop.xlane.xlu0 %1431 }
 0x280   : > { %8436 = vst [vmem:[#allocation45_spill] sm:$0xff] %v5965_v43  ;;  %1999 = vperm.xlu0 %3963, %v500_v6  }
 0x281   : > { %v6036_v22 = vpop.xlane.xlu1 %1440 }
 0x282   : > { %1816 = vperm.xlu1 %3964, %v473_v8   ;;  %8449 = vst [vmem:[#allocation11_spill] sm:$0xff] %v6036_v22  ;;  %v4254_v22 = vld [vmem:[%s4707_s22 + $0x10] sm:$0xff] }
 0x283   : > { %v5975_v50 = vpop.xlane.xlu0 %1437 }
 0x284   : > { %8438 = vst [vmem:[#allocation59_spill] sm:$0xff] %v5975_v50  ;;  %2009 = vperm.xlu0 %3963, %v502_v62   ;;  %v509_v62 = vld [vmem:[%s7944_s3 + $0x150] sm:$0xff]  ;;  %v4255_v50 = vld [vmem:[%s4707_s22] sm:$0xff] }
 0x285   : > { %v6043_v53 = vpop.xlane.xlu1 %1446 }
 0x286   : > { %1826 = vperm.xlu1 %3964, %v475_v17   ;;  %8451 = vst [vmem:[#allocation71_spill] sm:$0xff] %v6043_v53 }
 0x287   : > { %v5985_v23 = vpop.xlane.xlu0 %1443 }
 0x288   : > { %8440 = vst [vmem:[#allocation9_spill] sm:$0xff] %v5985_v23  ;;  %2019 = vperm.xlu0 %3963, %v504_v20  }
 0x289   : > { %v6053_v61 = vpop.xlane.xlu1 %1356 }
 0x28a   : > { %1836 = vperm.xlu1 %3964, %v477_v60   ;;  %8453 = vst [vmem:[#allocation7_spill] sm:$0xff] %v6053_v61 }
 0x28b   : > { %v5995_v45 = vpop.xlane.xlu0 %1353 }
 0x28c   : > { %8442 = vst [vmem:[#allocation37_spill] sm:$0xff] %v5995_v45  ;;  %2029 = vperm.xlu0 %3963, %v506_v40   ;;  %v6201_v45 = vsub.f32 %v4263_v49, %v5690_v42 }
 0x28d   : > { %v6060_v46 = vpop.xlane.xlu1 %1362 }
 0x28e   : > { %1846 = vperm.xlu1 %3964, %v479_v29   ;;  %8455 = vst [vmem:[#allocation50_spill] sm:$0xff] %v6060_v46  ;;  %v511_v29 = vld [vmem:[%s7944_s3 + $0x160] sm:$0xff]  ;;  %8494 = vst [vmem:[#allocation23_spill] sm:$0xff] %v6201_v45 }
 0x28f   : > { %v6003_v47 = vpop.xlane.xlu0 %1359 }
 0x290   : > { %8443 = vst [vmem:[#allocation83_spill] sm:$0xff] %v6003_v47  ;;  %2039 = vperm.xlu0 %3963, %v508_v55  }
 0x291   : > { %v6078_v48 = vpop.xlane.xlu1 %1368 }
 0x292   : > { %1856 = vperm.xlu1 %3964, %v481_v19   ;;  %8457 = vst [vmem:[#allocation80_spill] sm:$0xff] %v6078_v48 }
 0x293   : > { %v6013_v44 = vpop.xlane.xlu0 %1365 }
 0x294   : > { %8445 = vst [vmem:[#allocation84_spill] sm:$0xff] %v6013_v44  ;;  %2049 = vperm.xlu0 %3963, %v510_v38  }
 0x295   : > { %v6091_v60 = vpop.xlane.xlu1 %1374 }
 0x296   : > { %2632 = vperm.xlu1 %3964, %v2618_v39   ;;  %8461 = vst [vmem:[#allocation56_spill] sm:$0xff] %v6091_v60  ;;  %v513_v39 = vld [vmem:[%s7944_s3 + $0x170] sm:$0xff]  ;;  %v4256_v60 = vld [vmem:[%s4707_s22 + $0x8] sm:$0xff] }
 0x297   : > { %v6023_v30 = vpop.xlane.xlu0 %1371  ;;  %v6159_v43 = vsub.f32 %v4256_v60, %v8481_v16  ;;  %v8487_v60 = vld [vmem:[#allocation14_spill] sm:$0xff] }
 0x298   : > { %8447 = vst [vmem:[#allocation40_spill] sm:$0xff] %v6023_v30  ;;  %2059 = vperm.xlu0 %3963, %v512_v4   ;;  %v4258_v30 = vld [vmem:[%s4707_s22 + $0x18] sm:$0xff] }
 0x299   : > { %v6107_v4 = vpop.xlane.xlu1 %1380  ;;  %8483 = vst [vmem:[#allocation43_spill] sm:$0xff] %v6159_v43 }
 0x29a   : > { %2642 = vperm.xlu1 %3964, %v2620_v28   ;;  %8464 = vst [vmem:[#allocation99_spill] sm:$0xff] %v6107_v4 }
 0x29b   : > { %v6031_v9 = vpop.xlane.xlu0 %1377 }
 0x29c   : > { %8448 = vst [vmem:[#allocation98_spill] sm:$0xff] %v6031_v9  ;;  %2069 = vperm.xlu0 %3963, %v514_v37   ;;  %v6155_v9 = vsub.f32 %v4255_v50, %v8481_v16  ;;  %v4259_v16 = vld [vmem:[%s4707_s22 + $0x40] sm:$0xff]  ;;  %v4261_v50 = vld [vmem:[%s4707_s22 + $0x38] sm:$0xff] }
 0x29d   : > { %v6111_v37 = vpop.xlane.xlu1 %1386  ;;  %v6177_v44 = vsub.f32 %v4259_v16, %v8487_v60 }
 0x29e   : > { %2652 = vperm.xlu1 %3964, %v2622_v56   ;;  %8465 = vst [vmem:[#allocation90_spill] sm:$0xff] %v6111_v37  ;;  %8482 = vst [vmem:[#allocation16_spill] sm:$0xff] %v6155_v9 }
 0x29f   : > { %v6038_v2 = vpop.xlane.xlu0 %1383  ;;  %8488 = vst [vmem:[#allocation22_spill] sm:$0xff] %v6177_v44 }
 0x2a0   : > { %8450 = vst [vmem:[#allocation2_spill] sm:$0xff] %v6038_v2  ;;  %v6149_v2 = vsub.f32 %v4254_v22, %v5662_v34  ;;  %v6167_v22 = vsub.f32 %v4258_v30, %v5662_v34  ;;  %v4262_v34 = vld [vmem:[%s4707_s22 + $0x48] sm:$0xff] }
 0x2a1   : > { %v6197_v30 = vsub.f32 %v4262_v34, %v8487_v60  ;;  %v4265_v34 = vld [vmem:[%s4707_s22 + $0x68] sm:$0xff] }
 0x2a2   : > { %2662 = vperm.xlu1 %3964, %v2624_v31   ;;  %8479 = vst [vmem:[#allocation5_spill] sm:$0xff] %v6149_v2  ;;  %8485 = vst [vmem:[#allocation53_spill] sm:$0xff] %v6167_v22  ;;  %v8497_v1 = vrot.slane %v6149_v2, 1  ;;  %v6219_v49 = vsub.f32 %v4265_v34, %v5690_v42  ;;  %v4271_v34 = vld [vmem:[%s4707_s22 + $0xa0] sm:$0xff] }
 0x2a3   : > { %v6048_v32 = vpop.xlane.xlu0 %1389  ;;  %8493 = vst [vmem:[#allocation21_spill] sm:$0xff] %v6197_v30  ;;  %v6245_v51 = vsub.f32 %v4271_v34, %v5720_v0  ;;  %v4278_v34 = vld [vmem:[%s4707_s22 + $0xb8] sm:$0xff] }
 0x2a4   : > { %8452 = vst [vmem:[#allocation3_spill] sm:$0xff] %v6048_v32  ;;  %8500 = vst [vmem:[#allocation42_spill] sm:$0xff] %v6219_v49 }
 0x2a5   : > { %8506 = vst [vmem:[#allocation52_spill] sm:$0xff] %v6245_v51 }
 0x2a6   : > { %1994 = vperm.xlu1 %3964, %v499_v26   ;;  %v6117_v26 = vpop.xlane.xlu1 %1392 }
 0x2a7   : > { %v6055_v21 = vpop.xlane.xlu0 %1395  ;;  %8468 = vst [vmem:[#allocation94_spill] sm:$0xff] %v6117_v26 }
 0x2a8   : > { %8454 = vst [vmem:[#allocation96_spill] sm:$0xff] %v6055_v21 }
 0x2aa   : > { %2004 = vperm.xlu1 %3964, %v501_v36  }
 0x2ae   : > { %2014 = vperm.xlu1 %3964, %v503_v25   ;;  %v6067_v33 = vpop.f32.mrb[0].mxu0  ;;  %v6121_v25 = vpop.permute.xlu1 %1615 }
 0x2af   : > { %v6062_v5 = vpop.permute.xlu0 %1610  ;;  %v6069_v54 = vpop.f32.mrb[1].mxu0 }
 0x2b2   : > { %2024 = vperm.xlu1 %3964, %v505_v11   ;;  %v6076_v7 = vpop.f32.mrb[2].mxu0 }
 0x2b3   : > { %v6071_v3 = vpop.permute.xlu0 %1625  ;;  %8456 = vst [vmem:[#allocation91_spill] sm:$0xff] %v6076_v7  ;;  %v6080_v6 = vpop.f32.mrb[3].mxu0 }
 0x2b4   : > { %8458 = vst [vmem:[#allocation92_spill] sm:$0xff] %v6080_v6 }
 0x2b6   : > { %2034 = vperm.xlu1 %3964, %v507_v24   ;;  %v6087_v17 = vpop.f32.mrb[4].mxu0 }
 0x2b7   : > { %v6082_v8 = vpop.permute.xlu0 %1635  ;;  %8459 = vst [vmem:[#allocation41_spill] sm:$0xff] %v6087_v17  ;;  %v6089_v20 = vpop.f32.mrb[5].mxu0  ;;  %v8523_v17 = vrot.slane %v6197_v30, 1 }
 0x2b8   : > { %8460 = vst [vmem:[#allocation89_spill] sm:$0xff] %v6089_v20  ;;  %v8533_v20 = vld [vmem:[#allocation20_spill] sm:$0xff] }
 0x2ba   : > { %2044 = vperm.xlu1 %3964, %v509_v62   ;;  %v6098_v55 = vpop.f32.mrb[6].mxu0 }
 0x2bb   : > { %v6093_v40 = vpop.permute.xlu0 %1645  ;;  %8462 = vst [vmem:[#allocation44_spill] sm:$0xff] %v6098_v55  ;;  %v6100_v19 = vpop.f32.mrb[7].mxu0 }
 0x2bc   : > { %8463 = vst [vmem:[#allocation51_spill] sm:$0xff] %v6100_v19  ;;  %v8516_v19 = vld [vmem:[#allocation81_spill] sm:$0xff] }
 0x2be   : > { %2054 = vperm.xlu1 %3964, %v511_v29  }
 0x2bf   : > { %v6102_v38 = vpop.permute.xlu0 %1655 }
 0x2c2   : > { %2064 = vperm.xlu1 %3964, %v513_v39  }
 0x2c3   : > { %v6109_v28 = vpop.permute.xlu0 %1665 }
 0x2c7   : > { %v6113_v56 = vpop.permute.xlu0 %1675 }
 0x2c8   : > { %8466 = vst [vmem:[#allocation93_spill] sm:$0xff] %v6113_v56  ;;  %v8071_v56 = vrot.slane %v6149_v2, 7 }
 0x2cb   : > { %v6115_v31 = vpop.permute.xlu0 %1685 }
 0x2cc   : > { %8467 = vst [vmem:[#allocation87_spill] sm:$0xff] %v6115_v31 }
 0x2cf   : > { %v6119_v36 = vpop.permute.xlu0 %1791 }
 0x2d3   : > { %v6123_v11 = vpop.permute.xlu0 %1801 }
 0x2d6   : > { %v6125_v24 = vpop.xlane.xlu1 %1398 }
 0x2d7   : > { %8469 = vst [vmem:[#allocation10_spill] sm:$0xff] %v6125_v24  ;;  %v6127_v62 = vpop.permute.xlu0 %1811  ;;  %v4253_v24 = vld [vmem:[%s4707_s22 + $0x20] sm:$0xff] }
 0x2d8   : > { %8470 = vst [vmem:[#allocation97_spill] sm:$0xff] %v6127_v62  ;;  %v6145_v23 = vsub.f32 %v4253_v24, %v5664_v27  ;;  %v6163_v24 = vsub.f32 %v4257_v35, %v5664_v27  ;;  %v4260_v27 = vld [vmem:[%s4707_s22 + $0x30] sm:$0xff]  ;;  %v8489_v35 = vld [vmem:[#allocation70_spill] sm:$0xff] }
 0x2d9   : > { %v6181_v46 = vsub.f32 %v4260_v27, %v8489_v35  ;;  %v6188_v12 = vsub.f32 %v4261_v50, %v8489_v35  ;;  %v4264_v50 = vld [vmem:[%s4707_s22 + $0x50] sm:$0xff] }
 0x2da   : > { %v6129_v29 = vpop.permute.xlu1 %1620  ;;  %8478 = vst [vmem:[#allocation4_spill] sm:$0xff] %v6145_v23  ;;  %8484 = vst [vmem:[#allocation55_spill] sm:$0xff] %v6163_v24  ;;  %v6205_v35 = vsub.f32 %v4264_v50, %v5687_v10  ;;  %v8496_v16 = vrot.slane %v6145_v23, 1  ;;  %v6223_v50 = vsub.f32 %v4266_v13, %v5687_v10  ;;  %v4270_v10 = vld [vmem:[%s4707_s22 + $0x78] sm:$0xff] }
 0x2db   : > { %8471 = vst [vmem:[#allocation100_spill] sm:$0xff] %v6129_v29  ;;  %v6131_v39 = vpop.permute.xlu0 %1821  ;;  %8490 = vst [vmem:[#allocation26_spill] sm:$0xff] %v6181_v46  ;;  %v6241_v13 = vsub.f32 %v4270_v10, %v5701_v59 }
 0x2dc   : > { %8472 = vst [vmem:[#allocation12_spill] sm:$0xff] %v6131_v39  ;;  %8491 = vst [vmem:[#allocation30_spill] sm:$0xff] %v6188_v12  ;;  %v6213_v61 = vsel %vm790_vm0, %v8497_v1, %v8496_v16  ;;  %v6229_v1 = vsub.f32 %v4267_v15, %v5709_v14  ;;  %v4268_v16 = vld [vmem:[%s4707_s22 + $0x88] sm:$0xff]  ;;  %v6249_v15 = vsub.f32 %v4272_v58, %v5718_v18 }
 0x2dd   : > { %8495 = vst [vmem:[#allocation32_spill] sm:$0xff] %v6205_v35  ;;  %8501 = vst [vmem:[#allocation38_spill] sm:$0xff] %v6223_v50  ;;  %v6233_v52 = vsub.f32 %v4268_v16, %v5709_v14  ;;  %v8508_v14 = vrot.slane %v6163_v24, 1  ;;  %v8509_v16 = vrot.slane %v6167_v22, 1 }
 0x2de   : > { %v6133_v21 = vpop.permute.xlu1 %1630  ;;  %8502 = vst [vmem:[#allocation28_spill] sm:$0xff] %v6229_v1  ;;  %8505 = vst [vmem:[#allocation49_spill] sm:$0xff] %v6241_v13 }
 0x2df   : > { %8473 = vst [vmem:[#allocation13_spill] sm:$0xff] %v6133_v21  ;;  %v6135_v26 = vpop.permute.xlu0 %1831  ;;  %8503 = vst [vmem:[#allocation29_spill] sm:$0xff] %v6233_v52 }
 0x2e0   : > { %8474 = vst [vmem:[#allocation63_spill] sm:$0xff] %v6135_v26  ;;  %8507 = vst [vmem:[#allocation54_spill] sm:$0xff] %v6249_v15  ;;  %v4280_v26 = vld [vmem:[%s4707_s22 + $0xe8] sm:$0xff] }
 0x2e1   : > { %v6331_v29 = vsub.f32 %v4280_v26, %v5740_v63 }
 0x2e2   : > { %v6137_v32 = vpop.permute.xlu1 %1640 }
 0x2e3   : > { %8475 = vst [vmem:[#allocation64_spill] sm:$0xff] %v6137_v32  ;;  %v6139_v37 = vpop.permute.xlu0 %1841  ;;  %v4274_v32 = vld [vmem:[%s4707_s22 + $0x98] sm:$0xff]  ;;  %8529 = vst [vmem:[#allocation47_spill] sm:$0xff] %v6331_v29 }
 0x2e4   : > { %8476 = vst [vmem:[#allocation34_spill] sm:$0xff] %v6139_v37 }
 0x2e6   : > { %v6141_v53 = vpop.permute.xlu1 %1650 }
 0x2e7   : > { %8477 = vst [vmem:[#allocation35_spill] sm:$0xff] %v6141_v53  ;;  %v6151_v4 = vpop.permute.xlu0 %1851 }
 0x2e8   : > { %8480 = vst [vmem:[#allocation6_spill] sm:$0xff] %v6151_v4  ;;  %v8525_v4 = vrot.slane %v6201_v45, 1 }
 0x2ea   : > { %v6169_v48 = vpop.permute.xlu1 %1660 }
 0x2eb   : > { %8486 = vst [vmem:[#allocation8_spill] sm:$0xff] %v6169_v48  ;;  %v6173_v57 = vpop.permute.xlu0 %2627  ;;  %v8515_v48 = vrot.slane %v6181_v46, 1 }
 0x2ee   : > { %v6192_v47 = vpop.permute.xlu1 %1670 }
 0x2ef   : > { %8492 = vst [vmem:[#allocation31_spill] sm:$0xff] %v6192_v47  ;;  %v6215_v60 = vpop.permute.xlu0 %2637  ;;  %v4269_v47 = vld [vmem:[%s4707_s22 + $0x70] sm:$0xff] }
 0x2f0   : > { %8499 = vst [vmem:[#allocation33_spill] sm:$0xff] %v6215_v60  ;;  %v6237_v42 = vsub.f32 %v4269_v47, %v5701_v59  ;;  %v1779_v47 = vsel %vm790_vm0, %v8509_v16, %v8508_v14  ;;  %v4273_v59 = vld [vmem:[%s4707_s22 + $0xa8] sm:$0xff]  ;;  %v6271_v14 = vsub.f32 %v4274_v32, %v5718_v18  ;;  %v8514_v16 = vrot.slane %v6177_v44, 1 }
 0x2f1   : > { %v6262_v10 = vsub.f32 %v4273_v59, %v5720_v0  ;;  %v4277_v18 = vld [vmem:[%s4707_s22 + $0xc8] sm:$0xff] }
 0x2f2   : > { %8504 = vst [vmem:[#allocation48_spill] sm:$0xff] %v6237_v42  ;;  %v6258_v53 = vpop.permute.xlu1 %1680  ;;  %8513 = vst [vmem:[#allocation65_spill] sm:$0xff] %v6271_v14  ;;  %v6279_v0 = vsel %vm790_vm0, %v8515_v48, %v8514_v16  ;;  %v4276_v48 = vld [vmem:[%s4707_s22 + $0xb0] sm:$0xff]  ;;  %v8518_v16 = vld [vmem:[#allocation15_spill] sm:$0xff]  ;;  %v6301_v32 = vsub.f32 %v4277_v18, %v8516_v19  ;;  %v8537_v26 = vrot.slane %v6237_v42, 1 }
 0x2f3   : > { %8510 = vst [vmem:[#allocation61_spill] sm:$0xff] %v6258_v53  ;;  %8511 = vst [vmem:[#allocation60_spill] sm:$0xff] %v6262_v10  ;;  %v6267_v55 = vpop.permute.xlu0 %2647  ;;  %v4275_v53 = vld [vmem:[%s4707_s22 + $0xc0] sm:$0xff]  ;;  %v6293_v21 = vsub.f32 %v4276_v48, %v8518_v16  ;;  %v8524_v48 = vrot.slane %v6188_v12, 1 }
 0x2f4   : > { %8512 = vst [vmem:[#allocation68_spill] sm:$0xff] %v6267_v55  ;;  %v6289_v37 = vsub.f32 %v4275_v53, %v8516_v19  ;;  %8521 = vst [vmem:[#allocation69_spill] sm:$0xff] %v6301_v32  ;;  %v6305_v53 = vsub.f32 %v4278_v34, %v8518_v16  ;;  %v4279_v34 = vld [vmem:[%s4707_s22 + $0xe0] sm:$0xff]  ;;  %v4282_v55 = vld [vmem:[%s4707_s22 + $0xd8] sm:$0xff] }
 0x2f5   : > { %8519 = vst [vmem:[#allocation74_spill] sm:$0xff] %v6293_v21  ;;  %v6313_v59 = vsel %vm790_vm0, %v8524_v48, %v8523_v17  ;;  %v6327_v16 = vsub.f32 %v4279_v34, %v5740_v63  ;;  %v8530_v17 = vrot.slane %v6219_v49, 1  ;;  %v8531_v48 = vrot.slane %v6223_v50, 1 }
 0x2f6   : > { %8517 = vst [vmem:[#allocation78_spill] sm:$0xff] %v6289_v37  ;;  %v6297_v58 = vpop.permute.xlu1 %1786  ;;  %8522 = vst [vmem:[#allocation75_spill] sm:$0xff] %v6305_v53  ;;  %v6348_v7 = vsub.f32 %v4282_v55, %v8533_v20  ;;  %v8536_v63 = vrot.slane %v6229_v1, 1  ;;  %v8543_v55 = vrot.slane %v6249_v15, 1  ;;  %v8560_v60 = vrot.slane %v6305_v53, 1 }
 0x2f7   : > { %8520 = vst [vmem:[#allocation88_spill] sm:$0xff] %v6297_v58  ;;  %v8526_v58 = vrot.slane %v6205_v35, 1  ;;  %v6323_v18 = vpop.permute.xlu0 %2657  ;;  %8528 = vst [vmem:[#allocation46_spill] sm:$0xff] %v6327_v16 }
 0x2f8   : > { %8527 = vst [vmem:[#allocation79_spill] sm:$0xff] %v6323_v18  ;;  %v4281_v18 = vld [vmem:[%s4707_s22 + $0xd0] sm:$0xff]  ;;  %8535 = vst [vmem:[#allocation66_spill] sm:$0xff] %v6348_v7  ;;  %v6356_v39 = vsel %vm790_vm0, %v8537_v26, %v8536_v63  ;;  %v1867_v63 = vmul.f32 %v6119_v36, %v1779_v47  ;;  %v8550_v47 = vrot.slane %v6271_v14, 1 }
 0x2f9   : > { %v6321_v19 = vsel %vm790_vm0, %v8526_v58, %v8525_v4  ;;  %v6339_v4 = vsel %vm790_vm0, %v8531_v48, %v8530_v17  ;;  %v6344_v34 = vsub.f32 %v4281_v18, %v8533_v20  ;;  %8538 = vst [vmem:[#allocation67_spill] sm:$0xff] %v6356_v39  ;;  %v8539_v17 = vrot.slane %v6233_v52, 1 }
 0x2fa   : > { %8532 = vst [vmem:[#allocation57_spill] sm:$0xff] %v6339_v4  ;;  %v8540_v48 = vrot.slane %v6241_v13, 1  ;;  %v8542_v20 = vrot.slane %v6245_v51, 1  ;;  %v6377_v39 = vpop.permute.xlu1 %1796  ;;  %v4283_v4 = vld [vmem:[%s4707_s22 + $0xf0] sm:$0xff] }
 0x2fb   : > { %8534 = vst [vmem:[#allocation58_spill] sm:$0xff] %v6344_v34  ;;  %8545 = vst [vmem:[#allocation85_spill] sm:$0xff] %v6377_v39  ;;  %v8553_v39 = vrot.slane %v6293_v21, 1 }
 0x2fc   : > { %v6364_v18 = vsel %vm790_vm0, %v8540_v48, %v8539_v17  ;;  %v6373_v31 = vsel %vm790_vm0, %v8543_v55, %v8542_v20  ;;  %v6381_v17 = vsub.f32 %v4283_v4, %v5750_v41  ;;  %v4284_v48 = vld [vmem:[%s4707_s22 + $0xf8] sm:$0xff]  ;;  %v1866_v55 = vmul.f32 %v6119_v36, %v6213_v61 }
 0x2fd   : > { %8541 = vst [vmem:[#allocation72_spill] sm:$0xff] %v6364_v18  ;;  %8544 = vst [vmem:[#allocation73_spill] sm:$0xff] %v6373_v31  ;;  %v6385_v58 = vsub.f32 %v4284_v48, %v5750_v41  ;;  %v6387_v18 = vpop.permute.xlu0 %1861  ;;  %v1690_v20 = vmul.f32 %v6121_v25, %v6149_v2  ;;  %v1691_v61 = vmul.f32 %v6121_v25, %v6167_v22  ;;  %v8549_v36 = vrot.slane %v6262_v10, 1 }
 0x2fe   : > { %8546 = vst [vmem:[#allocation86_spill] sm:$0xff] %v6381_v17  ;;  %8548 = vst [vmem:[#allocation14_spill] sm:$0xff] %v6387_v18  ;;  %v8552_v41 = vrot.slane %v6289_v37, 1  ;;  %v6420_v48 = vpop.permute.xlu1 %1806  ;;  %v8556_v31 = vrot.slane %v6155_v9, 7  ;;  %v8559_v4 = vrot.slane %v6301_v32, 1 }
 0x2ff   : > { %8547 = vst [vmem:[#allocation18_spill] sm:$0xff] %v6385_v58  ;;  %v6410_v26 = vsel %vm790_vm0, %v8550_v47, %v8549_v36  ;;  %8555 = vst [vmem:[#allocation15_spill] sm:$0xff] %v6420_v48  ;;  %v8557_v47 = vrot.slane %v6167_v22, 7  ;;  %v1898_v48 = vadd.f32 %v1866_v55, %v1690_v20  ;;  %v8566_v20 = vrot.slane %v6348_v7, 1 }
 0x300   : > { %8551 = vst [vmem:[#allocation70_spill] sm:$0xff] %v6410_v26  ;;  %v6418_v18 = vsel %vm790_vm0, %v8553_v39, %v8552_v41  ;;  %v1988_v36 = vsel %vm999_vm1, %v8556_v31, %v8071_v56  ;;  %v8558_v26 = vrot.slane %v6159_v43, 7  ;;  %v6442_v62 = vsel %vm790_vm0, %v8560_v60, %v8559_v4 }
 0x301   : > { %8554 = vst [vmem:[#allocation81_spill] sm:$0xff] %v6418_v18  ;;  %v2000_v41 = vpop.permute.xlu0 %1999  ;;  %v1899_v18 = vadd.f32 %v1867_v63, %v1691_v61  ;;  %8561 = vst [vmem:[#allocation20_spill] sm:$0xff] %v6442_v62  ;;  %v8562_v31 = vrot.slane %v6327_v16, 1  ;;  %v8563_v56 = vrot.slane %v6344_v34, 1  ;;  %v8565_v63 = vrot.slane %v6331_v29, 1 }
 0x302   : > { %v1989_v39 = vsel %vm999_vm1, %v8558_v26, %v8557_v47  ;;  %v2074_v25 = vmul.f32 %v2000_v41, %v1988_v36  ;;  %v8568_v61 = vrot.slane %v6149_v2, 1  ;;  %v8569_v60 = vrot.slane %v6155_v9, 1 }
 0x303   : > { %v2075_v6 = vmul.f32 %v2000_v41, %v1989_v39  ;;  %v6450_v26 = vsel %vm790_vm0, %v8563_v56, %v8562_v31  ;;  %v6458_v55 = vsel %vm790_vm0, %v8566_v20, %v8565_v63  ;;  %v8571_v36 = vrot.slane %v6167_v22, 1  ;;  %v6481_v63 = vpop.permute.xlu1 %1816 }
 0x304   : > { %8564 = vst [vmem:[#allocation101_spill] sm:$0xff] %v6450_v26  ;;  %8567 = vst [vmem:[#allocation102_spill] sm:$0xff] %v6458_v55  ;;  %v6466_v4 = vsel %vm790_vm0, %v8569_v60, %v8568_v61  ;;  %v8572_v56 = vrot.slane %v6159_v43, 1  ;;  %v6476_v39 = vadd.f32 %v2074_v25, %v1898_v48  ;;  %v8577_v20 = vmov %v8569_v60 }
 0x305   : > { %8570 = vst [vmem:[#allocation103_spill] sm:$0xff] %v6466_v4  ;;  %v6478_v41 = vadd.f32 %v2075_v6, %v1899_v18  ;;  %8576 = vst [vmem:[#allocation107_spill] sm:$0xff] %v6481_v63  ;;  %v8578_v61 = vrot.slane %v6381_v17, 1  ;;  %v8583_v18 = vrot.slane %v6181_v46, 1  ;;  %v8584_v48 = vrot.slane %v6145_v23, 1 }
 0x306   : > { %v6474_v47 = vsel %vm790_vm0, %v8572_v56, %v8571_v36  ;;  %8574 = vst [vmem:[#allocation105_spill] sm:$0xff] %v6476_v39  ;;  %v8580_v55 = vmov %v8572_v56  ;;  %v8581_v36 = vrot.slane %v6385_v58, 1  ;;  %v1946_v4 = vrot.slane %v6249_v15, 7 }
 0x307   : > { %8573 = vst [vmem:[#allocation104_spill] sm:$0xff] %v6474_v47  ;;  %8575 = vst [vmem:[#allocation106_spill] sm:$0xff] %v6478_v41  ;;  %v6489_v60 = vsel %vm790_vm0, %v8578_v61, %v8577_v20  ;;  %v6505_v25 = vsel %vm790_vm0, %v8584_v48, %v8583_v18  ;;  %v8586_v20 = vrot.slane %v6188_v12, 1  ;;  %v8587_v61 = vrot.slane %v6163_v24, 1 }
 0x308   : > { %8579 = vst [vmem:[#allocation108_spill] sm:$0xff] %v6489_v60  ;;  %v6497_v6 = vsel %vm790_vm0, %v8581_v36, %v8580_v55  ;;  %8585 = vst [vmem:[#allocation110_spill] sm:$0xff] %v6505_v25  ;;  %v1932_v55 = vrot.slane %v6145_v23, 7  ;;  %v2139_v36 = vmax.f32 %v6476_v39, %v6478_v41  ;;  %v8589_v18 = vrot.slane %v6205_v35, 1 }
 0x309   : > { %8582 = vst [vmem:[#allocation109_spill] sm:$0xff] %v6497_v6  ;;  %v6514_v31 = vsel %vm790_vm0, %v8587_v61, %v8586_v20  ;;  %v8590_v48 = vrot.slane %v6177_v44, 1  ;;  %v8592_v60 = vrot.slane %v6223_v50, 1  ;;  %v8593_v20 = vrot.slane %v6197_v30, 1 }
 0x30a   : > { %8588 = vst [vmem:[#allocation111_spill] sm:$0xff] %v6514_v31  ;;  %v1933_v41 = vrot.slane %v6163_v24, 7  ;;  %v1939_v6 = vrot.slane %v6223_v50, 7  ;;  %v8595_v39 = vrot.slane %v6181_v46, 7  ;;  %2140 = vmax.xlane.f32.xlu0 %v2139_v36  ;;  %v8601_v31 = vrot.slane %v6188_v12, 7 }
 0x30b   : > { %v6526_v56 = vsel %vm790_vm0, %v8590_v48, %v8589_v18  ;;  %v6534_v61 = vsel %vm790_vm0, %v8593_v20, %v8592_v60  ;;  %v8597_v18 = vrot.slane %v6237_v42, 1  ;;  %v8598_v48 = vrot.slane %v6201_v45, 1  ;;  %v6553_v20 = vpop.permute.xlu1 %1826 }
 0x30c   : > { %8591 = vst [vmem:[#allocation112_spill] sm:$0xff] %v6526_v56  ;;  %8594 = vst [vmem:[#allocation113_spill] sm:$0xff] %v6534_v61  ;;  %v6542_v63 = vsel %vm999_vm1, %v1932_v55, %v8595_v39  ;;  %v1936_v60 = vrot.slane %v6177_v44, 7  ;;  %v1942_v61 = vrot.slane %v6237_v42, 7  ;;  %v6560_v39 = vsel %vm999_vm1, %v1933_v41, %v8601_v31 }
 0x30d   : > { %8596 = vst [vmem:[#allocation114_spill] sm:$0xff] %v6542_v63  ;;  %v6550_v56 = vsel %vm790_vm0, %v8598_v48, %v8597_v18  ;;  %8600 = vst [vmem:[#allocation116_spill] sm:$0xff] %v6553_v20  ;;  %v8603_v63 = vrot.slane %v6241_v13, 1  ;;  %v8604_v25 = vrot.slane %v6219_v49, 1  ;;  %v1937_v36 = vrot.slane %v6197_v30, 7 }
 0x30e   : > { %8599 = vst [vmem:[#allocation115_spill] sm:$0xff] %v6550_v56  ;;  %8602 = vst [vmem:[#allocation117_spill] sm:$0xff] %v6560_v39  ;;  %v1943_v48 = vrot.slane %v6241_v13, 7  ;;  %v8606_v20 = vrot.slane %v6205_v35, 7  ;;  %v8608_v31 = vrot.slane %v6249_v15, 1  ;;  %v8609_v39 = vrot.slane %v6229_v1, 1 }
 0x30f   : > { %v6568_v18 = vsel %vm790_vm0, %v8604_v25, %v8603_v63  ;;  %v8611_v63 = vrot.slane %v6271_v14, 1  ;;  %v8612_v25 = vrot.slane %v6233_v52, 1  ;;  %v1940_v47 = vrot.slane %v6201_v45, 7 }
 0x310   : > { %8605 = vst [vmem:[#allocation118_spill] sm:$0xff] %v6568_v18  ;;  %v6576_v56 = vsel %vm999_vm1, %v1936_v60, %v8606_v20  ;;  %v6584_v26 = vsel %vm790_vm0, %v8609_v39, %v8608_v31  ;;  %v6597_v20 = vsel %vm999_vm1, %v1937_v36, %v1939_v6  ;;  %v1947_v39 = vrot.slane %v6271_v14, 7 }
 0x311   : > { %8607 = vst [vmem:[#allocation119_spill] sm:$0xff] %v6576_v56  ;;  %8610 = vst [vmem:[#allocation120_spill] sm:$0xff] %v6584_v26  ;;  %v6592_v18 = vsel %vm790_vm0, %v8612_v25, %v8611_v63  ;;  %v1941_v56 = vrot.slane %v6219_v49, 7  ;;  %v6604_v31 = vsel %vm999_vm1, %v1940_v47, %v1942_v61  ;;  %v6606_v26 = vpop.permute.xlu1 %1836  ;;  %v8617_v63 = vrot.slane %v6293_v21, 1 }
 0x312   : > { %8613 = vst [vmem:[#allocation121_spill] sm:$0xff] %v6592_v18  ;;  %8614 = vst [vmem:[#allocation122_spill] sm:$0xff] %v6597_v20  ;;  %v8618_v25 = vrot.slane %v6245_v51, 1  ;;  %v8620_v20 = vrot.slane %v6305_v53, 1  ;;  %v8621_v49 = vrot.slane %v6262_v10, 1  ;;  %v1945_v30 = vrot.slane %v6233_v52, 7 }
 0x313   : > { %8615 = vst [vmem:[#allocation123_spill] sm:$0xff] %v6604_v31  ;;  %8616 = vst [vmem:[#allocation124_spill] sm:$0xff] %v6606_v26  ;;  %v1944_v31 = vrot.slane %v6229_v1, 7  ;;  %v6627_v26 = vsel %vm999_vm1, %v1941_v56, %v1943_v48  ;;  %v8624_v62 = vrot.slane %v6344_v34, 1  ;;  %v1954_v52 = vrot.slane %v6344_v34, 7 }
 0x314   : > { %v6614_v18 = vsel %vm790_vm0, %v8618_v25, %v8617_v63  ;;  %v6622_v45 = vsel %vm790_vm0, %v8621_v49, %v8620_v20  ;;  %8623 = vst [vmem:[#allocation127_spill] sm:$0xff] %v6627_v26  ;;  %v8625_v63 = vrot.slane %v6289_v37, 1  ;;  %v8627_v49 = vrot.slane %v6348_v7, 1 }
 0x315   : > { %8619 = vst [vmem:[#allocation125_spill] sm:$0xff] %v6614_v18  ;;  %8622 = vst [vmem:[#allocation126_spill] sm:$0xff] %v6622_v45  ;;  %v1950_v18 = vrot.slane %v6293_v21, 7  ;;  %v8628_v20 = vrot.slane %v6301_v32, 1  ;;  %v1951_v26 = vrot.slane %v6305_v53, 7  ;;  %v1958_v44 = vrot.slane %v6381_v17, 7 }
 0x316   : > { %v6636_v25 = vsel %vm790_vm0, %v8625_v63, %v8624_v62  ;;  %v6652_v62 = vsel %vm999_vm1, %v1944_v31, %v1946_v4  ;;  %v6656_v63 = vsel %vm999_vm1, %v1945_v30, %v1947_v39  ;;  %v1953_v1 = vrot.slane %v6301_v32, 7 }
 0x317   : > { %8626 = vst [vmem:[#allocation128_spill] sm:$0xff] %v6636_v25  ;;  %v6645_v45 = vsel %vm790_vm0, %v8628_v20, %v8627_v49  ;;  %8630 = vst [vmem:[#allocation130_spill] sm:$0xff] %v6652_v62  ;;  %v1948_v25 = vrot.slane %v6245_v51, 7  ;;  %v6660_v49 = vpop.permute.xlu1 %1846  ;;  %v1949_v20 = vrot.slane %v6262_v10, 7  ;;  %v1959_v24 = vrot.slane %v6385_v58, 7 }
 0x318   : > { %8629 = vst [vmem:[#allocation129_spill] sm:$0xff] %v6645_v45  ;;  %8631 = vst [vmem:[#allocation131_spill] sm:$0xff] %v6656_v63  ;;  %v1952_v45 = vrot.slane %v6289_v37, 7  ;;  %v8634_v63 = vrot.slane %v6381_v17, 1  ;;  %v8635_v51 = vrot.slane %v6327_v16, 1  ;;  %v8638_v37 = vrot.slane %v6331_v29, 1 }
 0x319   : > { %8632 = vst [vmem:[#allocation132_spill] sm:$0xff] %v6660_v49  ;;  %v6668_v62 = vsel %vm999_vm1, %v1948_v25, %v1950_v18  ;;  %v8637_v49 = vrot.slane %v6385_v58, 1  ;;  %v1956_v10 = vrot.slane %v6327_v16, 7 }
 0x31a   : > { %8633 = vst [vmem:[#allocation133_spill] sm:$0xff] %v6668_v62  ;;  %v6676_v23 = vsel %vm790_vm0, %v8635_v51, %v8634_v63  ;;  %v6689_v62 = vsel %vm999_vm1, %v1949_v20, %v1951_v26  ;;  %v6693_v17 = vsel %vm999_vm1, %v1952_v45, %v1954_v52  ;;  %v8641_v51 = vrot.slane %v6348_v7, 7 }
 0x31b   : > { %8636 = vst [vmem:[#allocation134_spill] sm:$0xff] %v6676_v23  ;;  %v6684_v32 = vsel %vm790_vm0, %v8638_v37, %v8637_v49  ;;  %8640 = vst [vmem:[#allocation136_spill] sm:$0xff] %v6693_v17  ;;  %v6704_v37 = vsel %vm999_vm1, %v1956_v10, %v1958_v44  ;;  %v8644_v49 = vrot.slane %v6155_v9, 7 }
 0x31c   : > { %8639 = vst [vmem:[#allocation135_spill] sm:$0xff] %v6684_v32  ;;  %v6699_v63 = vsel %vm999_vm1, %v1953_v1, %v8641_v51  ;;  %8643 = vst [vmem:[#allocation138_spill] sm:$0xff] %v6704_v37  ;;  %v8645_v32 = vrot.slane %v6149_v2, 7  ;;  %v8646_v51 = vrot.slane %v6167_v22, 7  ;;  %v8647_v37 = vrot.slane %v6331_v29, 7  ;;  %v8697_v29 = vld [vmem:[#allocation85_spill] sm:$0xff] }
 0x31d   : > { %8642 = vst [vmem:[#allocation137_spill] sm:$0xff] %v6699_v63  ;;  %v6710_v16 = vsel %vm999_vm1, %v1958_v44, %v8644_v49  ;;  %v6724_v63 = vpop.permute.xlu1 %1856  ;;  %v8648_v49 = vrot.slane %v6159_v43, 7 }
 0x31e   : > { %v6716_v17 = vsel %vm999_vm1, %v8645_v32, %v1932_v55  ;;  %v6722_v23 = vsel %vm999_vm1, %v8646_v51, %v1933_v41  ;;  %v6730_v44 = vsel %vm999_vm1, %v8647_v37, %v1959_v24  ;;  %v8649_v55 = vrot.slane %v6181_v46, 7 }
 0x31f   : > { %v6736_v32 = vsel %vm999_vm1, %v1959_v24, %v8648_v49  ;;  %v8650_v51 = vrot.slane %v6188_v12, 7  ;;  %v8651_v37 = vrot.slane %v6205_v35, 7  ;;  %v6758_v24 = vsel %vm999_vm1, %v1939_v6, %v1941_v56 }
 0x320   : > { %v6742_v41 = vsel %vm999_vm1, %v8649_v55, %v1936_v60  ;;  %v6762_v60 = vsel %vm999_vm1, %v1942_v61, %v1944_v31  ;;  %v6766_v49 = vsel %vm999_vm1, %v1943_v48, %v1945_v30  ;;  %v6778_v6 = vsel %vm999_vm1, %v1950_v18, %v1952_v45 }
 0x321   : > { %v6748_v22 = vsel %vm999_vm1, %v8650_v51, %v1937_v36  ;;  %v6754_v2 = vsel %vm999_vm1, %v8651_v37, %v1940_v47  ;;  %v6770_v36 = vsel %vm999_vm1, %v1946_v4, %v1948_v25  ;;  %v6774_v47 = vsel %vm999_vm1, %v1947_v39, %v1949_v20  ;;  %v2633_v18 = vpop.permute.xlu1 %2632  ;;  %v8655_v51 = vld [vmem:[#allocation33_spill] sm:$0xff]  ;;  %v8656_v37 = vld [vmem:[#allocation92_spill] sm:$0xff] }
 0x322   : > { %v6782_v56 = vsel %vm999_vm1, %v1951_v26, %v1953_v1  ;;  %v6786_v30 = vmul.f32 %v6062_v5, %v6155_v9  ;;  %v6790_v4 = vmul.f32 %v6062_v5, %v6159_v43  ;;  %v2732_v61 = vadd.f32 %v6069_v54, %v6173_v57  ;;  %v8678_v9 = vld [vmem:[#allocation81_spill] sm:$0xff] }
 0x323   : > { %8652 = vst [vmem:[#allocation139_spill] sm:$0xff] %v6782_v56  ;;  %v6796_v48 = vsel %vm999_vm1, %v1954_v52, %v1956_v10  ;;  %v1694_v45 = vmul.f32 %v6071_v3, %v6181_v46  ;;  %v1695_v1 = vmul.f32 %v6071_v3, %v6188_v12  ;;  %v1698_v26 = vmul.f32 %v6082_v8, %v6205_v35  ;;  %v6812_v10 = vpop.permute.xlu0 %2009  ;;  %v8667_v12 = vld [vmem:[#allocation68_spill] sm:$0xff]  ;;  %v8668_v46 = vld [vmem:[#allocation89_spill] sm:$0xff] }
 0x324   : > { %8653 = vst [vmem:[#allocation140_spill] sm:$0xff] %v6796_v48  ;;  %v1699_v5 = vmul.f32 %v6082_v8, %v6223_v50  ;;  %v1702_v57 = vmul.f32 %v6093_v40, %v6237_v42  ;;  %v1703_v52 = vmul.f32 %v6093_v40, %v6241_v13  ;;  %v1706_v54 = vmul.f32 %v6102_v38, %v6249_v15  ;;  %v8654_v40 = vld [vmem:[#allocation97_spill] sm:$0xff] }
 0x325   : > { %v2737_v3 = vadd.f32 %v6067_v33, %v2633_v18  ;;  %v1707_v39 = vmul.f32 %v6102_v38, %v6271_v14  ;;  %v1710_v8 = vmul.f32 %v6109_v28, %v6293_v21  ;;  %v1870_v31 = vmul.f32 %v6123_v11, %v6279_v0  ;;  %v8657_v18 = vld [vmem:[#allocation93_spill] sm:$0xff]  ;;  %v8660_v14 = vld [vmem:[#allocation87_spill] sm:$0xff] }
 0x326   : > { %v1871_v25 = vmul.f32 %v6123_v11, %v6313_v59  ;;  %v1874_v20 = vmul.f32 %v8654_v40, %v6321_v19  ;;  %v2770_v55 = vmax.f32 %v2732_v61, 0.0  ;;  %v2742_v15 = vadd.f32 %v8656_v37, %v8655_v51  ;;  %v8658_v11 = vld [vmem:[#allocation57_spill] sm:$0xff]  ;;  %v2643_v19 = vpop.permute.xlu1 %2642  ;;  %v8659_v61 = vld [vmem:[#allocation86_spill] sm:$0xff]  ;;  %v8663_v51 = vld [vmem:[#allocation12_spill] sm:$0xff] }
 0x327   : > { %v2771_v33 = vmax.f32 %v2737_v3, 0.0  ;;  %v1711_v38 = vmul.f32 %v6109_v28, %v6305_v53  ;;  %v6831_v21 = vmul.f32 %v8657_v18, %v6344_v34  ;;  %v6835_v0 = vmul.f32 %v8657_v18, %v6348_v7  ;;  %v8662_v3 = vld [vmem:[#allocation67_spill] sm:$0xff]  ;;  %v6860_v43 = vpop.permute.xlu0 %2019 }
 0x328   : > { %v1875_v59 = vmul.f32 %v8654_v40, %v8658_v11  ;;  %v6841_v13 = vmul.f32 %v8660_v14, %v8659_v61  ;;  %v1878_v37 = vmul.f32 %v8663_v51, %v8662_v3  ;;  %v8664_v28 = vld [vmem:[#allocation91_spill] sm:$0xff]  ;;  %v6848_v34 = vmul.f32 %v8660_v14, %v6385_v58  ;;  %v8666_v40 = vld [vmem:[#allocation72_spill] sm:$0xff]  ;;  %v8677_v58 = vld [vmem:[#allocation13_spill] sm:$0xff] }
 0x329   : > { %v2747_v53 = vadd.f32 %v8664_v28, %v2643_v19  ;;  %v3937_v42 = vpack.c.bf16 %v2771_v33, %v2770_v55  ;;  %v6850_v18 = vadd.f32 %v1870_v31, %v1694_v45  ;;  %v6852_v50 = vadd.f32 %v1871_v25, %v1695_v1  ;;  %v8669_v14 = vld [vmem:[#allocation4_spill] sm:$0xff]  ;;  %v8671_v1 = vld [vmem:[#allocation73_spill] sm:$0xff]  ;;  %v8672_v25 = vld [vmem:[#allocation63_spill] sm:$0xff] }
 0x32a   : > { %8661 = vst [vmem:[#allocation97_spill] sm:$0xff] %v6841_v13  ;;  %8665 = vst [vmem:[#allocation33_spill] sm:$0xff] %v6848_v34  ;;  %v1879_v11 = vmul.f32 %v8663_v51, %v8666_v40  ;;  %v6856_v35 = vadd.f32 %v1874_v20, %v1698_v26  ;;  %v2772_v61 = vmax.f32 %v2742_v15, 0.0  ;;  %v2752_v3 = vadd.f32 %v8668_v46, %v8667_v12  ;;  %v8670_v45 = vld [vmem:[#allocation100_spill] sm:$0xff]  ;;  %v8673_v28 = vld [vmem:[#allocation70_spill] sm:$0xff]  ;;  %v2653_v20 = vpop.permute.xlu1 %2652 }
 0x32b   : > { %v2773_v55 = vmax.f32 %v2747_v53, 0.0  ;;  %3938 = vmatprep.subr.bf16.mxu1 %v3937_v42  ;;  %v6862_v33 = vadd.f32 %v1875_v59, %v1699_v5  ;;  %v1692_v31 = vmul.f32 %v8670_v45, %v8669_v14  ;;  %v1882_v19 = vmul.f32 %v8672_v25, %v8671_v1  ;;  %v8674_v12 = vld [vmem:[#allocation55_spill] sm:$0xff]  ;;  %v8675_v53 = vld [vmem:[#allocation41_spill] sm:$0xff]  ;;  %v8676_v40 = vld [vmem:[#allocation22_spill] sm:$0xff] }
 0x32c   : > { %v1883_v26 = vmul.f32 %v8672_v25, %v8673_v28  ;;  %3940 = vmatpush3.bf16.msra.mxu1 %v3937_v42  ;;  %v6870_v15 = vadd.f32 %v1878_v37, %v1702_v57  ;;  %v1693_v46 = vmul.f32 %v8670_v45, %v8674_v12  ;;  %v2757_v51 = vadd.f32 %v8675_v53, %v2653_v20  ;;  %v8679_v1 = vld [vmem:[#allocation34_spill] sm:$0xff]  ;;  %v8680_v34 = vld [vmem:[#allocation20_spill] sm:$0xff]  ;;  %v8681_v42 = vld [vmem:[#allocation21_spill] sm:$0xff] }
 0x32d   : > { %v3941_v5 = vpack.c.bf16 %v2773_v55, %v2772_v61  ;;  %v6875_v59 = vadd.f32 %v1879_v11, %v1703_v52  ;;  %v1696_v14 = vmul.f32 %v8677_v58, %v8676_v40  ;;  %v1886_v48 = vmul.f32 %v8679_v1, %v8678_v9  ;;  %v8682_v28 = vld [vmem:[#allocation79_spill] sm:$0xff]  ;;  %v8685_v55 = vld [vmem:[#allocation88_spill] sm:$0xff] }
 0x32e   : > { %v1887_v25 = vmul.f32 %v8679_v1, %v8680_v34  ;;  %v1697_v57 = vmul.f32 %v8677_v58, %v8681_v42  ;;  %v2774_v37 = vmax.f32 %v2752_v3, 0.0  ;;  %v8683_v45 = vld [vmem:[#allocation51_spill] sm:$0xff]  ;;  %v2775_v20 = vmax.f32 %v2757_v51, 0.0  ;;  %v8686_v9 = vld [vmem:[#allocation104_spill] sm:$0xff]  ;;  %v2663_v34 = vpop.permute.xlu1 %2662  ;;  %v8689_v42 = vld [vmem:[#allocation42_spill] sm:$0xff] }
 0x32f   : > { %v2762_v12 = vadd.f32 %v8683_v45, %v8682_v28  ;;  %3942 = vmatprep.subr.bf16.mxu1 %v3941_v5  ;;  %v6887_v52 = vadd.f32 %v1882_v19, %v1706_v54  ;;  %v6889_v61 = vadd.f32 %v1883_v26, %v1707_v39  ;;  %v8684_v11 = vld [vmem:[#allocation103_spill] sm:$0xff]  ;;  %v1865_v40 = vmul.f32 %v8685_v55, %v8686_v9  ;;  %v8688_v58 = vld [vmem:[#allocation64_spill] sm:$0xff]  ;;  %v2030_v54 = vpop.permute.xlu0 %2029 }
 0x330   : > { %v1864_v53 = vmul.f32 %v8685_v55, %v8684_v11  ;;  %3944 = vmatpush3.bf16.msra.mxu1 %v3941_v5  ;;  %v8687_v1 = vld [vmem:[#allocation23_spill] sm:$0xff]  ;;  %v6901_v51 = vmul.f32 %v8688_v58, %v8689_v42  ;;  %v8690_v19 = vld [vmem:[#allocation44_spill] sm:$0xff]  ;;  %v3945_v26 = vpack.c.bf16 %v2775_v20, %v2774_v37  ;;  %v6904_v28 = vadd.f32 %v1886_v48, %v1710_v8  ;;  %v8691_v11 = vld [vmem:[#allocation101_spill] sm:$0xff] }
 0x331   : > { %v6897_v3 = vmul.f32 %v8688_v58, %v8687_v1  ;;  %v2767_v39 = vadd.f32 %v8690_v19, %v2663_v34  ;;  %v6906_v45 = vadd.f32 %v1887_v25, %v1711_v38  ;;  %v8692_v55 = vld [vmem:[#allocation6_spill] sm:$0xff]  ;;  %v8694_v1 = vld [vmem:[#allocation28_spill] sm:$0xff]  ;;  %v8695_v7 = vld [vmem:[#allocation35_spill] sm:$0xff]  ;;  %v2776_v58 = vmax.f32 %v2762_v12, 0.0 }
 0x332   : > { %v1890_v9 = vmul.f32 %v8692_v55, %v8691_v11  ;;  %v8693_v5 = vld [vmem:[#allocation102_spill] sm:$0xff]  ;;  %v6914_v13 = vmul.f32 %v8695_v7, %v8694_v1  ;;  %3946 = vmatprep.subr.bf16.mxu1 %v3945_v26  ;;  %v1896_v48 = vadd.f32 %v1864_v53, %v6786_v30  ;;  %v1897_v8 = vadd.f32 %v1865_v40, %v6790_v4  ;;  %v8698_v38 = vld [vmem:[#allocation111_spill] sm:$0xff]  ;;  %v1995_v19 = vpop.permute.xlu1 %1994  ;;  %v8700_v11 = vld [vmem:[#allocation117_spill] sm:$0xff] }
 0x333   : > { %v1891_v27 = vmul.f32 %v8692_v55, %v8693_v5  ;;  %v8696_v42 = vld [vmem:[#allocation110_spill] sm:$0xff]  ;;  %v2777_v34 = vmax.f32 %v2767_v39, 0.0  ;;  %v1869_v25 = vmul.f32 %v8697_v29, %v8698_v38  ;;  %v2079_v12 = vmul.f32 %v6812_v10, %v8700_v11  ;;  %v8702_v53 = vld [vmem:[#allocation112_spill] sm:$0xff]  ;;  %v8703_v5 = vld [vmem:[#allocation15_spill] sm:$0xff] }
 0x334   : > { %v1868_v56 = vmul.f32 %v8697_v29, %v8696_v42  ;;  %v8699_v37 = vld [vmem:[#allocation114_spill] sm:$0xff]  ;;  %3948 = vmatpush3.bf16.msra.mxu1 %v3945_v26  ;;  %v2072_v55 = vmul.f32 %v1995_v19, %v6710_v16  ;;  %v2073_v42 = vmul.f32 %v1995_v19, %v6736_v32  ;;  %v6929_v30 = vadd.f32 %v1890_v9, %v6831_v21  ;;  %v8701_v29 = vld [vmem:[#allocation29_spill] sm:$0xff]  ;;  %v2040_v16 = vpop.permute.xlu0 %2039 }
 0x335   : > { %v2078_v20 = vmul.f32 %v6812_v10, %v8699_v37  ;;  %v3949_v39 = vpack.c.bf16 %v2777_v34, %v2776_v58  ;;  %v6932_v4 = vadd.f32 %v1891_v27, %v6835_v0  ;;  %v1705_v40 = vmul.f32 %v8695_v7, %v8701_v29  ;;  %v8704_v37 = vld [vmem:[#allocation113_spill] sm:$0xff]  ;;  %v8705_v0 = vld [vmem:[#allocation119_spill] sm:$0xff]  ;;  %v8706_v9 = vld [vmem:[#allocation122_spill] sm:$0xff] }
 0x336   : > { %v1872_v26 = vmul.f32 %v8703_v5, %v8702_v53  ;;  %v1900_v38 = vadd.f32 %v1868_v56, %v1692_v31  ;;  %v1873_v10 = vmul.f32 %v8703_v5, %v8704_v37  ;;  %v6940_v11 = vadd.f32 %v2072_v55, %v1896_v48  ;;  %v2005_v56 = vpop.permute.xlu1 %2004 }
 0x337   : > { %v6942_v32 = vadd.f32 %v2073_v42, %v1897_v8  ;;  %3950 = vmatprep.subr.bf16.mxu1 %v3949_v39  ;;  %v1901_v21 = vadd.f32 %v1869_v25, %v1693_v46  ;;  %v6945_v27 = vadd.f32 %v2078_v20, %v6850_v18  ;;  %v2082_v7 = vmul.f32 %v6860_v43, %v8705_v0  ;;  %v8707_v18 = vld [vmem:[#allocation52_spill] sm:$0xff]  ;;  %v8711_v42 = vld [vmem:[#allocation107_spill] sm:$0xff] }
 0x338   : > { %v2083_v58 = vmul.f32 %v6860_v43, %v8706_v9  ;;  %3952 = vmatpush3.bf16.msra.mxu1 %v3949_v39  ;;  %v6952_v31 = vadd.f32 %v2079_v12, %v6852_v50  ;;  %v2076_v34 = vmul.f32 %v2005_v56, %v6716_v17  ;;  %v2077_v48 = vmul.f32 %v2005_v56, %v6722_v23  ;;  %v8708_v8 = vld [vmem:[#allocation8_spill] sm:$0xff]  ;;  %v8710_v43 = vld [vmem:[#allocation115_spill] sm:$0xff]  ;;  %v8712_v50 = vld [vmem:[#allocation118_spill] sm:$0xff] }
 0x339   : > { %v2136_v46 = vmax.f32 %v6940_v11, %v6942_v32  ;;  %v1708_v25 = vmul.f32 %v8708_v8, %v8707_v18  ;;  %v8709_v20 = vld [vmem:[#allocation60_spill] sm:$0xff]  ;;  %v1904_v55 = vadd.f32 %v1872_v26, %v1696_v14  ;;  %v1876_v39 = vmul.f32 %v8711_v42, %v8710_v43  ;;  %v8713_v0 = vld [vmem:[#allocation123_spill] sm:$0xff] }
 0x33a   : > { %v1709_v19 = vmul.f32 %v8708_v8, %v8709_v20  ;;  %v1905_v53 = vadd.f32 %v1873_v10, %v1697_v57  ;;  %v1877_v12 = vmul.f32 %v8711_v42, %v8712_v50  ;;  %v6966_v17 = vadd.f32 %v2076_v34, %v1900_v38  ;;  %v8714_v26 = vld [vmem:[#allocation127_spill] sm:$0xff]  ;;  %v2015_v56 = vpop.permute.xlu1 %2014  ;;  %v2050_v57 = vpop.permute.xlu0 %2049  ;;  %v8719_v8 = vld [vmem:[#allocation121_spill] sm:$0xff] }
 0x33b   : > { %v6968_v23 = vadd.f32 %v2077_v48, %v1901_v21  ;;  %2137 = vmax.xlane.f32.xlu1 %v2136_v46  ;;  %v6971_v5 = vadd.f32 %v2082_v7, %v6856_v35  ;;  %v6974_v37 = vadd.f32 %v2083_v58, %v6862_v33  ;;  %v2086_v14 = vmul.f32 %v2030_v54, %v8713_v0  ;;  %v8715_v7 = vld [vmem:[#allocation78_spill] sm:$0xff]  ;;  %v8716_v34 = vld [vmem:[#allocation31_spill] sm:$0xff]  ;;  %v8717_v48 = vld [vmem:[#allocation120_spill] sm:$0xff] }
 0x33c   : > { %v2087_v9 = vmul.f32 %v2030_v54, %v8714_v26  ;;  %v2080_v10 = vmul.f32 %v2015_v56, %v6742_v41  ;;  %v2081_v38 = vmul.f32 %v2015_v56, %v6748_v22  ;;  %v2145_v35 = vmax.f32 %v6945_v27, %v6952_v31  ;;  %v8718_v46 = vld [vmem:[#allocation116_spill] sm:$0xff] }
 0x33d   : > { %v2142_v21 = vmax.f32 %v6966_v17, %v6968_v23  ;;  %v1712_v33 = vmul.f32 %v8716_v34, %v8715_v7  ;;  %v1908_v58 = vadd.f32 %v1876_v39, %v6897_v3  ;;  %v1880_v54 = vmul.f32 %v8718_v46, %v8717_v48  ;;  %v8720_v3 = vld [vmem:[#allocation130_spill] sm:$0xff]  ;;  %v8721_v48 = vld [vmem:[#allocation131_spill] sm:$0xff] }
 0x33e   : > { %v1881_v43 = vmul.f32 %v8718_v46, %v8719_v8  ;;  %v1909_v41 = vadd.f32 %v1877_v12, %v6901_v51  ;;  %v6992_v22 = vadd.f32 %v2080_v10, %v1904_v55  ;;  %v6994_v42 = vadd.f32 %v2081_v38, %v1905_v53  ;;  %v2025_v26 = vpop.permute.xlu1 %2024  ;;  %v8723_v10 = vld [vmem:[#allocation125_spill] sm:$0xff]  ;;  %v8724_v38 = vld [vmem:[#allocation124_spill] sm:$0xff] }
 0x33f   : > { %2143 = vmax.xlane.f32.xlu0 %v2142_v21  ;;  %2146 = vmax.xlane.f32.xlu1 %v2145_v35  ;;  %v6997_v50 = vadd.f32 %v2086_v14, %v6870_v15  ;;  %v7000_v0 = vadd.f32 %v2087_v9, %v6875_v59  ;;  %v2090_v39 = vmul.f32 %v2040_v16, %v8720_v3  ;;  %v8722_v15 = vld [vmem:[#allocation69_spill] sm:$0xff]  ;;  %v8725_v35 = vld [vmem:[#allocation126_spill] sm:$0xff] }
 0x340   : > { %v2151_v56 = vmax.f32 %v6971_v5, %v6974_v37  ;;  %v2091_v51 = vmul.f32 %v2040_v16, %v8721_v48  ;;  %v2084_v55 = vmul.f32 %v2025_v26, %v6754_v2  ;;  %v2085_v53 = vmul.f32 %v2025_v26, %v6758_v24  ;;  %v2060_v16 = vpop.permute.xlu0 %2059 }
 0x341   : > { %v2148_v12 = vmax.f32 %v6992_v22, %v6994_v42  ;;  %v1713_v14 = vmul.f32 %v8716_v34, %v8722_v15  ;;  %v1912_v59 = vadd.f32 %v1880_v54, %v6914_v13  ;;  %v1913_v9 = vadd.f32 %v1881_v43, %v1705_v40  ;;  %v8726_v34 = vld [vmem:[#allocation133_spill] sm:$0xff] }
 0x342   : > { %v1884_v21 = vmul.f32 %v8724_v38, %v8723_v10  ;;  %v1885_v46 = vmul.f32 %v8724_v38, %v8725_v35  ;;  %v7017_v8 = vadd.f32 %v2084_v55, %v1908_v58  ;;  %v7019_v2 = vadd.f32 %v2085_v53, %v1909_v41  ;;  %v2035_v40 = vpop.permute.xlu1 %2034  ;;  %v8729_v55 = vld [vmem:[#allocation128_spill] sm:$0xff]  ;;  %v8731_v53 = vld [vmem:[#allocation129_spill] sm:$0xff] }
 0x343   : > { %2149 = vmax.xlane.f32.xlu0 %v2148_v12  ;;  %2152 = vmax.xlane.f32.xlu1 %v2151_v56  ;;  %v7022_v24 = vadd.f32 %v2090_v39, %v6887_v52  ;;  %v2094_v3 = vmul.f32 %v2050_v57, %v8726_v34  ;;  %v2095_v13 = vmul.f32 %v2050_v57, %v6689_v62  ;;  %v8727_v52 = vld [vmem:[#allocation108_spill] sm:$0xff]  ;;  %v8728_v39 = vld [vmem:[#allocation14_spill] sm:$0xff] }
 0x344   : > { %v2157_v54 = vmax.f32 %v6997_v50, %v7000_v0  ;;  %v7029_v43 = vadd.f32 %v2091_v51, %v6889_v61  ;;  %v2088_v58 = vmul.f32 %v2035_v40, %v6762_v60  ;;  %v2089_v41 = vmul.f32 %v2035_v40, %v6766_v49  ;;  %v8730_v62 = vld [vmem:[#allocation132_spill] sm:$0xff]  ;;  %v2070_v40 = vpop.permute.xlu0 %2069 }
 0x345   : > { %v2154_v26 = vmax.f32 %v7017_v8, %v7019_v2  ;;  %v1894_v56 = vmul.f32 %v8728_v39, %v8727_v52  ;;  %v1916_v48 = vadd.f32 %v1884_v21, %v1708_v25  ;;  %v1888_v57 = vmul.f32 %v8730_v62, %v8729_v55  ;;  %v8732_v25 = vld [vmem:[#allocation136_spill] sm:$0xff]  ;;  %v8733_v21 = vld [vmem:[#allocation137_spill] sm:$0xff] }
 0x346   : > { %v1889_v12 = vmul.f32 %v8730_v62, %v8731_v53  ;;  %v1917_v10 = vadd.f32 %v1885_v46, %v1709_v19  ;;  %v7041_v61 = vadd.f32 %v2088_v58, %v1912_v59  ;;  %v7043_v51 = vadd.f32 %v2089_v41, %v1913_v9  ;;  %v2045_v34 = vpop.permute.xlu1 %2044  ;;  %v8734_v46 = vld [vmem:[#allocation109_spill] sm:$0xff]  ;;  %v8736_v58 = vld [vmem:[#allocation135_spill] sm:$0xff] }
 0x347   : > { %2155 = vmax.xlane.f32.xlu0 %v2154_v26  ;;  %2158 = vmax.xlane.f32.xlu1 %v2157_v54  ;;  %v7046_v60 = vadd.f32 %v2094_v3, %v6904_v28  ;;  %v7049_v49 = vadd.f32 %v2095_v13, %v6906_v45  ;;  %v2098_v38 = vmul.f32 %v2060_v16, %v8732_v25  ;;  %v8735_v54 = vld [vmem:[#allocation134_spill] sm:$0xff]  ;;  %v8738_v62 = vld [vmem:[#allocation139_spill] sm:$0xff] }
 0x348   : > { %v2099_v35 = vmul.f32 %v2060_v16, %v8733_v21  ;;  %v2092_v19 = vmul.f32 %v2045_v34, %v6770_v36  ;;  %v2093_v59 = vmul.f32 %v2045_v34, %v6774_v47  ;;  %v2160_v9 = vmax.f32 %v7041_v61, %v7043_v51  ;;  %v8744_v34 = vld [vmem:[#allocation66_spill] sm:$0xff] }
 0x349   : > { %v2163_v28 = vmax.f32 %v7022_v24, %v7029_v43  ;;  %v1895_v45 = vmul.f32 %v8728_v39, %v8734_v46  ;;  %v1920_v3 = vadd.f32 %v1888_v57, %v1712_v33  ;;  %v1921_v13 = vadd.f32 %v1889_v12, %v1713_v14  ;;  %v8737_v33 = vld [vmem:[#allocation138_spill] sm:$0xff]  ;;  %v8740_v12 = vld [vmem:[#allocation61_spill] sm:$0xff] }
 0x34a   : > { %v1892_v16 = vmul.f32 %v6724_v63, %v8735_v54  ;;  %v1893_v41 = vmul.f32 %v6724_v63, %v8736_v58  ;;  %v7065_v36 = vadd.f32 %v2092_v19, %v1916_v48  ;;  %v7067_v47 = vadd.f32 %v2093_v59, %v1917_v10  ;;  %v2055_v39 = vpop.permute.xlu1 %2054 }
 0x34b   : > { %2161 = vmax.xlane.f32.xlu0 %v2160_v9  ;;  %2164 = vmax.xlane.f32.xlu1 %v2163_v28  ;;  %v7070_v26 = vadd.f32 %v2098_v38, %v6929_v30  ;;  %v7073_v52 = vadd.f32 %v2099_v35, %v6932_v4  ;;  %v2102_v14 = vmul.f32 %v2070_v40, %v8737_v33  ;;  %v8739_v30 = vld [vmem:[#allocation46_spill] sm:$0xff]  ;;  %v8741_v4 = vld [vmem:[#allocation47_spill] sm:$0xff]  ;;  %v8742_v38 = vld [vmem:[#allocation97_spill] sm:$0xff]  ;;  %v8745_v19 = vrot.slane %v8744_v34, 7 }
 0x34c   : > { %v2169_v55 = vmax.f32 %v7046_v60, %v7049_v49  ;;  %v2103_v63 = vmul.f32 %v2070_v40, %v6730_v44  ;;  %v2096_v48 = vmul.f32 %v2055_v39, %v6778_v6  ;;  %v2097_v57 = vmul.f32 %v2055_v39, %v8738_v62  ;;  %v8746_v44 = vld [vmem:[#allocation24_spill] sm:$0xff]  ;;  %v8747_v40 = vld [vmem:[#allocation33_spill] sm:$0xff] }
 0x34d   : > { %v2166_v53 = vmax.f32 %v7065_v36, %v7067_v47  ;;  %v1716_v10 = vmul.f32 %v8740_v12, %v8739_v30  ;;  %v1717_v25 = vmul.f32 %v8740_v12, %v8741_v4  ;;  %v1926_v21 = vadd.f32 %v1894_v56, %v8742_v38  ;;  %v8748_v62 = vld [vmem:[#allocation140_spill] sm:$0xff] }
 0x34e   : > { %v8743_v35 = vrot.slane %v8741_v4, 7  ;;  %v1927_v59 = vadd.f32 %v1895_v45, %v8747_v40  ;;  %v7095_v9 = vadd.f32 %v2096_v48, %v1920_v3  ;;  %v7097_v28 = vadd.f32 %v2097_v57, %v1921_v13  ;;  %v2065_v56 = vpop.permute.xlu1 %2064  ;;  %v2781_v48 = vld [vmem:[%s7947_s6 + $0x18] sm:$0xff]  ;;  %v2782_v57 = vld [vmem:[%s7947_s6 + $0x20] sm:$0xff] }
 0x34f   : > { %2167 = vmax.xlane.f32.xlu0 %v2166_v53  ;;  %2170 = vmax.xlane.f32.xlu1 %v2169_v55  ;;  %v1924_v46 = vadd.f32 %v1892_v16, %v1716_v10  ;;  %v1925_v54 = vadd.f32 %v1893_v41, %v1717_v25  ;;  %v7099_v58 = vadd.f32 %v2102_v14, %v1926_v21  ;;  %v2778_v14 = vld [vmem:[%s7947_s6] sm:$0xff]  ;;  %v2779_v55 = vld [vmem:[%s7947_s6 + $0x8] sm:$0xff]  ;;  %v2784_v10 = vld [vmem:[%s7947_s6 + $0x30] sm:$0xff] }
 0x350   : > { %v1963_v6 = vsel %vm999_vm1, %v8745_v19, %v8743_v35  ;;  %v2175_v33 = vmax.f32 %v7070_v26, %v7073_v52  ;;  %v7103_v39 = vadd.f32 %v2103_v63, %v1927_v59  ;;  %v2100_v12 = vmul.f32 %v2065_v56, %v8748_v62  ;;  %3881 = vmatprep.mubr.msk.f32.mxu1 %vm2890_vm3, %v2778_v14  ;;  %v2780_v63 = vld [vmem:[%s7947_s6 + $0x10] sm:$0xff]  ;;  %v2783_v53 = vld [vmem:[%s7947_s6 + $0x28] sm:$0xff]  ;;  %v2785_v25 = vld [vmem:[%s7947_s6 + $0x38] sm:$0xff] }
 0x351   : > { %v2101_v38 = vmul.f32 %v2065_v56, %v1963_v6  ;;  %v2172_v45 = vmax.f32 %v7095_v9, %v7097_v28  ;;  %3882 = vmatmul.mubr.msk.f32.vlgmr.msra.gmra.mrb[0].mxu1 %vm2890_vm3, %v2779_v55  ;;  %v2786_v21 = vld [vmem:[%s7947_s6 + $0x40] sm:$0xff]  ;;  %v2787_v35 = vld [vmem:[%s7947_s6 + $0x48] sm:$0xff]  ;;  %v2788_v19 = vld [vmem:[%s7947_s6 + $0x50] sm:$0xff] }
 0x352   : > { %v7108_v3 = vadd.f32 %v2100_v12, %v1924_v46  ;;  %v2181_v41 = vmax.f32 %v7099_v58, %v7103_v39  ;;  %3884 = vmatprep.mubr.msk.f32.mxu1 %vm2890_vm3, %v2780_v63  ;;  %v2789_v6 = vld [vmem:[%s7947_s6 + $0x58] sm:$0xff]  ;;  %v2790_v40 = vld [vmem:[%s7947_s6 + $0x60] sm:$0xff]  ;;  %v2791_v59 = vld [vmem:[%s7947_s6 + $0x68] sm:$0xff] }
 0x353   : > { %v7110_v13 = vadd.f32 %v2101_v38, %v1925_v54  ;;  %2173 = vmax.xlane.f32.xlu0 %v2172_v45  ;;  %2176 = vmax.xlane.f32.xlu1 %v2175_v33  ;;  %v2792_v46 = vld [vmem:[%s7947_s6 + $0x70] sm:$0xff]  ;;  %v2793_v54 = vld [vmem:[%s7947_s6 + $0x78] sm:$0xff]  ;;  %v8750_v12 = vld [vmem:[#allocation106_spill] sm:$0xff] }
 0x354   : > { %v8749_v33 = vld [vmem:[#allocation105_spill] sm:$0xff] }
 0x355   : > { %v2178_v16 = vmax.f32 %v7108_v3, %v7110_v13  ;;  %3885 = vmatmul.mubr.msk.f32.gmra.mrb[2].mxu1 %vm2890_vm3, %v2781_v48  ;;  %v8751_v55 = vld [vmem:[#allocation5_spill] sm:$0xff] }
 0x356   : > { %3887 = vmatprep.mubr.msk.f32.mxu1 %vm2890_vm3, %v2782_v57  ;;  %v8752_v48 = vld [vmem:[#allocation53_spill] sm:$0xff] }
 0x357   : > { %2179 = vmax.xlane.f32.xlu0 %v2178_v16  ;;  %2182 = vmax.xlane.f32.xlu1 %v2181_v41 }
 0x359   : > { %3888 = vmatmul.mubr.msk.f32.gmra.mrb[4].mxu1 %vm2890_vm3, %v2783_v53 }
 0x35a   : > { %3890 = vmatprep.mubr.msk.f32.mxu1 %vm2890_vm3, %v2784_v10 }
 0x35d   : > { %3891 = vmatmul.mubr.msk.f32.gmra.mrb[6].mxu1 %vm2890_vm3, %v2785_v25 }
 0x35e   : > { %3893 = vmatprep.mubr.msk.f32.mxu1 %vm2890_vm3, %v2786_v21 }
 0x361   : > { %3894 = vmatmul.mubr.msk.f32.gmra.mrb[8].mxu1 %vm2890_vm3, %v2787_v35 }
 0x362   : > { %3896 = vmatprep.mubr.msk.f32.mxu1 %vm2890_vm3, %v2788_v19 }
 0x365   : > { %3897 = vmatmul.mubr.msk.f32.gmra.mrb[10].mxu1 %vm2890_vm3, %v2789_v6 }
 0x366   : > { %3899 = vmatprep.mubr.msk.f32.mxu1 %vm2890_vm3, %v2790_v40 }
 0x369   : > { %3900 = vmatmul.mubr.msk.f32.gmra.mrb[12].mxu1 %vm2890_vm3, %v2791_v59 }
 0x36a   : > { %3902 = vmatprep.mubr.msk.f32.mxu1 %vm2890_vm3, %v2792_v46 }
 0x36d   : > { %3903 = vmatmul.mubr.msk.f32.gmra.mrb[14].mxu1 %vm2890_vm3, %v2793_v54 }
 0x397   : > { %v2141_v56 = vpop.xlane.xlu0 %2140 }
 0x398   : > { %v2186_v62 = vsub.f32 %v8749_v33, %v2141_v56  ;;  %v2187_v38 = vsub.f32 %v8750_v12, %v2141_v56 }
 0x39a   : > { %v2220_v45 = vmul.f32 1.442695, %v2186_v62  ;;  %v2222_v16 = vmul.f32 1.442695, %v2187_v38 }
 0x39c   : > { %4055 = vpow2.f32 %v2220_v45 }
 0x39d   : > { %4057 = vpow2.f32 %v2222_v16 }
 0x3a6   : > { %v4056_v41 = vpop.eup %4055 }
 0x3a7   : > { %v4058_v14 = vpop.eup %4057  ;;  %v2282_v63 = vmul.f32 %v4056_v41, %v8751_v55 }
 0x3a8   : > { %v2283_v57 = vmul.f32 %v4058_v14, %v8752_v48  ;;  %v7184_v53 = vadd.f32 %v4058_v14, %v4056_v41 }
 0x3aa   : > { %v2315_v10 = vadd.f32 %v2283_v57, %v2282_v63 }
 0x3ac   : > { %2316 = vadd.xlane.f32.xlu1 %v2315_v10 }
 0x3c8   : > { %v2138_v25 = vpop.xlane.xlu1 %2137 }
 0x3c9   : > { %v2184_v21 = vsub.f32 %v6940_v11, %v2138_v25  ;;  %v2185_v35 = vsub.f32 %v6942_v32, %v2138_v25 }
 0x3cb   : > { %v2216_v19 = vmul.f32 1.442695, %v2184_v21  ;;  %v2218_v6 = vmul.f32 1.442695, %v2185_v35 }
 0x3cc   : > { %v2147_v40 = vpop.xlane.xlu1 %2146  ;;  %v2144_v59 = vpop.xlane.xlu0 %2143 }
 0x3cd   : > { %4059 = vpow2.f32 %v2216_v19  ;;  %v2190_v46 = vsub.f32 %v6945_v27, %v2147_v40  ;;  %v2191_v54 = vsub.f32 %v6952_v31, %v2147_v40  ;;  %v2188_v56 = vsub.f32 %v6966_v17, %v2144_v59 }
 0x3ce   : > { %4061 = vpow2.f32 %v2218_v6  ;;  %v2189_v33 = vsub.f32 %v6968_v23, %v2144_v59 }
 0x3cf   : > { %v2228_v62 = vmul.f32 1.442695, %v2190_v46  ;;  %v2230_v12 = vmul.f32 1.442695, %v2191_v54  ;;  %v2224_v38 = vmul.f32 1.442695, %v2188_v56 }
 0x3d0   : > { %v2226_v11 = vmul.f32 1.442695, %v2189_v33  ;;  %v2153_v45 = vpop.xlane.xlu1 %2152  ;;  %v2150_v32 = vpop.xlane.xlu0 %2149  ;;  %v8754_v54 = vld [vmem:[#allocation43_spill] sm:$0xff] }
 0x3d1   : > { %4063 = vpow2.f32 %v2228_v62  ;;  %v2194_v16 = vsub.f32 %v6971_v5, %v2153_v45  ;;  %v2195_v41 = vsub.f32 %v6974_v37, %v2153_v45  ;;  %v2192_v27 = vsub.f32 %v6992_v22, %v2150_v32 }
 0x3d2   : > { %4065 = vpow2.f32 %v2230_v12  ;;  %v2193_v31 = vsub.f32 %v6994_v42, %v2150_v32 }
 0x3d3   : > { %4067 = vpow2.f32 %v2224_v38  ;;  %v2236_v17 = vmul.f32 1.442695, %v2194_v16  ;;  %v2238_v14 = vmul.f32 1.442695, %v2195_v41  ;;  %v2232_v23 = vmul.f32 1.442695, %v2192_v27 }
 0x3d4   : > { %4069 = vpow2.f32 %v2226_v11  ;;  %v2234_v55 = vmul.f32 1.442695, %v2193_v31  ;;  %v2159_v63 = vpop.xlane.xlu1 %2158  ;;  %v2156_v48 = vpop.xlane.xlu0 %2155 }
 0x3d5   : > { %4071 = vpow2.f32 %v2236_v17  ;;  %v2198_v57 = vsub.f32 %v6997_v50, %v2159_v63  ;;  %v2199_v5 = vsub.f32 %v7000_v0, %v2159_v63  ;;  %v2196_v37 = vsub.f32 %v7017_v8, %v2156_v48  ;;  %v8753_v50 = vld [vmem:[#allocation16_spill] sm:$0xff] }
 0x3d6   : > { %4073 = vpow2.f32 %v2238_v14  ;;  %v2197_v22 = vsub.f32 %v7019_v2, %v2156_v48  ;;  %v8757_v63 = vld [vmem:[#allocation4_spill] sm:$0xff] }
 0x3d7   : > { %v7200_v10 = vpop.eup %4059  ;;  %4075 = vpow2.f32 %v2232_v23  ;;  %v2244_v42 = vmul.f32 1.442695, %v2198_v57  ;;  %v2246_v25 = vmul.f32 1.442695, %v2199_v5  ;;  %v2240_v21 = vmul.f32 1.442695, %v2196_v37 }
 0x3d8   : > { %v7202_v35 = vpop.eup %4061  ;;  %4077 = vpow2.f32 %v2234_v55  ;;  %v2242_v19 = vmul.f32 1.442695, %v2197_v22  ;;  %v2165_v6 = vpop.xlane.xlu1 %2164  ;;  %v2280_v0 = vmul.f32 %v7200_v10, %v8753_v50  ;;  %v8756_v23 = vld [vmem:[#allocation30_spill] sm:$0xff] }
 0x3d9   : > { %v2162_v40 = vpop.xlane.xlu0 %2161  ;;  %4079 = vpow2.f32 %v2244_v42  ;;  %v2202_v8 = vsub.f32 %v7022_v24, %v2165_v6  ;;  %v2203_v2 = vsub.f32 %v7029_v43, %v2165_v6  ;;  %v2281_v56 = vmul.f32 %v7202_v35, %v8754_v54 }
 0x3da   : > { %v2200_v59 = vsub.f32 %v7041_v61, %v2162_v40  ;;  %4081 = vpow2.f32 %v2246_v25  ;;  %v2201_v46 = vsub.f32 %v7043_v51, %v2162_v40  ;;  %v8755_v61 = vld [vmem:[#allocation26_spill] sm:$0xff]  ;;  %v8758_v25 = vld [vmem:[#allocation55_spill] sm:$0xff] }
 0x3db   : > { %v7212_v33 = vpop.eup %4063  ;;  %4083 = vpow2.f32 %v2240_v21  ;;  %v2252_v62 = vmul.f32 1.442695, %v2202_v8  ;;  %v2254_v12 = vmul.f32 1.442695, %v2203_v2  ;;  %v2312_v45 = vadd.f32 %v2281_v56, %v2280_v0 }
 0x3dc   : > { %v2248_v38 = vmul.f32 1.442695, %v2200_v59  ;;  %v7214_v11 = vpop.eup %4065  ;;  %4085 = vpow2.f32 %v2242_v19  ;;  %v2250_v24 = vmul.f32 1.442695, %v2201_v46  ;;  %v2171_v43 = vpop.xlane.xlu1 %2170  ;;  %v2286_v16 = vmul.f32 %v7212_v33, %v8755_v61  ;;  %v8759_v59 = vld [vmem:[#allocation32_spill] sm:$0xff] }
 0x3dd   : > { %v2168_v32 = vpop.xlane.xlu0 %2167  ;;  %v7218_v51 = vpop.eup %4067  ;;  %4087 = vpow2.f32 %v2252_v62  ;;  %v2206_v41 = vsub.f32 %v7046_v60, %v2171_v43  ;;  %v2207_v27 = vsub.f32 %v7049_v49, %v2171_v43  ;;  %2313 = vadd.xlane.f32.xlu0 %v2312_v45  ;;  %v2287_v55 = vmul.f32 %v7214_v11, %v8756_v23  ;;  %v8761_v45 = vld [vmem:[#allocation22_spill] sm:$0xff] }
 0x3de   : > { %v2204_v31 = vsub.f32 %v7065_v36, %v2168_v32  ;;  %v7223_v17 = vpop.eup %4069  ;;  %4089 = vpow2.f32 %v2254_v12  ;;  %v2205_v14 = vsub.f32 %v7067_v47, %v2168_v32  ;;  %v2284_v48 = vmul.f32 %v7218_v51, %v8757_v63 }
 0x3df   : > { %v7230_v57 = vpop.eup %4071  ;;  %4091 = vpow2.f32 %v2248_v38  ;;  %v2260_v60 = vmul.f32 1.442695, %v2206_v41  ;;  %v2262_v5 = vmul.f32 1.442695, %v2207_v27  ;;  %v2321_v42 = vadd.f32 %v2287_v55, %v2286_v16  ;;  %v8760_v38 = vld [vmem:[#allocation38_spill] sm:$0xff]  ;;  %v8762_v41 = vld [vmem:[#allocation21_spill] sm:$0xff] }
 0x3e0   : > { %v2256_v49 = vmul.f32 1.442695, %v2204_v31  ;;  %v7232_v37 = vpop.eup %4073  ;;  %4093 = vpow2.f32 %v2250_v24  ;;  %v2258_v36 = vmul.f32 1.442695, %v2205_v14  ;;  %v2177_v22 = vpop.xlane.xlu1 %2176  ;;  %v2285_v47 = vmul.f32 %v7223_v17, %v8758_v25  ;;  %v8765_v25 = vld [vmem:[#allocation23_spill] sm:$0xff] }
 0x3e1   : > { %v2174_v21 = vpop.xlane.xlu0 %2173  ;;  %v7236_v19 = vpop.eup %4075  ;;  %4095 = vpow2.f32 %v2260_v60  ;;  %v2210_v6 = vsub.f32 %v7070_v26, %v2177_v22  ;;  %v2211_v40 = vsub.f32 %v7073_v52, %v2177_v22  ;;  %2322 = vadd.xlane.f32.xlu1 %v2321_v42  ;;  %v2290_v46 = vmul.f32 %v7230_v57, %v8759_v59 }
 0x3e2   : > { %v2208_v50 = vsub.f32 %v7095_v9, %v2174_v21  ;;  %v7241_v0 = vpop.eup %4077  ;;  %4097 = vpow2.f32 %v2262_v5  ;;  %v2318_v8 = vadd.f32 %v2285_v47, %v2284_v48  ;;  %v2209_v2 = vsub.f32 %v7097_v28, %v2174_v21  ;;  %v8766_v21 = vld [vmem:[#allocation42_spill] sm:$0xff] }
 0x3e3   : > { %v7246_v54 = vpop.eup %4079  ;;  %4099 = vpow2.f32 %v2256_v49  ;;  %v2268_v56 = vmul.f32 1.442695, %v2210_v6  ;;  %v2270_v62 = vmul.f32 1.442695, %v2211_v40  ;;  %v2291_v24 = vmul.f32 %v7232_v37, %v8760_v38 }
 0x3e4   : > { %v2264_v26 = vmul.f32 1.442695, %v2208_v50  ;;  %v7248_v12 = vpop.eup %4081  ;;  %4101 = vpow2.f32 %v2258_v36  ;;  %2319 = vadd.xlane.f32.xlu0 %v2318_v8  ;;  %v2266_v52 = vmul.f32 1.442695, %v2209_v2  ;;  %v2183_v9 = vpop.xlane.xlu1 %2182  ;;  %v2288_v28 = vmul.f32 %v7236_v19, %v8761_v45  ;;  %v8763_v36 = vld [vmem:[#allocation48_spill] sm:$0xff]  ;;  %v8767_v50 = vld [vmem:[#allocation54_spill] sm:$0xff] }
 0x3e5   : > { %v2180_v43 = vpop.xlane.xlu0 %2179  ;;  %v7254_v32 = vpop.eup %4083  ;;  %4103 = vpow2.f32 %v2268_v56  ;;  %v2214_v61 = vsub.f32 %v7099_v58, %v2183_v9  ;;  %v2215_v16 = vsub.f32 %v7103_v39, %v2183_v9  ;;  %v2289_v27 = vmul.f32 %v7241_v0, %v8762_v41  ;;  %v8768_v2 = vld [vmem:[#allocation65_spill] sm:$0xff] }
 0x3e6   : > { %v7260_v31 = vpop.eup %4085  ;;  %4105 = vpow2.f32 %v2270_v62  ;;  %v2327_v14 = vadd.f32 %v2291_v24, %v2290_v46  ;;  %v2212_v23 = vsub.f32 %v7108_v3, %v2180_v43  ;;  %v2213_v55 = vsub.f32 %v7110_v13, %v2180_v43  ;;  %v8764_v3 = vld [vmem:[#allocation49_spill] sm:$0xff] }
 0x3e7   : > { %v7264_v63 = vpop.eup %4087  ;;  %4107 = vpow2.f32 %v2264_v26  ;;  %v2276_v48 = vmul.f32 1.442695, %v2214_v61  ;;  %v2278_v60 = vmul.f32 1.442695, %v2215_v16  ;;  %v2324_v5 = vadd.f32 %v2289_v27, %v2288_v28  ;;  %v8769_v28 = vld [vmem:[#allocation74_spill] sm:$0xff]  ;;  %v8770_v61 = vld [vmem:[#allocation75_spill] sm:$0xff] }
 0x3e8   : > { %v7266_v58 = vpop.eup %4089  ;;  %4109 = vpow2.f32 %v2266_v52  ;;  %2328 = vadd.xlane.f32.xlu1 %v2327_v14  ;;  %v2272_v39 = vmul.f32 1.442695, %v2212_v23  ;;  %v2274_v49 = vmul.f32 1.442695, %v2213_v55  ;;  %v2294_v22 = vmul.f32 %v7246_v54, %v8763_v36 }
 0x3e9   : > { %v7270_v42 = vpop.eup %4091  ;;  %4111 = vpow2.f32 %v2276_v48  ;;  %2325 = vadd.xlane.f32.xlu0 %v2324_v5  ;;  %v2295_v13 = vmul.f32 %v7248_v12, %v8764_v3  ;;  %v2292_v47 = vmul.f32 %v7254_v32, %v8765_v25  ;;  %v2293_v6 = vmul.f32 %v7260_v31, %v8766_v21 }
 0x3ea   : > { %v7278_v40 = vpop.eup %4093  ;;  %4113 = vpow2.f32 %v2278_v60  ;;  %v2298_v8 = vmul.f32 %v7264_v63, %v8767_v50  ;;  %v2299_v59 = vmul.f32 %v7266_v58, %v8768_v2  ;;  %v2296_v46 = vmul.f32 %v7270_v42, %v8694_v1 }
 0x3eb   : > { %v7286_v56 = vpop.eup %4095  ;;  %4115 = vpow2.f32 %v2272_v39  ;;  %v2333_v62 = vadd.f32 %v2295_v13, %v2294_v22  ;;  %v2330_v26 = vadd.f32 %v2293_v6, %v2292_v47  ;;  %v2297_v52 = vmul.f32 %v7278_v40, %v8701_v29  ;;  %v8771_v29 = vld [vmem:[#allocation58_spill] sm:$0xff] }
 0x3ec   : > { %v4098_v9 = vpop.eup %4097  ;;  %4117 = vpow2.f32 %v2274_v49  ;;  %v2339_v38 = vadd.f32 %v2299_v59, %v2298_v8  ;;  %v2302_v43 = vmul.f32 %v7286_v56, %v8769_v28  ;;  %v8772_v47 = vld [vmem:[#allocation86_spill] sm:$0xff]  ;;  %v8774_v28 = vld [vmem:[#allocation25_spill] sm:$0xff] }
 0x3ed   : > { %v4100_v24 = vpop.eup %4099  ;;  %2334 = vadd.xlane.f32.xlu1 %v2333_v62  ;;  %2331 = vadd.xlane.f32.xlu0 %v2330_v26  ;;  %v2336_v45 = vadd.f32 %v2297_v52, %v2296_v46  ;;  %v2303_v1 = vmul.f32 %v4098_v9, %v8770_v61  ;;  %v8773_v6 = vld [vmem:[#allocation18_spill] sm:$0xff]  ;;  %v2369_v46 = vadd.f32 %v7214_v11, %v7212_v33  ;;  %v2803_v26 = vld [vmem:[%s7948_s7 + $0x48] sm:$0xff]  ;;  %4119 = vrcp.f32 %v8774_v28  ;;  %v8776_v61 = vld [vmem:[#allocation17_spill] sm:$0xff] }
 0x3ee   : > { %v4102_v16 = vpop.eup %4101  ;;  %v2300_v41 = vmul.f32 %v4100_v24, %v8707_v18  ;;  %v2372_v62 = vadd.f32 %v7241_v0, %v7236_v19  ;;  %v2384_v33 = vadd.f32 %v7278_v40, %v7270_v42  ;;  %v2393_v11 = vadd.f32 %v4098_v9, %v7286_v56  ;;  %v2795_v0 = vld [vmem:[%s7948_s7 + $0x8] sm:$0xff]  ;;  %v2802_v42 = vld [vmem:[%s7948_s7 + $0x40] sm:$0xff]  ;;  %v2801_v40 = vld [vmem:[%s7948_s7 + $0x38] sm:$0xff] }
 0x3ef   : > { %v4104_v27 = vpop.eup %4103  ;;  %v2301_v14 = vmul.f32 %v4102_v16, %v8709_v20  ;;  %v2345_v60 = vadd.f32 %v2303_v1, %v2302_v43  ;;  %v2804_v56 = vld [vmem:[%s7948_s7 + $0x50] sm:$0xff]  ;;  %v2806_v52 = vld [vmem:[%s7948_s7 + $0x60] sm:$0xff]  ;;  %v2805_v9 = vld [vmem:[%s7948_s7 + $0x58] sm:$0xff] }
 0x3f0   : > { %v4106_v23 = vpop.eup %4105  ;;  %v2306_v55 = vmul.f32 %v4104_v27, %v8771_v29  ;;  %v8775_v43 = vld [vmem:[#allocation82_spill] sm:$0xff]  ;;  %v8777_v1 = vld [vmem:[#allocation76_spill] sm:$0xff]  ;;  %v8781_v29 = vld [vmem:[#allocation37_spill] sm:$0xff] }
 0x3f1   : > { %v4108_v48 = vpop.eup %4107  ;;  %2340 = vadd.xlane.f32.xlu1 %v2339_v38  ;;  %2337 = vadd.xlane.f32.xlu0 %v2336_v45  ;;  %v2342_v5 = vadd.f32 %v2301_v14, %v2300_v41  ;;  %v2307_v39 = vmul.f32 %v4106_v23, %v8744_v34  ;;  %v2808_v38 = vld [vmem:[%s7948_s7 + $0x70] sm:$0xff]  ;;  %v2809_v45 = vld [vmem:[%s7948_s7 + $0x78] sm:$0xff]  ;;  %4121 = vrcp.f32 %v8775_v43  ;;  %v8779_v14 = vld [vmem:[#allocation7_spill] sm:$0xff] }
 0x3f2   : > { %v4110_v49 = vpop.eup %4109  ;;  %v2304_v36 = vmul.f32 %v4108_v48, %v8715_v7  ;;  %4123 = vrcp.f32 %v8776_v61  ;;  %v8794_v61 = vld [vmem:[#allocation62_spill] sm:$0xff] }
 0x3f3   : > { %v4112_v22 = vpop.eup %4111  ;;  %v2305_v3 = vmul.f32 %v4110_v49, %v8722_v15  ;;  %v2351_v13 = vadd.f32 %v2307_v39, %v2306_v55  ;;  %v2360_v15 = vadd.f32 %v7202_v35, %v7200_v10  ;;  %v2378_v10 = vadd.f32 %v7260_v31, %v7254_v32  ;;  %v2798_v32 = vld [vmem:[%s7948_s7 + $0x20] sm:$0xff]  ;;  %v2797_v31 = vld [vmem:[%s7948_s7 + $0x18] sm:$0xff]  ;;  %v8783_v39 = vld [vmem:[#allocation83_spill] sm:$0xff] }
 0x3f4   : > { %v4114_v18 = vpop.eup %4113  ;;  %v2310_v21 = vmul.f32 %v4112_v22, %v8772_v47  ;;  %v2387_v35 = vadd.f32 %v7266_v58, %v7264_v63  ;;  %v2800_v63 = vld [vmem:[%s7948_s7 + $0x30] sm:$0xff]  ;;  %v2799_v58 = vld [vmem:[%s7948_s7 + $0x28] sm:$0xff]  ;;  %4125 = vrcp.f32 %v8777_v1 }
 0x3f5   : > { %v4116_v25 = vpop.eup %4115  ;;  %2346 = vadd.xlane.f32.xlu1 %v2345_v60  ;;  %2343 = vadd.xlane.f32.xlu0 %v2342_v5  ;;  %v2348_v20 = vadd.f32 %v2305_v3, %v2304_v36  ;;  %v2311_v50 = vmul.f32 %v4114_v18, %v8773_v6  ;;  %v8786_v6 = vld [vmem:[#allocation27_spill] sm:$0xff] }
 0x3f6   : > { %v4118_v8 = vpop.eup %4117  ;;  %v2308_v2 = vmul.f32 %v4116_v25, %v8739_v30  ;;  %v2366_v30 = vadd.f32 %v7223_v17, %v7218_v51  ;;  %v2390_v51 = vadd.f32 %v4102_v16, %v4100_v24  ;;  %v2399_v17 = vadd.f32 %v4106_v23, %v4104_v27  ;;  %v2807_v24 = vld [vmem:[%s7948_s7 + $0x68] sm:$0xff] }
 0x3f7   : > { %v2309_v34 = vmul.f32 %v4118_v8, %v8741_v4  ;;  %v2357_v7 = vadd.f32 %v2311_v50, %v2310_v21  ;;  %v2375_v4 = vadd.f32 %v7232_v37, %v7230_v57  ;;  %v2396_v57 = vadd.f32 %v4110_v49, %v4108_v48  ;;  %v4120_v16 = vpop.eup %4119  ;;  %v8778_v27 = vld [vmem:[#allocation19_spill] sm:$0xff] }
 0x3f8   : > { %v2405_v37 = vadd.f32 %v4114_v18, %v4112_v22  ;;  %v2402_v19 = vadd.f32 %v4118_v8, %v4116_v25  ;;  %4127 = vrcp.f32 %v8778_v27  ;;  %v7377_v23 = vmul.f32 %v4120_v16, %v8779_v14  ;;  %v8785_v18 = vld [vmem:[#allocation77_spill] sm:$0xff] }
 0x3f9   : > { %2352 = vadd.xlane.f32.xlu1 %v2351_v13  ;;  %2349 = vadd.xlane.f32.xlu0 %v2348_v20  ;;  %v2354_v59 = vadd.f32 %v2309_v34, %v2308_v2  ;;  %4129 = vrcp.f32 %v8785_v18  ;;  %v8787_v34 = vld [vmem:[#allocation50_spill] sm:$0xff]  ;;  %v8795_v14 = vld [vmem:[#allocation45_spill] sm:$0xff] }
 0x3fa   : > { %8780 = vst [vmem:[#allocation92_spill] sm:$0xff] %v7377_v23  ;;  %v2478_v36 = vmul.f32 %v7377_v23, %v7377_v23  ;;  %4131 = vrcp.f32 %v8786_v6 }
 0x3fb   : > { %v4122_v41 = vpop.eup %4121 }
 0x3fc   : > { %v7380_v55 = vmul.f32 %v4122_v41, %v8781_v29  ;;  %v4124_v48 = vpop.eup %4123  ;;  %v8796_v29 = vld [vmem:[#allocation56_spill] sm:$0xff] }
 0x3fd   : > { %2358 = vadd.xlane.f32.xlu1 %v2357_v7  ;;  %2355 = vadd.xlane.f32.xlu0 %v2354_v59  ;;  %v7387_v49 = vmul.f32 %v4124_v48, %v8783_v39 }
 0x3fe   : > { %8782 = vst [vmem:[#allocation93_spill] sm:$0xff] %v7380_v55  ;;  %v2477_v22 = vmul.f32 %v7380_v55, %v7380_v55  ;;  %v4126_v21 = vpop.eup %4125 }
 0x3ff   : > { %8784 = vst [vmem:[#allocation57_spill] sm:$0xff] %v7387_v49  ;;  %v2479_v20 = vmul.f32 %v7387_v49, %v7387_v49  ;;  %v7410_v7 = vmul.f32 %v4126_v21, %v8787_v34 }
 0x400   : > { %v2493_v2 = vadd.f32 %v2478_v36, %v2477_v22 }
 0x401   : > { %2364 = vadd.xlane.f32.xlu1 %v7184_v53  ;;  %2361 = vadd.xlane.f32.xlu0 %v2360_v15  ;;  %v2381_v53 = vadd.f32 %v7248_v12, %v7246_v54  ;;  %v2796_v54 = vld [vmem:[%s7948_s7 + $0x10] sm:$0xff]  ;;  %v2794_v12 = vld [vmem:[%s7948_s7] sm:$0xff]  ;;  %8788 = vst [vmem:[#allocation87_spill] sm:$0xff] %v7410_v7 }
 0x402   : > { %v4128_v15 = vpop.eup %4127 }
 0x405   : > { %2370 = vadd.xlane.f32.xlu1 %v2369_v46  ;;  %2367 = vadd.xlane.f32.xlu0 %v2366_v30  ;;  %v2494_v30 = vadd.f32 %v2493_v2, %v2479_v20  ;;  %v8797_v20 = vld [vmem:[#allocation98_spill] sm:$0xff] }
 0x409   : > { %2376 = vadd.xlane.f32.xlu1 %v2375_v4  ;;  %2373 = vadd.xlane.f32.xlu0 %v2372_v62  ;;  %v8789_v4 = vld [vmem:[#allocation84_spill] sm:$0xff] }
 0x40a   : > { %v7417_v62 = vmul.f32 %v4128_v15, %v8789_v4  ;;  %v8798_v15 = vld [vmem:[#allocation39_spill] sm:$0xff] }
 0x40d   : > { %2382 = vadd.xlane.f32.xlu1 %v2381_v53  ;;  %2379 = vadd.xlane.f32.xlu0 %v2378_v10 }
 0x411   : > { %2388 = vadd.xlane.f32.xlu1 %v2387_v35  ;;  %2385 = vadd.xlane.f32.xlu0 %v2384_v33  ;;  %v2480_v33 = vmul.f32 %v7410_v7, %v7410_v7 }
 0x415   : > { %2394 = vadd.xlane.f32.xlu1 %v2393_v11  ;;  %2391 = vadd.xlane.f32.xlu0 %v2390_v51 }
 0x419   : > { %2400 = vadd.xlane.f32.xlu1 %v2399_v17  ;;  %2397 = vadd.xlane.f32.xlu0 %v2396_v57  ;;  %v8790_v17 = vld [vmem:[#allocation95_spill] sm:$0xff] }
 0x41a   : > { %4133 = vrcp.f32 %v8790_v17  ;;  %v8799_v17 = vld [vmem:[#allocation59_spill] sm:$0xff] }
 0x41d   : > { %2406 = vadd.xlane.f32.xlu1 %v2405_v37  ;;  %2403 = vadd.xlane.f32.xlu0 %v2402_v19  ;;  %v2495_v37 = vadd.f32 %v2494_v30, %v2480_v33  ;;  %v2481_v19 = vmul.f32 %v7417_v62, %v7417_v62 }
 0x424   : > { %v7393_v3 = vpop.f32.mrb[0].mxu1 }
 0x425   : > { %v7398_v25 = vpop.f32.mrb[1].mxu1 }
 0x428   : > { %v7402_v47 = vpop.f32.mrb[2].mxu1 }
 0x429   : > { %v7407_v8 = vpop.f32.mrb[3].mxu1 }
 0x42c   : > { %v7412_v59 = vpop.f32.mrb[4].mxu1 }
 0x42d   : > { %v7414_v46 = vpop.f32.mrb[5].mxu1 }
 0x42e   : > { %2817 = vperm.xlu1 %3964, %v2795_v0  }
 0x430   : > { %v7419_v53 = vpop.f32.mrb[6].mxu1 }
 0x431   : > { %v7423_v35 = vpop.f32.mrb[7].mxu1 }
 0x432   : > { %2822 = vperm.xlu1 %3964, %v2796_v54   ;;  %v4130_v54 = vpop.eup %4129 }
 0x433   : > { %2812 = vperm.xlu0 %3963, %v2794_v12   ;;  %v8791_v12 = vld [vmem:[#allocation36_spill] sm:$0xff] }
 0x434   : > { %v7429_v51 = vpop.f32.mrb[8].mxu1  ;;  %4135 = vrcp.f32 %v8791_v12 }
 0x435   : > { %v7432_v57 = vpop.f32.mrb[9].mxu1  ;;  %4137 = vrcp.f32 %v8794_v61 }
 0x436   : > { %2832 = vperm.xlu1 %3964, %v2798_v32   ;;  %4139 = vrcp.f32 %v8795_v14 }
 0x437   : > { %2827 = vperm.xlu0 %3963, %v2797_v31   ;;  %v8792_v31 = vld [vmem:[#allocation80_spill] sm:$0xff]  ;;  %4141 = vrcp.f32 %v8798_v15 }
 0x438   : > { %v7436_v0 = vpop.f32.mrb[10].mxu1  ;;  %4143 = vrcp.f32 %v8799_v17  ;;  %v8806_v17 = vld [vmem:[#allocation3_spill] sm:$0xff] }
 0x439   : > { %v7382_v60 = vpop.xlane.xlu1 %2316  ;;  %v7439_v32 = vpop.f32.mrb[11].mxu1 }
 0x43a   : > { %2842 = vperm.xlu1 %3964, %v2800_v63   ;;  %v7442_v63 = vmul.f32 %v4130_v54, %v8792_v31 }
 0x43b   : > { %2837 = vperm.xlu0 %3963, %v2799_v58  }
 0x43e   : > { %2852 = vperm.xlu1 %3964, %v2802_v42  }
 0x43f   : > { %2847 = vperm.xlu0 %3963, %v2801_v40   ;;  %v4132_v40 = vpop.eup %4131 }
 0x440   : > { %v4134_v27 = vpop.eup %4133 }
 0x441   : > { %v7470_v48 = vmul.f32 %v4134_v27, %v8796_v29  ;;  %v4136_v22 = vpop.eup %4135 }
 0x442   : > { %2862 = vperm.xlu1 %3964, %v2804_v56   ;;  %v7448_v56 = vpop.f32.mrb[12].mxu1  ;;  %v7477_v21 = vmul.f32 %v4136_v22, %v8797_v20  ;;  %v4138_v33 = vpop.eup %4137  ;;  %v8803_v22 = vld [vmem:[#allocation9_spill] sm:$0xff]  ;;  %v8805_v20 = vld [vmem:[#allocation90_spill] sm:$0xff] }
 0x443   : > { %2857 = vperm.xlu0 %3963, %v2803_v26   ;;  %v2496_v26 = vadd.f32 %v2495_v37, %v2481_v19  ;;  %v2484_v6 = vmul.f32 %v7470_v48, %v7470_v48  ;;  %v8800_v37 = vld [vmem:[#allocation99_spill] sm:$0xff]  ;;  %v4140_v31 = vpop.eup %4139 }
 0x444   : > { %v2485_v4 = vmul.f32 %v7477_v21, %v7477_v21  ;;  %v7490_v19 = vmul.f32 %v4138_v33, %v8800_v37  ;;  %v4142_v29 = vpop.eup %4141 }
 0x446   : > { %2872 = vperm.xlu1 %3964, %v2806_v52   ;;  %v8793_v52 = vld [vmem:[#allocation40_spill] sm:$0xff]  ;;  %v2486_v61 = vmul.f32 %v7490_v19, %v7490_v19 }
 0x447   : > { %2867 = vperm.xlu0 %3963, %v2805_v9   ;;  %v7451_v9 = vmul.f32 %v4132_v40, %v8793_v52 }
 0x449   : > { %v2483_v41 = vmul.f32 %v7451_v9, %v7451_v9 }
 0x44a   : > { %2882 = vperm.xlu1 %3964, %v2808_v38   ;;  %v7453_v38 = vpop.f32.mrb[13].mxu1 }
 0x44b   : > { %2877 = vperm.xlu0 %3963, %v2807_v24   ;;  %v7455_v24 = vpop.f32.mrb[14].mxu1 }
 0x44c   : > { %v7464_v1 = vpop.f32.mrb[15].mxu1 }
 0x44f   : > { %2887 = vperm.xlu0 %3963, %v2809_v45   ;;  %v2482_v45 = vmul.f32 %v7442_v63, %v7442_v63 }
 0x451   : > { %v2497_v16 = vadd.f32 %v2496_v26, %v2482_v45  ;;  %v8801_v26 = vld [vmem:[#allocation2_spill] sm:$0xff]  ;;  %v8802_v45 = vld [vmem:[#allocation11_spill] sm:$0xff] }
 0x452   : > { %v7497_v52 = vmul.f32 %v4140_v31, %v8801_v26  ;;  %4145 = vrcp.f32 %v8802_v45 }
 0x453   : > { %v2498_v18 = vadd.f32 %v2497_v16, %v2483_v41 }
 0x454   : > { %v2487_v14 = vmul.f32 %v7497_v52, %v7497_v52 }
 0x455   : > { %v2499_v30 = vadd.f32 %v2498_v18, %v2484_v6  ;;  %v8804_v18 = vld [vmem:[#allocation71_spill] sm:$0xff]  ;;  %v7507_v6 = vmul.f32 %v4142_v29, %v8805_v20 }
 0x457   : > { %v2500_v40 = vadd.f32 %v2499_v30, %v2485_v4  ;;  %v4144_v4 = vpop.eup %4143  ;;  %v2488_v31 = vmul.f32 %v7507_v6, %v7507_v6 }
 0x458   : > { %v7510_v37 = vmul.f32 %v4144_v4, %v8806_v17  ;;  %v8810_v17 = vld [vmem:[#allocation96_spill] sm:$0xff] }
 0x459   : > { %v2501_v27 = vadd.f32 %v2500_v40, %v2486_v61 }
 0x45b   : > { %v2502_v33 = vadd.f32 %v2501_v27, %v2487_v14 }
 0x45c   : > { %v4146_v45 = vpop.eup %4145 }
 0x45d   : > { %v2503_v61 = vadd.f32 %v2502_v33, %v2488_v31 }
 0x46a   : > { %v7384_v5 = vpop.xlane.xlu0 %2313 }
 0x46e   : > { %v7396_v13 = vpop.xlane.xlu1 %2322 }
 0x471   : > { %v7405_v50 = vpop.xlane.xlu0 %2319 }
 0x475   : > { %v7421_v10 = vpop.xlane.xlu1 %2328 }
 0x476   : > { %v7427_v11 = vpop.xlane.xlu0 %2325 }
 0x47a   : > { %v7444_v58 = vpop.xlane.xlu1 %2334  ;;  %v7446_v42 = vpop.xlane.xlu0 %2331 }
 0x47e   : > { %v7459_v28 = vpop.xlane.xlu1 %2340  ;;  %v7461_v43 = vpop.xlane.xlu0 %2337 }
 0x482   : > { %v7472_v39 = vpop.xlane.xlu1 %2346  ;;  %v7474_v36 = vpop.xlane.xlu0 %2343 }
 0x486   : > { %v7481_v2 = vpop.xlane.xlu1 %2352  ;;  %v7483_v34 = vpop.xlane.xlu0 %2349 }
 0x48a   : > { %v7492_v54 = vpop.xlane.xlu1 %2358  ;;  %v7494_v12 = vpop.xlane.xlu0 %2355 }
 0x48e   : > { %v2365_v16 = vpop.xlane.xlu1 %2364  ;;  %v2362_v41 = vpop.xlane.xlu0 %2361 }
 0x48f   : > { %4147 = vrcp.f32 %v2365_v16  ;;  %v2489_v16 = vmul.f32 %v7510_v37, %v7510_v37 }
 0x490   : > { %4149 = vrcp.f32 %v2362_v41 }
 0x491   : > { %4151 = vrcp.f32 %v8803_v22  ;;  %v8807_v22 = vld [vmem:[#allocation94_spill] sm:$0xff]  ;;  %v2504_v33 = vadd.f32 %v2503_v61, %v2489_v16 }
 0x492   : > { %4153 = vrcp.f32 %v8804_v18  ;;  %v2371_v15 = vpop.xlane.xlu1 %2370  ;;  %v2368_v30 = vpop.xlane.xlu0 %2367  ;;  %v7517_v27 = vmul.f32 %v4146_v45, %v8807_v22  ;;  %v8811_v16 = vld [vmem:[#allocation10_spill] sm:$0xff] }
 0x493   : > { %4155 = vrcp.f32 %v2371_v15 }
 0x494   : > { %4157 = vrcp.f32 %v2368_v30  ;;  %v2490_v61 = vmul.f32 %v7517_v27, %v7517_v27 }
 0x496   : > { %v2377_v40 = vpop.xlane.xlu1 %2376  ;;  %v2374_v26 = vpop.xlane.xlu0 %2373 }
 0x497   : > { %4159 = vrcp.f32 %v2377_v40 }
 0x498   : > { %4161 = vrcp.f32 %v2374_v26 }
 0x499   : > { %v4148_v41 = vpop.eup %4147 }
 0x49a   : > { %v4150_v29 = vpop.eup %4149  ;;  %v7520_v14 = vmul.f32 %v4148_v41, %v7382_v60  ;;  %v2383_v18 = vpop.xlane.xlu1 %2382 }
 0x49b   : > { %v2380_v20 = vpop.xlane.xlu0 %2379  ;;  %v4152_v15 = vpop.eup %4151  ;;  %v7523_v30 = vmul.f32 %v4150_v29, %v7384_v5  ;;  %4163 = vrcp.f32 %v2383_v18 }
 0x49c   : > { %8808 = vst [vmem:[#allocation67_spill] sm:$0xff] %v7520_v14  ;;  %v4154_v4 = vpop.eup %4153  ;;  %v7526_v31 = vmul.f32 %v4152_v15, %v8810_v17  ;;  %4165 = vrcp.f32 %v2380_v20  ;;  %v2441_v26 = vmul.f32 %v7520_v14, %v7377_v23  ;;  %v2522_v60 = vmul.f32 %v7520_v14, %v7520_v14 }
 0x49d   : > { %8809 = vst [vmem:[#allocation12_spill] sm:$0xff] %v7523_v30  ;;  %v4156_v40 = vpop.eup %4155  ;;  %v2440_v45 = vmul.f32 %v7523_v30, %v7380_v55  ;;  %v2521_v5 = vmul.f32 %v7523_v30, %v7523_v30  ;;  %v7539_v29 = vmul.f32 %v4154_v4, %v8811_v16  ;;  %v2505_v17 = vadd.f32 %v2504_v33, %v2490_v61 }
 0x49e   : > { %v4158_v41 = vpop.eup %4157  ;;  %v7542_v22 = vmul.f32 %v4156_v40, %v7396_v13  ;;  %v2389_v18 = vpop.xlane.xlu1 %2388  ;;  %v2491_v30 = vmul.f32 %v7526_v31, %v7526_v31 }
 0x49f   : > { %v2386_v20 = vpop.xlane.xlu0 %2385  ;;  %v7545_v15 = vmul.f32 %v4158_v41, %v7405_v50  ;;  %4167 = vrcp.f32 %v2389_v18  ;;  %v2456_v14 = vadd.f32 %v2441_v26, %v2440_v45  ;;  %v2537_v23 = vadd.f32 %v2522_v60, %v2521_v5 }
 0x4a0   : > { %8812 = vst [vmem:[#allocation91_spill] sm:$0xff] %v7542_v22  ;;  %4169 = vrcp.f32 %v2386_v20  ;;  %v2492_v50 = vmul.f32 %v7539_v29, %v7539_v29  ;;  %v2443_v33 = vmul.f32 %v7542_v22, %v7410_v7  ;;  %v2524_v41 = vmul.f32 %v7542_v22, %v7542_v22 }
 0x4a1   : > { %8813 = vst [vmem:[#allocation72_spill] sm:$0xff] %v7545_v15  ;;  %v4160_v55 = vpop.eup %4159  ;;  %v2442_v4 = vmul.f32 %v7545_v15, %v7387_v49  ;;  %v2523_v13 = vmul.f32 %v7545_v15, %v7545_v15  ;;  %v2506_v18 = vadd.f32 %v2505_v17, %v2491_v30 }
 0x4a2   : > { %v4162_v40 = vpop.eup %4161  ;;  %v7560_v61 = vmul.f32 %v4160_v55, %v7421_v10  ;;  %v2395_v26 = vpop.xlane.xlu1 %2394 }
 0x4a3   : > { %v2392_v60 = vpop.xlane.xlu0 %2391  ;;  %v2457_v45 = vadd.f32 %v2456_v14, %v2442_v4  ;;  %v2538_v5 = vadd.f32 %v2537_v23, %v2523_v13  ;;  %v7563_v16 = vmul.f32 %v4162_v40, %v7427_v11  ;;  %4171 = vrcp.f32 %v2395_v26 }
 0x4a4   : > { %4173 = vrcp.f32 %v2392_v60  ;;  %v2507_v22 = vadd.f32 %v2506_v18, %v2492_v50  ;;  %v2445_v23 = vmul.f32 %v7560_v61, %v7442_v63  ;;  %v2526_v11 = vmul.f32 %v7560_v61, %v7560_v61 }
 0x4a5   : > { %v4164_v20 = vpop.eup %4163  ;;  %v2458_v15 = vadd.f32 %v2457_v45, %v2443_v33  ;;  %v2539_v49 = vadd.f32 %v2538_v5, %v2524_v41  ;;  %v2444_v7 = vmul.f32 %v7563_v16, %v7417_v62  ;;  %v2525_v55 = vmul.f32 %v7563_v16, %v7563_v16 }
 0x4a6   : > { %v4166_v10 = vpop.eup %4165  ;;  %v7574_v14 = vmul.f32 %v4164_v20, %v7444_v58  ;;  %v2401_v30 = vpop.xlane.xlu1 %2400  ;;  %v2508_v45 = vrot.slane %v2507_v22, 4 }
 0x4a7   : > { %v2398_v17 = vpop.xlane.xlu0 %2397  ;;  %v2459_v4 = vadd.f32 %v2458_v15, %v2444_v7  ;;  %v2540_v13 = vadd.f32 %v2539_v49, %v2525_v55  ;;  %v7577_v40 = vmul.f32 %v4166_v10, %v7446_v42  ;;  %4175 = vrcp.f32 %v2401_v30 }
 0x4a8   : > { %4177 = vrcp.f32 %v2398_v17  ;;  %v2528_v7 = vmul.f32 %v7574_v14, %v7574_v14  ;;  %v2447_v55 = vmul.f32 %v7574_v14, %v7470_v48 }
 0x4a9   : > { %v4168_v33 = vpop.eup %4167  ;;  %v2460_v50 = vadd.f32 %v2459_v4, %v2445_v23  ;;  %v2541_v41 = vadd.f32 %v2540_v13, %v2526_v11  ;;  %v2446_v26 = vmul.f32 %v7577_v40, %v7451_v9  ;;  %v2527_v60 = vmul.f32 %v7577_v40, %v7577_v40 }
 0x4aa   : > { %v4170_v58 = vpop.eup %4169  ;;  %v7586_v49 = vmul.f32 %v4168_v33, %v7459_v28  ;;  %v2407_v42 = vpop.xlane.xlu1 %2406  ;;  %v2509_v28 = vadd.f32 %v2508_v45, %v2507_v22 }
 0x4ab   : > { %v2404_v15 = vpop.xlane.xlu0 %2403  ;;  %v2461_v5 = vadd.f32 %v2460_v50, %v2446_v26  ;;  %v2542_v18 = vadd.f32 %v2541_v41, %v2527_v60  ;;  %v7589_v20 = vmul.f32 %v4170_v58, %v7461_v43  ;;  %4179 = vrcp.f32 %v2407_v42 }
 0x4ac   : > { %4181 = vrcp.f32 %v2404_v15  ;;  %v2530_v17 = vmul.f32 %v7586_v49, %v7586_v49 }
 0x4ad   : > { %v4172_v10 = vpop.eup %4171  ;;  %v2543_v23 = vadd.f32 %v2542_v18, %v2528_v7  ;;  %v2529_v11 = vmul.f32 %v7589_v20, %v7589_v20  ;;  %v2462_v4 = vadd.f32 %v2461_v5, %v2447_v55  ;;  %v2448_v43 = vmul.f32 %v7589_v20, %v7477_v21 }
 0x4ae   : > { %v4174_v30 = vpop.eup %4173  ;;  %v2818_v13 = vpop.permute.xlu1 %2817  ;;  %v7600_v50 = vmul.f32 %v4172_v10, %v7472_v39  ;;  %v2510_v7 = vrot.slane %v2509_v28, 2  ;;  %v2449_v10 = vmul.f32 %v7586_v49, %v7490_v19 }
 0x4af   : > { %v2544_v33 = vadd.f32 %v2543_v23, %v2529_v11  ;;  %v7603_v41 = vmul.f32 %v4174_v30, %v7474_v36  ;;  %v3011_v26 = vadd.f32 %v7393_v3, %v2818_v13  ;;  %v2463_v42 = vadd.f32 %v2462_v4, %v2448_v43 }
 0x4b0   : > { %v2532_v39 = vmul.f32 %v7600_v50, %v7600_v50  ;;  %v2511_v43 = vadd.f32 %v2510_v7, %v2509_v28 }
 0x4b1   : > { %v4176_v60 = vpop.eup %4175  ;;  %v2545_v58 = vadd.f32 %v2544_v33, %v2530_v17  ;;  %v2531_v22 = vmul.f32 %v7603_v41, %v7603_v41  ;;  %v3752_v15 = vmul.f32 -1.442695, %v3011_v26  ;;  %v2464_v13 = vadd.f32 %v2463_v42, %v2449_v10 }
 0x4b2   : > { %v4178_v45 = vpop.eup %4177  ;;  %v2823_v5 = vpop.permute.xlu1 %2822  ;;  %v7611_v36 = vmul.f32 %v4176_v60, %v7481_v2  ;;  %v2450_v2 = vmul.f32 %v7603_v41, %v7497_v52  ;;  %v2512_v42 = vrot.slane %v2511_v43, 1 }
 0x4b3   : > { %v2813_v18 = vpop.permute.xlu0 %2812  ;;  %v2546_v55 = vadd.f32 %v2545_v58, %v2531_v22  ;;  %v7614_v3 = vmul.f32 %v4178_v45, %v7483_v34  ;;  %4183 = vpow2.f32 %v3752_v15 }
 0x4b4   : > { %v3006_v23 = vadd.f32 %v7398_v25, %v2813_v18  ;;  %v2534_v26 = vmul.f32 %v7611_v36, %v7611_v36  ;;  %v2465_v15 = vadd.f32 %v2464_v13, %v2450_v2 }
 0x4b5   : > { %v4180_v11 = vpop.eup %4179  ;;  %v2547_v30 = vadd.f32 %v2546_v55, %v2532_v39  ;;  %v2533_v17 = vmul.f32 %v7614_v3, %v7614_v3 }
 0x4b6   : > { %v4182_v4 = vpop.eup %4181  ;;  %v3751_v33 = vmul.f32 -1.442695, %v3006_v23  ;;  %v7626_v58 = vmul.f32 %v4180_v11, %v7492_v54  ;;  %v2833_v22 = vpop.permute.xlu1 %2832  ;;  %v3016_v23 = vadd.f32 %v7407_v8, %v2823_v5 }
 0x4b7   : > { %v2828_v34 = vpop.permute.xlu0 %2827  ;;  %v2548_v60 = vadd.f32 %v2547_v30, %v2533_v17  ;;  %v7629_v25 = vmul.f32 %v4182_v4, %v7494_v12  ;;  %v3026_v10 = vadd.f32 %v7414_v46, %v2833_v22  ;;  %v7641_v17 = vadd.f32 %v2512_v42, %v2511_v43 }
 0x4b8   : > { %v3021_v45 = vadd.f32 %v7402_v47, %v2828_v34  ;;  %4185 = vpow2.f32 %v3751_v33  ;;  %v2536_v55 = vmul.f32 %v7626_v58, %v7626_v58  ;;  %v2451_v47 = vmul.f32 %v7600_v50, %v7507_v6 }
 0x4b9   : > { %v2549_v28 = vadd.f32 %v2548_v60, %v2534_v26  ;;  %v2535_v7 = vmul.f32 %v7629_v25, %v7629_v25  ;;  %v2452_v33 = vmul.f32 %v7614_v3, %v7510_v37  ;;  %v3755_v26 = vmul.f32 -1.442695, %v3026_v10 }
 0x4ba   : > { %v3754_v18 = vmul.f32 -1.442695, %v3021_v45  ;;  %v2466_v4 = vadd.f32 %v2465_v15, %v2451_v47  ;;  %v2843_v8 = vpop.permute.xlu1 %2842  ;;  %v2453_v42 = vmul.f32 %v7611_v36, %v7517_v27  ;;  %vm2516_vm4 = vcmp.eq.f32.partialorder %v7641_v17, inf }
 0x4bb   : > { %v2838_v39 = vpop.permute.xlu0 %2837  ;;  %v2550_v54 = vadd.f32 %v2549_v28, %v2535_v7  ;;  %v3036_v28 = vadd.f32 %v7423_v35, %v2843_v8  ;;  %vm2518_vm5 = vcmp.eq.f32.partialorder %v7641_v17, 0.0 }
 0x4bc   : > { %v3031_v12 = vadd.f32 %v7412_v59, %v2838_v39  ;;  %4187 = vpow2.f32 %v3754_v18  ;;  %v3753_v59 = vmul.f32 -1.442695, %v3016_v23  ;;  %v2467_v5 = vadd.f32 %v2466_v4, %v2452_v33 }
 0x4bd   : > { %v2551_v11 = vadd.f32 %v2550_v54, %v2536_v55  ;;  %v4184_v30 = vpop.eup %4183  ;;  %v2454_v55 = vmul.f32 %v7629_v25, %v7526_v31  ;;  %v3757_v47 = vmul.f32 -1.442695, %v3036_v28 }
 0x4be   : > { %v3756_v13 = vmul.f32 -1.442695, %v3031_v12  ;;  %v3133_v46 = vadd.f32 1.0, %v4184_v30  ;;  %v2853_v33 = vpop.permute.xlu1 %2852 }
 0x4bf   : > { %v2848_v2 = vpop.permute.xlu0 %2847  ;;  %v2552_v34 = vrot.slane %v2551_v11, 4 }
 0x4c0   : > { %4189 = vpow2.f32 %v3756_v13  ;;  %v3041_v60 = vadd.f32 %v7419_v53, %v2848_v2  ;;  %v2468_v53 = vadd.f32 %v2467_v5, %v2453_v42  ;;  %v4294_v5 = vmov 1  }
 0x4c1   : > { %v2553_v22 = vadd.f32 %v2552_v34, %v2551_v11  ;;  %4191 = vrcp.f32 %v3133_v46  ;;  %v2455_v46 = vmul.f32 %v7626_v58, %v7539_v29 }
 0x4c2   : > { %4193 = vrsqrt.f32 %v7641_v17  ;;  %v4186_v45 = vpop.eup %4185  ;;  %v3758_v7 = vmul.f32 -1.442695, %v3041_v60  ;;  %v2469_v4 = vadd.f32 %v2468_v53, %v2454_v55 }
 0x4c3   : > { %v2554_v43 = vrot.slane %v2553_v22, 2  ;;  %4195 = vpow2.f32 %v3755_v26  ;;  %v3132_v18 = vadd.f32 1.0, %v4186_v45  ;;  %v2858_v10 = vpop.permute.xlu0 %2857 }
 0x4c4   : > { %4197 = vpow2.f32 %v3753_v59  ;;  %v3051_v35 = vadd.f32 %v7429_v51, %v2858_v10  ;;  %v3046_v51 = vadd.f32 %v7432_v57, %v2853_v33  ;;  %v2519_v57 = vand.u32 2147483648, %v7641_v17 }
 0x4c5   : > { %v2555_v15 = vadd.f32 %v2554_v43, %v2553_v22  ;;  %4199 = vrcp.f32 %v3132_v18  ;;  %v2470_v22 = vadd.f32 %v2469_v4, %v2455_v46  ;;  %v8814_v10 = vmov 0  }
 0x4c6   : > { %v4188_v39 = vpop.eup %4187  ;;  %4201 = vpow2.f32 %v3758_v7  ;;  %v3760_v59 = vmul.f32 -1.442695, %v3051_v35  ;;  %v3759_v18 = vmul.f32 -1.442695, %v3046_v51  ;;  %v2863_v35 = vpop.permute.xlu1 %2862 }
 0x4c7   : > { %v2556_v54 = vrot.slane %v2555_v15, 1  ;;  %v3135_v12 = vadd.f32 1.0, %v4188_v39  ;;  %v2868_v28 = vpop.permute.xlu0 %2867 }
 0x4c8   : > { %v3061_v53 = vadd.f32 %v7436_v0, %v2868_v28 }
 0x4c9   : > { %v2557_v23 = vadd.f32 %v2556_v54, %v2555_v15  ;;  %4203 = vrcp.f32 %v3135_v12  ;;  %v2471_v15 = vrot.slane %v2470_v22, 4 }
 0x4ca   : > { %v4190_v11 = vpop.eup %4189 }
 0x4cb   : > { %v4192_v30 = vpop.eup %4191  ;;  %4205 = vrsqrt.f32 %v2557_v23  ;;  %v3137_v2 = vadd.f32 1.0, %v4190_v11  ;;  %vm2560_vm6 = vcmp.eq.f32.partialorder %v2557_v23, inf  ;;  %v2563_v4 = vand.u32 2147483648, %v2557_v23 }
 0x4cc   : > { %v4194_v13 = vpop.eup %4193  ;;  %4207 = vpow2.f32 %v3757_v47  ;;  %3251 = vperm.xlu0 %3963, %v4192_v30   ;;  %vm2562_vm7 = vcmp.eq.f32.partialorder %v2557_v23, 0.0 }
 0x4cd   : > { %v4196_v34 = vpop.eup %4195  ;;  %v2515_v60 = vmul.f32 %v4194_v13, %v7641_v17  ;;  %4209 = vrcp.f32 %v3137_v2  ;;  %v3762_v13 = vmul.f32 -1.442695, %v3061_v53 }
 0x4ce   : > { %v4198_v26 = vpop.eup %4197  ;;  %v3136_v8 = vadd.f32 1.0, %v4196_v34  ;;  %4211 = vpow2.f32 %v3760_v59  ;;  %v3056_v34 = vadd.f32 %v7439_v32, %v2863_v35  ;;  %v2574_v35 = vsub.s32 0, %v8746_v44 }
 0x4cf   : > { %v4200_v43 = vpop.eup %4199  ;;  %v3134_v45 = vadd.f32 1.0, %v4198_v26  ;;  %v2517_v42 = vsel %vm2516_vm4, %v7641_v17, %v2515_v60  ;;  %v2878_v60 = vpop.permute.xlu0 %2877 }
 0x4d0   : > { %3965 = vset.pattern.permute.xlu0 %v4294_v5  ;;  %v4202_v7 = vpop.eup %4201  ;;  %3246 = vperm.xlu1 %3964, %v4200_v43   ;;  %4213 = vrcp.f32 %v3136_v8  ;;  %v2520_v47 = vsel %vm2518_vm5, %v2519_v57, %v2517_v42  ;;  %v3761_v8 = vmul.f32 -1.442695, %v3056_v34 }
 0x4d1   : > { %3457 = vperm.xlu0 %3965, %v4192_v30   ;;  %4215 = vrcp.f32 %v3134_v45  ;;  %v3139_v54 = vadd.f32 1.0, %v4202_v7  ;;  %v2472_v30 = vadd.f32 %v2471_v15, %v2470_v22  ;;  %v2565_v46 = vmax.f32 %v2520_v47, 1e-06  ;;  %v2873_v7 = vpop.permute.xlu1 %2872 }
 0x4d2   : > { %4217 = vpow2.f32 %v3759_v18 }
 0x4d3   : > { %v4204_v39 = vpop.eup %4203  ;;  %4219 = vrcp.f32 %v3139_v54  ;;  %v2473_v59 = vrot.slane %v2472_v30, 2  ;;  %v2888_v53 = vpop.permute.xlu0 %2887 }
 0x4d4   : > { %3966 = vset.pattern.permute.xlu1 %v4294_v5  ;;  %4221 = vpow2.f32 %v3762_v13 }
 0x4d5   : > { %v4206_v55 = vpop.eup %4205  ;;  %3967 = vset.pattern.permute.xlu0 %v8814_v10  ;;  %3453 = vperm.xlu1 %3966, %v4200_v43   ;;  %v3071_v43 = vadd.f32 %v7448_v56, %v2878_v60  ;;  %v2474_v32 = vadd.f32 %v2473_v59, %v2472_v30  ;;  %v3066_v56 = vadd.f32 %v7453_v38, %v2873_v7 }
 0x4d6   : > { %v4208_v12 = vpop.eup %4207  ;;  %v2559_v11 = vmul.f32 %v4206_v55, %v2557_v23  ;;  %3261 = vperm.xlu0 %3967, %v4204_v39   ;;  %v3081_v38 = vadd.f32 %v7455_v24, %v2888_v53  ;;  %v3183_v53 = vld [vmem:[%s4369_s19 + $0x18] sm:$0xff] }
 0x4d7   : > { %v4210_v17 = vpop.eup %4209  ;;  %v3138_v33 = vadd.f32 1.0, %v4208_v12  ;;  %v3764_v15 = vmul.f32 -1.442695, %v3071_v43  ;;  %v3763_v47 = vmul.f32 -1.442695, %v3066_v56 }
 0x4d8   : > { %v2561_v0 = vsel %vm2560_vm6, %v2557_v23, %v2559_v11  ;;  %v4212_v22 = vpop.eup %4211  ;;  %v3766_v44 = vmul.f32 -1.442695, %v3081_v38  ;;  %v3390_v38 = vld [vmem:[%s4707_s22 + $0x10] sm:$0xff] }
 0x4d9   : > { %v2564_v2 = vsel %vm2562_vm7, %v2563_v4, %v2561_v0  ;;  %3465 = vperm.xlu1 %3966, %v4204_v39   ;;  %4223 = vrcp.f32 %v3138_v33  ;;  %v3141_v28 = vadd.f32 1.0, %v4212_v22  ;;  %v2475_v39 = vrot.slane %v2474_v32, 1  ;;  %v2883_v0 = vpop.permute.xlu1 %2882 }
 0x4da   : > { %v2566_v26 = vmax.f32 %v2564_v2, 1e-06  ;;  %3271 = vperm.xlu0 %3967, %v4210_v17   ;;  %v4214_v23 = vpop.eup %4213  ;;  %v3076_v24 = vadd.f32 %v7464_v1, %v2883_v0  ;;  %v3181_v0 = vld [vmem:[%s4369_s19 + $0x8] sm:$0xff] }
 0x4db   : > { %v4216_v45 = vpop.eup %4215  ;;  %v2476_v12 = vadd.f32 %v2475_v39, %v2474_v32  ;;  %v8816_v39 = vld [vmem:[#allocation67_spill] sm:$0xff] }
 0x4dc   : > { %v2567_v51 = vmul.f32 %v2566_v26, %v2565_v46  ;;  %v4218_v42 = vpop.eup %4217  ;;  %v3765_v26 = vmul.f32 -1.442695, %v3076_v24  ;;  %v8819_v24 = vld [vmem:[#allocation87_spill] sm:$0xff] }
 0x4dd   : > { %3968 = vset.pattern.permute.xlu1 %v8814_v10  ;;  %v4220_v18 = vpop.eup %4219  ;;  %v3140_v57 = vadd.f32 1.0, %v4218_v42 }
 0x4de   : > { %4225 = vrcp.f32 %v2567_v51  ;;  %3971 = vset.pattern.permute.xlu0 %v4294_v5  ;;  %3256 = vperm.xlu1 %3968, %v4216_v45   ;;  %v4222_v55 = vpop.eup %4221 }
 0x4df   : > { %3469 = vperm.xlu0 %3971, %v4214_v23   ;;  %4227 = vpow2.f32 %v3761_v8  ;;  %v3143_v4 = vadd.f32 1.0, %v4222_v55 }
 0x4e0   : > { %4229 = vrcp.f32 %v3141_v28 }
 0x4e1   : > { %4231 = vpow2.f32 %v3764_v15 }
 0x4e2   : > { %3969 = vset.pattern.permute.xlu1 %v4294_v5  ;;  %4233 = vrcp.f32 %v3140_v57  ;;  %v3182_v57 = vld [vmem:[%s4369_s19 + $0x10] sm:$0xff] }
 0x4e3   : > { %3972 = vset.pattern.permute.xlu0 %v8814_v10  ;;  %3461 = vperm.xlu1 %3969, %v4216_v45   ;;  %v4224_v54 = vpop.eup %4223  ;;  %4235 = vpow2.f32 %v3763_v47 }
 0x4e4   : > { %3281 = vperm.xlu0 %3972, %v4220_v18   ;;  %4237 = vrcp.f32 %v3143_v4  ;;  %v3180_v4 = vld [vmem:[%s4369_s19] sm:$0xff] }
 0x4e5   : > { %4239 = vpow2.f32 %v3766_v44 }
 0x4e7   : > { %3473 = vperm.xlu1 %3969, %v4210_v17  }
 0x4e8   : > { %v4226_v11 = vpop.eup %4225  ;;  %3975 = vset.pattern.permute.xlu0 %v4294_v5 }
 0x4e9   : > { %v2569_v30 = vmul.f32 %v4226_v11, %v2476_v12  ;;  %3477 = vperm.xlu0 %3975, %v4224_v54   ;;  %v4228_v13 = vpop.eup %4227  ;;  %v8818_v11 = vld [vmem:[#allocation12_spill] sm:$0xff] }
 0x4ea   : > { %v4230_v34 = vpop.eup %4229  ;;  %v3142_v17 = vadd.f32 1.0, %v4228_v13 }
 0x4eb   : > { %v2571_v2 = vsel %vm2570_vm2, %v2569_v30, 0.0  ;;  %3970 = vset.pattern.permute.xlu1 %v8814_v10  ;;  %v4232_v46 = vpop.eup %4231  ;;  %v3391_v30 = vld [vmem:[%s4707_s22 + $0x18] sm:$0xff] }
 0x4ec   : > { %v2575_v33 = vrot.slane %v2571_v2, %v2574_v35  ;;  %3266 = vperm.xlu1 %3970, %v4214_v23   ;;  %v4234_v59 = vpop.eup %4233  ;;  %4241 = vrcp.f32 %v3142_v17  ;;  %v3145_v60 = vadd.f32 1.0, %v4232_v46  ;;  %v8820_v17 = vld [vmem:[#allocation91_spill] sm:$0xff] }
 0x4ed   : > { %3976 = vset.pattern.permute.xlu0 %v8814_v10  ;;  %v4236_v1 = vpop.eup %4235  ;;  %4243 = vpow2.f32 %v3765_v26  ;;  %v2580_v46 = vadd.f32 %v8820_v17, %v8819_v24  ;;  %v3184_v17 = vld [vmem:[%s4369_s19 + $0x20] sm:$0xff] }
 0x4ee   : > { %2576 = vst [vmem:[%s418_s23] sm:$0xff] %v2575_v33  ;;  %3291 = vperm.xlu0 %3976, %v4230_v34   ;;  %v4238_v22 = vpop.eup %4237  ;;  %4245 = vrcp.f32 %v3145_v60  ;;  %v3144_v51 = vadd.f32 1.0, %v4236_v1  ;;  %v3186_v1 = vld [vmem:[%s4369_s19 + $0x30] sm:$0xff] }
 0x4ef   : > { %v4240_v8 = vpop.eup %4239 }
 0x4f0   : > { %3973 = vset.pattern.permute.xlu1 %v4294_v5  ;;  %4247 = vrcp.f32 %v3144_v51  ;;  %v3147_v43 = vadd.f32 1.0, %v4240_v8 }
 0x4f1   : > { %3481 = vperm.xlu1 %3973, %v4220_v18   ;;  %v8815_v18 = vld [vmem:[#allocation92_spill] sm:$0xff] }
 0x4f2   : > { %3979 = vset.pattern.permute.xlu0 %v4294_v5  ;;  %4249 = vrcp.f32 %v3147_v43  ;;  %v2578_v56 = vadd.f32 %v8816_v39, %v8815_v18  ;;  %v3389_v43 = vld [vmem:[%s4707_s22 + $0x8] sm:$0xff]  ;;  %v3190_v18 = vld [vmem:[%s4369_s19 + $0x50] sm:$0xff]  ;;  %v3191_v39 = vld [vmem:[%s4369_s19 + $0x58] sm:$0xff] }
 0x4f3   : > { %3485 = vperm.xlu0 %3979, %v4234_v59  }
 0x4f4   : > { %v3214_v55 = vadd.f32 %v3182_v57, %v2578_v56  ;;  %v3422_v13 = vadd.f32 %v3390_v38, %v2578_v56  ;;  %v3423_v2 = vadd.f32 %v3391_v30, %v2578_v56 }
 0x4f5   : > { %3974 = vset.pattern.permute.xlu1 %v8814_v10 }
 0x4f6   : > { %3276 = vperm.xlu1 %3974, %v4224_v54   ;;  %v4242_v23 = vpop.eup %4241  ;;  %v3215_v54 = vadd.f32 %v3183_v53, %v2578_v56 }
 0x4f7   : > { %3980 = vset.pattern.permute.xlu0 %v8814_v10  ;;  %v4244_v45 = vpop.eup %4243 }
 0x4f8   : > { %3301 = vperm.xlu0 %3980, %v4238_v22   ;;  %v4246_v32 = vpop.eup %4245  ;;  %v3146_v28 = vadd.f32 1.0, %v4244_v45  ;;  %v3218_v45 = vadd.f32 %v3186_v1, %v2580_v46  ;;  %v7766_v1 = vadd.f32 %v7574_v14, %v7470_v48 }
 0x4fa   : > { %3977 = vset.pattern.permute.xlu1 %v4294_v5  ;;  %v4248_v7 = vpop.eup %4247  ;;  %4251 = vrcp.f32 %v3146_v28  ;;  %v7736_v28 = vadd.f32 %v7560_v61, %v7442_v63 }
 0x4fb   : > { %3489 = vperm.xlu1 %3977, %v4230_v34  }
 0x4fc   : > { %3983 = vset.pattern.permute.xlu0 %v4294_v5  ;;  %v4250_v42 = vpop.eup %4249  ;;  %v3222_v63 = vadd.f32 %v3190_v18, %v7736_v28  ;;  %v3223_v61 = vadd.f32 %v3191_v39, %v7736_v28 }
 0x4fd   : > { %3493 = vperm.xlu0 %3983, %v4242_v23  }
 0x4ff   : > { %3978 = vset.pattern.permute.xlu1 %v8814_v10 }
 0x500   : > { %3286 = vperm.xlu1 %3978, %v4234_v59  }
 0x501   : > { %3984 = vset.pattern.permute.xlu0 %v8814_v10 }
 0x502   : > { %3311 = vperm.xlu0 %3984, %v4246_v32  }
 0x504   : > { %3981 = vset.pattern.permute.xlu1 %v4294_v5  ;;  %v4252_v15 = vpop.eup %4251 }
 0x505   : > { %3497 = vperm.xlu1 %3981, %v4238_v22   ;;  %v3187_v22 = vld [vmem:[%s4369_s19 + $0x38] sm:$0xff] }
 0x506   : > { %3987 = vset.pattern.permute.xlu0 %v4294_v5 }
 0x507   : > { %3501 = vperm.xlu0 %3987, %v4248_v7  }
 0x509   : > { %3982 = vset.pattern.permute.xlu1 %v8814_v10 }
 0x50a   : > { %3296 = vperm.xlu1 %3982, %v4242_v23   ;;  %v3388_v23 = vld [vmem:[%s4707_s22] sm:$0xff] }
 0x50b   : > { %3988 = vset.pattern.permute.xlu0 %v8814_v10 }
 0x50c   : > { %3321 = vperm.xlu0 %3988, %v4250_v42  }
 0x50e   : > { %3985 = vset.pattern.permute.xlu1 %v4294_v5 }
 0x50f   : > { %3505 = vperm.xlu1 %3985, %v4246_v32   ;;  %v3219_v32 = vadd.f32 %v3187_v22, %v2580_v46 }
 0x510   : > { %3989 = vset.pattern.permute.xlu0 %v4294_v5 }
 0x511   : > { %3509 = vperm.xlu0 %3989, %v4252_v15  }
 0x513   : > { %3986 = vset.pattern.permute.xlu1 %v8814_v10 }
 0x514   : > { %3306 = vperm.xlu1 %3986, %v4248_v7  }
 0x518   : > { %3316 = vperm.xlu1 %3986, %v4252_v15  }
 0x51c   : > { %3990 = vset.pattern.permute.xlu1 %v4294_v5  ;;  %v8817_v5 = vld [vmem:[#allocation93_spill] sm:$0xff] }
 0x51d   : > { %3513 = vperm.xlu1 %3990, %v4250_v42   ;;  %v2577_v35 = vadd.f32 %v8818_v11, %v8817_v5 }
 0x51f   : > { %v3212_v33 = vadd.f32 %v3180_v4, %v2577_v35  ;;  %v3213_v44 = vadd.f32 %v3181_v0, %v2577_v35  ;;  %v3420_v7 = vadd.f32 %v3388_v23, %v2577_v35  ;;  %v3421_v42 = vadd.f32 %v3389_v43, %v2577_v35  ;;  %v8821_v0 = vld [vmem:[#allocation57_spill] sm:$0xff]  ;;  %v3194_v23 = vld [vmem:[%s4369_s19 + $0x70] sm:$0xff] }
 0x520   : > { %v7750_v35 = vadd.f32 %v7563_v16, %v7417_v62  ;;  %v3195_v43 = vld [vmem:[%s4369_s19 + $0x78] sm:$0xff]  ;;  %v3226_v48 = vadd.f32 %v3194_v23, %v7766_v1 }
 0x521   : > { %v3227_v14 = vadd.f32 %v3195_v43, %v7766_v1  ;;  %v3403_v23 = vld [vmem:[%s4707_s22 + $0x78] sm:$0xff]  ;;  %v3405_v43 = vld [vmem:[%s4707_s22 + $0x88] sm:$0xff] }
 0x54b   : > { %v3252_v10 = vpop.permute.xlu0 %3251 }
 0x54c   : > { %v3326_v12 = vmul.f32 %v3252_v10, %v3214_v55  ;;  %v3327_v47 = vmul.f32 %v3252_v10, %v3215_v54  ;;  %v3394_v55 = vld [vmem:[%s4707_s22 + $0x30] sm:$0xff]  ;;  %v3395_v54 = vld [vmem:[%s4707_s22 + $0x38] sm:$0xff] }
 0x54d   : > { %v3427_v5 = vadd.f32 %v3395_v54, %v2580_v46 }
 0x54e   : > { %3358 = vst [vmem:[%s7708_s25 + $0x10] sm:$0xff] %v3326_v12  ;;  %3359 = vst [vmem:[%s7708_s25 + $0x18] sm:$0xff] %v3327_v47  ;;  %v3426_v47 = vadd.f32 %v3394_v55, %v2580_v46  ;;  %v3185_v46 = vld [vmem:[%s4369_s19 + $0x28] sm:$0xff] }
 0x54f   : > { %v3247_v26 = vpop.permute.xlu1 %3246 }
 0x550   : > { %v3458_v34 = vpop.permute.xlu0 %3457  ;;  %v3324_v51 = vmul.f32 %v3247_v26, %v3212_v33  ;;  %v3325_v8 = vmul.f32 %v3247_v26, %v3213_v44  ;;  %v3396_v33 = vld [vmem:[%s4707_s22 + $0x40] sm:$0xff]  ;;  %v3397_v44 = vld [vmem:[%s4707_s22 + $0x48] sm:$0xff] }
 0x551   : > { %v3518_v59 = vmul.f32 %v3458_v34, %v3422_v13  ;;  %v3519_v60 = vmul.f32 %v3458_v34, %v3423_v2  ;;  %v8822_v13 = vld [vmem:[#allocation72_spill] sm:$0xff]  ;;  %v3428_v62 = vadd.f32 %v3396_v33, %v7750_v35  ;;  %v3429_v16 = vadd.f32 %v3397_v44, %v7750_v35 }
 0x552   : > { %3356 = vst [vmem:[%s7708_s25] sm:$0xff] %v3324_v51  ;;  %3357 = vst [vmem:[%s7708_s25 + $0x8] sm:$0xff] %v3325_v8  ;;  %v2579_v2 = vadd.f32 %v8822_v13, %v8821_v0  ;;  %v7797_v0 = vadd.f32 %v7586_v49, %v7490_v19 }
 0x553   : > { %3550 = vst [vmem:[%s7722_s28 + $0x10] sm:$0xff] %v3518_v59  ;;  %3551 = vst [vmem:[%s7722_s28 + $0x18] sm:$0xff] %v3519_v60 }
 0x554   : > { %v3454_v56 = vpop.permute.xlu1 %3453  ;;  %v3216_v26 = vadd.f32 %v3184_v17, %v2579_v2  ;;  %v3217_v59 = vadd.f32 %v3185_v46, %v2579_v2 }
 0x555   : > { %v3262_v15 = vpop.permute.xlu0 %3261  ;;  %v3516_v10 = vmul.f32 %v3454_v56, %v3420_v7  ;;  %v3517_v12 = vmul.f32 %v3454_v56, %v3421_v42  ;;  %v3392_v7 = vld [vmem:[%s4707_s22 + $0x20] sm:$0xff]  ;;  %v3393_v42 = vld [vmem:[%s4707_s22 + $0x28] sm:$0xff]  ;;  %v3398_v56 = vld [vmem:[%s4707_s22 + $0x50] sm:$0xff] }
 0x556   : > { %v3330_v57 = vmul.f32 %v3262_v15, %v3218_v45  ;;  %v3331_v53 = vmul.f32 %v3262_v15, %v3219_v32  ;;  %v3424_v15 = vadd.f32 %v3392_v7, %v2579_v2  ;;  %v3425_v18 = vadd.f32 %v3393_v42, %v2579_v2 }
 0x557   : > { %3548 = vst [vmem:[%s7722_s28] sm:$0xff] %v3516_v10  ;;  %3549 = vst [vmem:[%s7722_s28 + $0x8] sm:$0xff] %v3517_v12  ;;  %v3399_v10 = vld [vmem:[%s4707_s22 + $0x58] sm:$0xff]  ;;  %v3400_v12 = vld [vmem:[%s4707_s22 + $0x60] sm:$0xff] }
 0x558   : > { %3362 = vst [vmem:[%s7708_s25 + $0x30] sm:$0xff] %v3330_v57  ;;  %3363 = vst [vmem:[%s7708_s25 + $0x38] sm:$0xff] %v3331_v53  ;;  %v3466_v38 = vpop.permute.xlu1 %3465  ;;  %v7781_v57 = vadd.f32 %v7577_v40, %v7451_v9  ;;  %v3430_v9 = vadd.f32 %v3398_v56, %v7736_v28  ;;  %v3431_v40 = vadd.f32 %v3399_v10, %v7736_v28  ;;  %v3198_v28 = vld [vmem:[%s4369_s19 + $0x90] sm:$0xff] }
 0x559   : > { %v3272_v11 = vpop.permute.xlu0 %3271  ;;  %v3522_v34 = vmul.f32 %v3466_v38, %v3426_v47  ;;  %v3523_v24 = vmul.f32 %v3466_v38, %v3427_v5  ;;  %v3230_v49 = vadd.f32 %v3198_v28, %v7797_v0 }
 0x55a   : > { %v3334_v30 = vmul.f32 %v3272_v11, %v3222_v63  ;;  %v3335_v4 = vmul.f32 %v3272_v11, %v3223_v61  ;;  %v3401_v63 = vld [vmem:[%s4707_s22 + $0x68] sm:$0xff]  ;;  %v3432_v5 = vadd.f32 %v3400_v12, %v7781_v57 }
 0x55b   : > { %3554 = vst [vmem:[%s7722_s28 + $0x30] sm:$0xff] %v3522_v34  ;;  %3555 = vst [vmem:[%s7722_s28 + $0x38] sm:$0xff] %v3523_v24  ;;  %v3433_v11 = vadd.f32 %v3401_v63, %v7781_v57  ;;  %v3189_v34 = vld [vmem:[%s4369_s19 + $0x48] sm:$0xff]  ;;  %v3199_v24 = vld [vmem:[%s4369_s19 + $0x98] sm:$0xff] }
 0x55c   : > { %3366 = vst [vmem:[%s7708_s25 + $0x50] sm:$0xff] %v3334_v30  ;;  %3367 = vst [vmem:[%s7708_s25 + $0x58] sm:$0xff] %v3335_v4  ;;  %v3188_v4 = vld [vmem:[%s4369_s19 + $0x40] sm:$0xff]  ;;  %v3221_v19 = vadd.f32 %v3189_v34, %v7750_v35  ;;  %v3231_v46 = vadd.f32 %v3199_v24, %v7797_v0  ;;  %v7861_v34 = vadd.f32 %v7611_v36, %v7517_v27 }
 0x55d   : > { %v3257_v22 = vpop.permute.xlu1 %3256  ;;  %v3220_v17 = vadd.f32 %v3188_v4, %v7750_v35  ;;  %v3404_v35 = vld [vmem:[%s4707_s22 + $0x80] sm:$0xff] }
 0x55e   : > { %v3470_v60 = vpop.permute.xlu0 %3469  ;;  %v3328_v45 = vmul.f32 %v3257_v22, %v3216_v26  ;;  %v3329_v32 = vmul.f32 %v3257_v22, %v3217_v59  ;;  %v3402_v26 = vld [vmem:[%s4707_s22 + $0x70] sm:$0xff]  ;;  %v7813_v59 = vadd.f32 %v7589_v20, %v7477_v21  ;;  %v3435_v21 = vadd.f32 %v3403_v23, %v7766_v1 }
 0x55f   : > { %v3524_v51 = vmul.f32 %v3470_v60, %v3428_v62  ;;  %v3525_v8 = vmul.f32 %v3470_v60, %v3429_v16 }
 0x560   : > { %3360 = vst [vmem:[%s7708_s25 + $0x20] sm:$0xff] %v3328_v45  ;;  %3361 = vst [vmem:[%s7708_s25 + $0x28] sm:$0xff] %v3329_v32  ;;  %v3434_v45 = vadd.f32 %v3402_v26, %v7766_v1  ;;  %v3436_v20 = vadd.f32 %v3404_v35, %v7813_v59  ;;  %v3437_v32 = vadd.f32 %v3405_v43, %v7813_v59  ;;  %v3202_v1 = vld [vmem:[%s4369_s19 + $0xb0] sm:$0xff] }
 0x561   : > { %3556 = vst [vmem:[%s7722_s28 + $0x40] sm:$0xff] %v3524_v51  ;;  %3557 = vst [vmem:[%s7722_s28 + $0x48] sm:$0xff] %v3525_v8 }
 0x562   : > { %v3462_v53 = vpop.permute.xlu1 %3461 }
 0x563   : > { %v3282_v39 = vpop.permute.xlu0 %3281  ;;  %v3520_v61 = vmul.f32 %v3462_v53, %v3424_v15  ;;  %v3521_v47 = vmul.f32 %v3462_v53, %v3425_v18  ;;  %v3193_v53 = vld [vmem:[%s4369_s19 + $0x68] sm:$0xff] }
 0x564   : > { %v3338_v55 = vmul.f32 %v3282_v39, %v3226_v48  ;;  %v3339_v54 = vmul.f32 %v3282_v39, %v3227_v14  ;;  %v3192_v48 = vld [vmem:[%s4369_s19 + $0x60] sm:$0xff]  ;;  %v7829_v14 = vadd.f32 %v7600_v50, %v7507_v6  ;;  %v3225_v6 = vadd.f32 %v3193_v53, %v7781_v57 }
 0x565   : > { %3552 = vst [vmem:[%s7722_s28 + $0x20] sm:$0xff] %v3520_v61  ;;  %3553 = vst [vmem:[%s7722_s28 + $0x28] sm:$0xff] %v3521_v47  ;;  %v3406_v61 = vld [vmem:[%s4707_s22 + $0x90] sm:$0xff]  ;;  %v7845_v47 = vadd.f32 %v7603_v41, %v7497_v52 }
 0x566   : > { %3370 = vst [vmem:[%s7708_s25 + $0x70] sm:$0xff] %v3338_v55  ;;  %3371 = vst [vmem:[%s7708_s25 + $0x78] sm:$0xff] %v3339_v54  ;;  %v3474_v38 = vpop.permute.xlu1 %3473  ;;  %v3203_v55 = vld [vmem:[%s4369_s19 + $0xb8] sm:$0xff]  ;;  %v3224_v54 = vadd.f32 %v3192_v48, %v7781_v57  ;;  %v3234_v50 = vadd.f32 %v3202_v1, %v7829_v14  ;;  %v3408_v57 = vld [vmem:[%s4707_s22 + $0xa0] sm:$0xff]  ;;  %v3438_v4 = vadd.f32 %v3406_v61, %v7797_v0 }
 0x567   : > { %v3526_v13 = vmul.f32 %v3474_v38, %v3430_v9  ;;  %v3527_v2 = vmul.f32 %v3474_v38, %v3431_v40  ;;  %v3235_v10 = vadd.f32 %v3203_v55, %v7829_v14  ;;  %v3407_v38 = vld [vmem:[%s4707_s22 + $0x98] sm:$0xff]  ;;  %v3440_v41 = vadd.f32 %v3408_v57, %v7845_v47  ;;  %v3200_v48 = vld [vmem:[%s4369_s19 + $0xa0] sm:$0xff]  ;;  %v3201_v1 = vld [vmem:[%s4369_s19 + $0xa8] sm:$0xff] }
 0x568   : > { %v3478_v30 = vpop.permute.xlu0 %3477  ;;  %v3439_v52 = vadd.f32 %v3407_v38, %v7797_v0  ;;  %v3206_v0 = vld [vmem:[%s4369_s19 + $0xd0] sm:$0xff]  ;;  %v3211_v55 = vld [vmem:[%s4369_s19 + $0xf8] sm:$0xff]  ;;  %v3416_v38 = vld [vmem:[%s4707_s22 + $0xe0] sm:$0xff] }
 0x569   : > { %v3528_v33 = vmul.f32 %v3478_v30, %v3432_v5  ;;  %v3529_v44 = vmul.f32 %v3478_v30, %v3433_v11  ;;  %3558 = vst [vmem:[%s7722_s28 + $0x50] sm:$0xff] %v3526_v13  ;;  %3559 = vst [vmem:[%s7722_s28 + $0x58] sm:$0xff] %v3527_v2  ;;  %v3409_v30 = vld [vmem:[%s4707_s22 + $0xa8] sm:$0xff]  ;;  %v3238_v36 = vadd.f32 %v3206_v0, %v7861_v34 }
 0x56a   : > { %v3441_v13 = vadd.f32 %v3409_v30, %v7845_v47 }
 0x56b   : > { %3560 = vst [vmem:[%s7722_s28 + $0x60] sm:$0xff] %v3528_v33  ;;  %3561 = vst [vmem:[%s7722_s28 + $0x68] sm:$0xff] %v3529_v44  ;;  %v3267_v62 = vpop.permute.xlu1 %3266  ;;  %v3196_v44 = vld [vmem:[%s4369_s19 + $0x80] sm:$0xff] }
 0x56c   : > { %v3332_v60 = vmul.f32 %v3267_v62, %v3220_v17  ;;  %v3333_v22 = vmul.f32 %v3267_v62, %v3221_v19  ;;  %v3228_v62 = vadd.f32 %v3196_v44, %v7813_v59  ;;  %v3204_v44 = vld [vmem:[%s4369_s19 + $0xc0] sm:$0xff] }
 0x56d   : > { %v3292_v16 = vpop.permute.xlu0 %3291 }
 0x56e   : > { %v3342_v51 = vmul.f32 %v3292_v16, %v3230_v49  ;;  %v3343_v8 = vmul.f32 %v3292_v16, %v3231_v46  ;;  %3364 = vst [vmem:[%s7708_s25 + $0x40] sm:$0xff] %v3332_v60  ;;  %3365 = vst [vmem:[%s7708_s25 + $0x48] sm:$0xff] %v3333_v22  ;;  %v3197_v49 = vld [vmem:[%s4369_s19 + $0x88] sm:$0xff]  ;;  %v3207_v46 = vld [vmem:[%s4369_s19 + $0xd8] sm:$0xff] }
 0x56f   : > { %v3229_v27 = vadd.f32 %v3197_v49, %v7813_v59  ;;  %v3239_v16 = vadd.f32 %v3207_v46, %v7861_v34  ;;  %v3410_v22 = vld [vmem:[%s4707_s22 + $0xb0] sm:$0xff]  ;;  %v3412_v59 = vld [vmem:[%s4707_s22 + $0xc0] sm:$0xff]  ;;  %v3209_v49 = vld [vmem:[%s4369_s19 + $0xe8] sm:$0xff] }
 0x570   : > { %3374 = vst [vmem:[%s7708_s25 + $0x90] sm:$0xff] %v3342_v51  ;;  %3375 = vst [vmem:[%s7708_s25 + $0x98] sm:$0xff] %v3343_v8  ;;  %v3482_v7 = vpop.permute.xlu1 %3481  ;;  %v7877_v51 = vadd.f32 %v7614_v3, %v7510_v37 }
 0x571   : > { %v3530_v15 = vmul.f32 %v3482_v7, %v3434_v45  ;;  %v3531_v18 = vmul.f32 %v3482_v7, %v3435_v21  ;;  %v3411_v45 = vld [vmem:[%s4707_s22 + $0xb8] sm:$0xff]  ;;  %v3413_v21 = vld [vmem:[%s4707_s22 + $0xc8] sm:$0xff] }
 0x572   : > { %v3486_v42 = vpop.permute.xlu0 %3485  ;;  %v3443_v37 = vadd.f32 %v3411_v45, %v7829_v14  ;;  %v3444_v3 = vadd.f32 %v3412_v59, %v7877_v51 }
 0x573   : > { %v3532_v39 = vmul.f32 %v3486_v42, %v3436_v20  ;;  %v3533_v56 = vmul.f32 %v3486_v42, %v3437_v32  ;;  %3562 = vst [vmem:[%s7722_s28 + $0x70] sm:$0xff] %v3530_v15  ;;  %3563 = vst [vmem:[%s7722_s28 + $0x78] sm:$0xff] %v3531_v18  ;;  %v3442_v20 = vadd.f32 %v3410_v22, %v7829_v14  ;;  %v3210_v14 = vld [vmem:[%s4369_s19 + $0xf0] sm:$0xff]  ;;  %v3419_v22 = vld [vmem:[%s4707_s22 + $0xf8] sm:$0xff] }
 0x574   : > { %v3445_v32 = vadd.f32 %v3413_v21, %v7877_v51  ;;  %v7893_v15 = vadd.f32 %v7626_v58, %v7539_v29  ;;  %v3233_v29 = vadd.f32 %v3201_v1, %v7845_v47 }
 0x575   : > { %3564 = vst [vmem:[%s7722_s28 + $0x80] sm:$0xff] %v3532_v39  ;;  %3565 = vst [vmem:[%s7722_s28 + $0x88] sm:$0xff] %v3533_v56  ;;  %v3277_v12 = vpop.permute.xlu1 %3276 }
 0x576   : > { %v3336_v9 = vmul.f32 %v3277_v12, %v3224_v54  ;;  %v3337_v40 = vmul.f32 %v3277_v12, %v3225_v6  ;;  %v3232_v54 = vadd.f32 %v3200_v48, %v7845_v47  ;;  %v3242_v58 = vadd.f32 %v3210_v14, %v7893_v15  ;;  %v3414_v12 = vld [vmem:[%s4707_s22 + $0xd0] sm:$0xff]  ;;  %v3417_v47 = vld [vmem:[%s4707_s22 + $0xe8] sm:$0xff] }
 0x577   : > { %v3302_v63 = vpop.permute.xlu0 %3301  ;;  %v3243_v6 = vadd.f32 %v3211_v55, %v7893_v15  ;;  %v3446_v57 = vadd.f32 %v3414_v12, %v7861_v34 }
 0x578   : > { %v3346_v5 = vmul.f32 %v3302_v63, %v3234_v50  ;;  %v3347_v11 = vmul.f32 %v3302_v63, %v3235_v10  ;;  %3368 = vst [vmem:[%s7708_s25 + $0x60] sm:$0xff] %v3336_v9  ;;  %3369 = vst [vmem:[%s7708_s25 + $0x68] sm:$0xff] %v3337_v40  ;;  %v2591_v63 = vadd.f32 %v7629_v25, %v7526_v31 }
 0x57a   : > { %3378 = vst [vmem:[%s7708_s25 + $0xb0] sm:$0xff] %v3346_v5  ;;  %3379 = vst [vmem:[%s7708_s25 + $0xb8] sm:$0xff] %v3347_v11  ;;  %v3490_v2 = vpop.permute.xlu1 %3489  ;;  %v3415_v11 = vld [vmem:[%s4707_s22 + $0xd8] sm:$0xff]  ;;  %v3448_v25 = vadd.f32 %v3416_v38, %v2591_v63  ;;  %v3449_v30 = vadd.f32 %v3417_v47, %v2591_v63 }
 0x57b   : > { %v3534_v28 = vmul.f32 %v3490_v2, %v3438_v4  ;;  %v3535_v24 = vmul.f32 %v3490_v2, %v3439_v52  ;;  %v3447_v31 = vadd.f32 %v3415_v11, %v7861_v34  ;;  %v3236_v34 = vadd.f32 %v3204_v44, %v7877_v51 }
 0x57c   : > { %v3494_v33 = vpop.permute.xlu0 %3493 }
 0x57d   : > { %v3536_v17 = vmul.f32 %v3494_v33, %v3440_v41  ;;  %v3537_v19 = vmul.f32 %v3494_v33, %v3441_v13  ;;  %3566 = vst [vmem:[%s7722_s28 + $0x90] sm:$0xff] %v3534_v28  ;;  %3567 = vst [vmem:[%s7722_s28 + $0x98] sm:$0xff] %v3535_v24  ;;  %v3205_v28 = vld [vmem:[%s4369_s19 + $0xc8] sm:$0xff] }
 0x57e   : > { %v3237_v24 = vadd.f32 %v3205_v28, %v7877_v51 }
 0x57f   : > { %3568 = vst [vmem:[%s7722_s28 + $0xa0] sm:$0xff] %v3536_v17  ;;  %3569 = vst [vmem:[%s7722_s28 + $0xa8] sm:$0xff] %v3537_v19  ;;  %v3287_v26 = vpop.permute.xlu1 %3286  ;;  %v3208_v19 = vld [vmem:[%s4369_s19 + $0xe0] sm:$0xff] }
 0x580   : > { %v3340_v8 = vmul.f32 %v3287_v26, %v3228_v62  ;;  %v3341_v23 = vmul.f32 %v3287_v26, %v3229_v27  ;;  %v3240_v62 = vadd.f32 %v3208_v19, %v2591_v63  ;;  %v3241_v27 = vadd.f32 %v3209_v49, %v2591_v63 }
 0x581   : > { %v3312_v60 = vpop.permute.xlu0 %3311 }
 0x582   : > { %v3350_v35 = vmul.f32 %v3312_v60, %v3238_v36  ;;  %v3351_v43 = vmul.f32 %v3312_v60, %v3239_v16  ;;  %3372 = vst [vmem:[%s7708_s25 + $0x80] sm:$0xff] %v3340_v8  ;;  %3373 = vst [vmem:[%s7708_s25 + $0x88] sm:$0xff] %v3341_v23  ;;  %v3418_v60 = vld [vmem:[%s4707_s22 + $0xf0] sm:$0xff]  ;;  %v3451_v8 = vadd.f32 %v3419_v22, %v7893_v15 }
 0x583   : > { %v3450_v51 = vadd.f32 %v3418_v60, %v7893_v15 }
 0x584   : > { %3382 = vst [vmem:[%s7708_s25 + $0xd0] sm:$0xff] %v3350_v35  ;;  %3383 = vst [vmem:[%s7708_s25 + $0xd8] sm:$0xff] %v3351_v43  ;;  %v3498_v7 = vpop.permute.xlu1 %3497 }
 0x585   : > { %v3538_v18 = vmul.f32 %v3498_v7, %v3442_v20  ;;  %v3539_v39 = vmul.f32 %v3498_v7, %v3443_v37 }
 0x586   : > { %v3502_v42 = vpop.permute.xlu0 %3501 }
 0x587   : > { %v3540_v56 = vmul.f32 %v3502_v42, %v3444_v3  ;;  %v3541_v53 = vmul.f32 %v3502_v42, %v3445_v32  ;;  %3570 = vst [vmem:[%s7722_s28 + $0xb0] sm:$0xff] %v3538_v18  ;;  %3571 = vst [vmem:[%s7722_s28 + $0xb8] sm:$0xff] %v3539_v39 }
 0x589   : > { %3572 = vst [vmem:[%s7722_s28 + $0xc0] sm:$0xff] %v3540_v56  ;;  %3573 = vst [vmem:[%s7722_s28 + $0xc8] sm:$0xff] %v3541_v53  ;;  %v3297_v50 = vpop.permute.xlu1 %3296 }
 0x58a   : > { %v3344_v61 = vmul.f32 %v3297_v50, %v3232_v54  ;;  %v3345_v9 = vmul.f32 %v3297_v50, %v3233_v29 }
 0x58b   : > { %v3322_v10 = vpop.permute.xlu0 %3321 }
 0x58c   : > { %v3354_v40 = vmul.f32 %v3322_v10, %v3242_v58  ;;  %v3355_v5 = vmul.f32 %v3322_v10, %v3243_v6  ;;  %3376 = vst [vmem:[%s7708_s25 + $0xa0] sm:$0xff] %v3344_v61  ;;  %3377 = vst [vmem:[%s7708_s25 + $0xa8] sm:$0xff] %v3345_v9 }
 0x58e   : > { %3386 = vst [vmem:[%s7708_s25 + $0xf0] sm:$0xff] %v3354_v40  ;;  %3387 = vst [vmem:[%s7708_s25 + $0xf8] sm:$0xff] %v3355_v5  ;;  %v3506_v4 = vpop.permute.xlu1 %3505 }
 0x58f   : > { %v3542_v41 = vmul.f32 %v3506_v4, %v3446_v57  ;;  %v3543_v13 = vmul.f32 %v3506_v4, %v3447_v31 }
 0x590   : > { %v3510_v52 = vpop.permute.xlu0 %3509 }
 0x591   : > { %v3544_v2 = vmul.f32 %v3510_v52, %v3448_v25  ;;  %v3545_v33 = vmul.f32 %v3510_v52, %v3449_v30  ;;  %3574 = vst [vmem:[%s7722_s28 + $0xd0] sm:$0xff] %v3542_v41  ;;  %3575 = vst [vmem:[%s7722_s28 + $0xd8] sm:$0xff] %v3543_v13 }
 0x593   : > { %3576 = vst [vmem:[%s7722_s28 + $0xe0] sm:$0xff] %v3544_v2  ;;  %3577 = vst [vmem:[%s7722_s28 + $0xe8] sm:$0xff] %v3545_v33  ;;  %v3307_v17 = vpop.permute.xlu1 %3306 }
 0x594   : > { %v3348_v0 = vmul.f32 %v3307_v17, %v3236_v34  ;;  %v3349_v46 = vmul.f32 %v3307_v17, %v3237_v24 }
 0x596   : > { %3380 = vst [vmem:[%s7708_s25 + $0xc0] sm:$0xff] %v3348_v0  ;;  %3381 = vst [vmem:[%s7708_s25 + $0xc8] sm:$0xff] %v3349_v46 }
 0x597   : > { %v3317_v36 = vpop.permute.xlu1 %3316 }
 0x598   : > { %v3352_v16 = vmul.f32 %v3317_v36, %v3240_v62  ;;  %v3353_v26 = vmul.f32 %v3317_v36, %v3241_v27 }
 0x59a   : > { %3384 = vst [vmem:[%s7708_s25 + $0xe0] sm:$0xff] %v3352_v16  ;;  %3385 = vst [vmem:[%s7708_s25 + $0xe8] sm:$0xff] %v3353_v26 }
 0x59c   : > { %v3514_v23 = vpop.permute.xlu1 %3513 }
 0x59d   : > { %v3546_v35 = vmul.f32 %v3514_v23, %v3450_v51  ;;  %v3547_v43 = vmul.f32 %v3514_v23, %v3451_v8 }
 0x59f   : > { %3578 = vst [vmem:[%s7722_s28 + $0xf0] sm:$0xff] %v3546_v35  ;;  %3579 = vst [vmem:[%s7722_s28 + $0xf8] sm:$0xff] %v3547_v43 }
 0x5a0 PF: > { %s21_s13 = sadd.s32 1, %s4291_s13  }
 0x5a1   : > { %p18_p5 = scmp.ge.s32.totalorder %s21_s13, 4  }
 0x5a3   :  { %20 = sbr.rel (!%p18_p5) target bundleno = 1 (0x1), region = 109 }

</bundles_post_ra>
